<compile_context>
chip_gen: v6e
topology: v6e:2x2x1
jax: 0.10.0
libtpu: 0.0.40
codegen_flags: <defaults>
</compile_context>

<pallas_src>
import numpy as np
import jax
import jax.numpy as jnp
from jax import lax
from jax.experimental import pallas as pl
from jax.experimental.pallas import tpu as pltpu

SIGMA = 25.0          # marginal_prob_std(t) = sqrt((sigma^(2t) - 1) / (2 ln sigma))
MAX_TILE_B = 2048     # lane-tile cap so huge batches still pipeline through VMEM


def _round_up(n, m):
    return ((n + m - 1) // m) * m


def _swish(v):
    return v * jax.nn.sigmoid(v)


def _num_tensorcores():
    """Best-effort TensorCore count of device 0 (v7x: 2, v5e/v6e: 1)."""
    try:
        d = jax.devices()[0]
        for attr in ("num_cores", "core_count"):
            n = getattr(d, attr, None)
            if isinstance(n, int) and n > 0:
                return n
        if "v7" in str(getattr(d, "device_kind", "")).lower():
            return 2
    except Exception:
        pass
    return 1


def scorenet_kernel(t_ref, x_ref,
                    wfh_ref,                    # half Fourier weights * 2pi   (E/2, 1)
                    wes_ref, wec_ref, be_ref,   # embed Linear split (E, E/2)x2, bias (E, 1)
                    w1_ref, b1_ref,             # fc1 (H, D), (H, 1)
                    w2_ref, b2_ref,             # fc2 (H, H), (H, 1)
                    w3_ref, b3_ref,             # fc3 (D, H), (D, 1)
                    out_ref):
    t = t_ref[...]                               # (1, TB)
    x = x_ref[...]                               # (D, TB)

    # --- Gaussian Fourier features: only E/2 sin and E/2 cos (no dup+select) ---
    proj = wfh_ref[...] * t                      # (E/2, TB)
    sin_h = jnp.sin(proj)
    cos_h = jnp.cos(proj)

    # --- time embedding: swish(we @ [sin; cos] + be), we pre-split by halves ---
    emb = (jnp.dot(wes_ref[...], sin_h, preferred_element_type=jnp.float32)
           + jnp.dot(wec_ref[...], cos_h, preferred_element_type=jnp.float32)
           + be_ref[...])
    embed = _swish(emb)                          # (E, TB)

    # --- MLP trunk, feature-major (batch on lanes).  Biases are added inside
    # the pre-activation expressions so no extra (H, TB) intermediates stay
    # live across the w1/w2 matmuls. --------------------------------------
    h1 = _swish(jnp.dot(w1_ref[...], x,
                        preferred_element_type=jnp.float32) + embed + b1_ref[...])
    h2 = _swish(jnp.dot(w2_ref[...], h1,
                        preferred_element_type=jnp.float32) + embed + b2_ref[...])
    h3 = jnp.dot(w3_ref[...], h2,
                 preferred_element_type=jnp.float32) + b3_ref[...]          # (D, TB)

    # --- divide by marginal_prob_std(t): rsqrt + multiply (single store) ----
    log_sigma = jnp.float32(np.log(SIGMA))
    var = (jnp.exp(2.0 * t * log_sigma) - 1.0) / (2.0 * log_sigma)          # (1, TB)
    out_ref[...] = h3 * lax.rsqrt(var)


def scorenet_forward_feature_major(params, x_fm, t_row, num_tiles=1):
    """Feature-major entry point (no pad/transpose plumbing).

    x_fm: (D, B_pad) f32, t_row: (1, B_pad) f32 -> (D, B_pad) f32.
    B_pad must be a multiple of 128 * num_tiles.  Padded columns of t_row must
    be finite and > 0 (use 1.0) so rsqrt(var) stays finite.
    """
    D, B_pad = x_fm.shape
    E = params["we"].shape[0]
    Eh = E // 2
    H = params["w1"].shape[0]
    assert B_pad % (128 * num_tiles) == 0
    tile_b = B_pad // num_tiles

    batch_map = lambda i: (0, i)   # stream over batch tiles
    fixed_map = lambda i: (0, 0)   # weights/biases stay VMEM-resident
    # NOTE: weights keep default buffering; with a constant index_map they are
    # only fetched once and their VMEM footprint is negligible here.

    args = (t_row, x_fm,
            params["wfh2"],
            params["we_sin"], params["we_cos"], params["be"],
            params["w1"], params["b1"],
            params["w2"], params["b2"],
            params["w3"], params["b3"])

    in_specs = [
        pl.BlockSpec((1, tile_b), batch_map),   # t
        pl.BlockSpec((D, tile_b), batch_map),   # x (feature-major)
        pl.BlockSpec((Eh, 1), fixed_map),       # wfh2
        pl.BlockSpec((E, Eh), fixed_map),       # we_sin
        pl.BlockSpec((E, Eh), fixed_map),       # we_cos
        pl.BlockSpec((E, 1), fixed_map),        # be
        pl.BlockSpec((H, D), fixed_map),        # w1
        pl.BlockSpec((H, 1), fixed_map),        # b1
        pl.BlockSpec((H, H), fixed_map),        # w2
        pl.BlockSpec((H, 1), fixed_map),        # b2
        pl.BlockSpec((D, H), fixed_map),        # w3
        pl.BlockSpec((D, 1), fixed_map),        # b3
    ]
    out_spec = pl.BlockSpec((D, tile_b), batch_map)

    return pl.pallas_call(
        scorenet_kernel,
        out_shape=jax.ShapeDtypeStruct((D, B_pad), jnp.float32),
        grid=(num_tiles,),
        in_specs=in_specs,
        out_specs=out_spec,
        compiler_params=pltpu.CompilerParams(
            dimension_semantics=("parallel",)),
    )(*args)


def scorenet_forward(params, x, t, num_tiles=None):
    """Batch-major convenience wrapper. x: (B, D) f32, t: (B,) f32 -> (B, D)."""
    B, D = x.shape

    if num_tiles is None:
        cores = _num_tensorcores()
        # Single grid step on single-TC chips (v5e/v6e); one balanced tile per
        # TensorCore on dual-TC chips (v7x).  Cap tile size for huge batches.
        num_tiles = cores if (cores > 1 and B > 128) else 1
        num_tiles = max(num_tiles, -(-B // MAX_TILE_B))
    num_tiles = max(1, int(num_tiles))

    # Pad only to a multiple of 128 * num_tiles (lane width x tile count).
    B_pad = _round_up(max(B, 1), 128 * num_tiles)
    pad = B_pad - B

    # Single fused pad(+transpose) per input.  Padded t columns are 1.0 so the
    # (sliced-away) padded lanes stay finite through rsqrt(var).
    x_fm = jnp.pad(x.astype(jnp.float32).T, ((0, 0), (0, pad)))
    t_row = jnp.pad(t.astype(jnp.float32)[None, :], ((0, 0), (0, pad)),
                    constant_values=1.0)

    out_fm = scorenet_forward_feature_major(params, x_fm, t_row, num_tiles)
    return out_fm[:, :B].T


def init_params(key, input_dim=7, hidden_dim=32, embed_dim=32, scale=30.0):
    """Deterministic synthetic parameters matching ScoreNet.__init__ shapes.

    Weights are stored in PyTorch's native (out, in) layout; biases as (out, 1).
    The embed Linear is additionally pre-split into sin/cos halves and the
    half-size Fourier weight is pre-scaled by 2*pi for the kernel.
    """
    assert hidden_dim == embed_dim, "h += embed requires hidden_dim == embed_dim"
    assert embed_dim % 2 == 0
    ks = jax.random.split(key, 9)
    half = embed_dim // 2

    def lin(kw, kb, fan_in, fan_out):
        bound = 1.0 / np.sqrt(fan_in)
        w = jax.random.uniform(kw, (fan_out, fan_in), jnp.float32, -bound, bound)
        b = jax.random.uniform(kb, (fan_out, 1), jnp.float32, -bound, bound)
        return w, b

    wf = jax.random.normal(ks[0], (half,), jnp.float32) * scale
    wfh2 = (wf.reshape(half, 1) * (2.0 * np.pi)).astype(jnp.float32)
    we, be = lin(ks[1], ks[2], embed_dim, embed_dim)
    we_sin = we[:, :half]          # multiplies the sin(x_proj) half
    we_cos = we[:, half:]          # multiplies the cos(x_proj) half
    w1, b1 = lin(ks[3], ks[4], input_dim, hidden_dim)
    w2, b2 = lin(ks[5], ks[6], hidden_dim, hidden_dim)
    w3, b3 = lin(ks[7], ks[8], hidden_dim, input_dim)
    return dict(wf=wf, wfh2=wfh2, we=we, we_sin=we_sin, we_cos=we_cos, be=be,
                w1=w1, b1=b1, w2=w2, b2=b2, w3=w3, b3=b3)


def scorenet_reference(params, x, t):
    """Pure-JAX reference mirroring the PyTorch forward (batch-major)."""
    t2d = t[:, None]
    x_proj = t2d * params["wf"][None, :] * 2.0 * np.pi
    fourier = jnp.concatenate([jnp.sin(x_proj), jnp.cos(x_proj)], axis=-1)
    emb = fourier @ params["we"].T + params["be"][:, 0]
    embed = emb * jax.nn.sigmoid(emb)
    h1 = x @ params["w1"].T + params["b1"][:, 0] + embed
    h1 = h1 * jax.nn.sigmoid(h1)
    h2 = h1 @ params["w2"].T + params["b2"][:, 0] + embed
    h2 = h2 * jax.nn.sigmoid(h2)
    h3 = h2 @ params["w3"].T + params["b3"][:, 0]
    log_sigma = np.log(SIGMA)
    std = jnp.sqrt((SIGMA ** (2.0 * t2d) - 1.0) / (2.0 * log_sigma))
    return h3 / std


if __name__ == "__main__":
    key = jax.random.PRNGKey(0)
    k_params, k_x1, k_t1, k_x2, k_t2 = jax.random.split(key, 5)

    INPUT_DIM, HIDDEN, EMBED = 7, 32, 32
    params = init_params(k_params, input_dim=INPUT_DIM,
                         hidden_dim=HIDDEN, embed_dim=EMBED)

    # Case 1: B=640 (already a 128-multiple -> zero padding), auto tile count.
    B1 = 640
    x1 = jax.random.normal(k_x1, (B1, INPUT_DIM), jnp.float32)
    t1 = jax.random.uniform(k_t1, (B1,), jnp.float32, 1e-3, 1.0)
    out1 = jax.block_until_ready(scorenet_forward(params, x1, t1))
    ref1 = scorenet_reference(params, x1, t1)
    np.testing.assert_allclose(np.asarray(out1), np.asarray(ref1),
                               rtol=1e-4, atol=1e-4)

    # Case 2: small ragged batch (exercises lane padding; padded t columns = 1.0).
    B2 = 37
    x2 = jax.random.normal(k_x2, (B2, INPUT_DIM), jnp.float32)
    t2 = jax.random.uniform(k_t2, (B2,), jnp.float32, 1e-3, 1.0)
    out2 = jax.block_until_ready(scorenet_forward(params, x2, t2))
    ref2 = scorenet_reference(params, x2, t2)
    np.testing.assert_allclose(np.asarray(out2), np.asarray(ref2),
                               rtol=1e-4, atol=1e-4)

    # Case 3: forced 2 "parallel" tiles (multi-step / dual-TensorCore path).
    out3 = jax.block_until_ready(scorenet_forward(params, x1, t1, num_tiles=2))
    np.testing.assert_allclose(np.asarray(out3), np.asarray(ref1),
                               rtol=1e-4, atol=1e-4)

    print("KERNEL_OK")
</pallas_src>

<mosaic_0001>
module attributes {stable_mosaic.version = 11 : i64} {
  func.func @scorenet_kernel(%arg0: i32, %arg1: memref<1x640xf32, #tpu.memory_space<vmem>>, %arg2: memref<7x640xf32, #tpu.memory_space<vmem>>, %arg3: memref<16x1xf32, #tpu.memory_space<vmem>>, %arg4: memref<32x16xf32, #tpu.memory_space<vmem>>, %arg5: memref<32x16xf32, #tpu.memory_space<vmem>>, %arg6: memref<32x1xf32, #tpu.memory_space<vmem>>, %arg7: memref<32x7xf32, #tpu.memory_space<vmem>>, %arg8: memref<32x1xf32, #tpu.memory_space<vmem>>, %arg9: memref<32x32xf32, #tpu.memory_space<vmem>>, %arg10: memref<32x1xf32, #tpu.memory_space<vmem>>, %arg11: memref<7x32xf32, #tpu.memory_space<vmem>>, %arg12: memref<7x1xf32, #tpu.memory_space<vmem>>, %arg13: memref<7x640xf32, #tpu.memory_space<vmem>>) attributes {dimension_semantics = [#tpu.dimension_semantics<parallel>], iteration_bounds = array<i64: 1>, scalar_prefetch = 0 : i64, scratch_operands = 0 : i64, tpu.core_type = #tpu.core_type<tc>, window_params = [{transform_indices = @transform_0, window_bounds = array<i64: 1, 640>}, {transform_indices = @transform_1, window_bounds = array<i64: 7, 640>}, {pipeline_mode = #tpu.pipeline_mode<synchronous>, transform_indices = @transform_2, window_bounds = array<i64: 16, 1>}, {pipeline_mode = #tpu.pipeline_mode<synchronous>, transform_indices = @transform_3, window_bounds = array<i64: 32, 16>}, {pipeline_mode = #tpu.pipeline_mode<synchronous>, transform_indices = @transform_4, window_bounds = array<i64: 32, 16>}, {pipeline_mode = #tpu.pipeline_mode<synchronous>, transform_indices = @transform_5, window_bounds = array<i64: 32, 1>}, {pipeline_mode = #tpu.pipeline_mode<synchronous>, transform_indices = @transform_6, window_bounds = array<i64: 32, 7>}, {pipeline_mode = #tpu.pipeline_mode<synchronous>, transform_indices = @transform_7, window_bounds = array<i64: 32, 1>}, {pipeline_mode = #tpu.pipeline_mode<synchronous>, transform_indices = @transform_8, window_bounds = array<i64: 32, 32>}, {pipeline_mode = #tpu.pipeline_mode<synchronous>, transform_indices = @transform_9, window_bounds = array<i64: 32, 1>}, {pipeline_mode = #tpu.pipeline_mode<synchronous>, transform_indices = @transform_10, window_bounds = array<i64: 7, 32>}, {pipeline_mode = #tpu.pipeline_mode<synchronous>, transform_indices = @transform_11, window_bounds = array<i64: 7, 1>}, {transform_indices = @transform_12, window_bounds = array<i64: 7, 640>}]} {
    %c0 = arith.constant 0 : index
    %c0_0 = arith.constant 0 : index
    %0 = vector.load %arg1[%c0, %c0_0] : memref<1x640xf32, #tpu.memory_space<vmem>>, vector<1x640xf32>
    %c0_1 = arith.constant 0 : index
    %c0_2 = arith.constant 0 : index
    %1 = vector.load %arg2[%c0_1, %c0_2] : memref<7x640xf32, #tpu.memory_space<vmem>>, vector<7x640xf32>
    %c0_3 = arith.constant 0 : index
    %c0_4 = arith.constant 0 : index
    %2 = vector.load %arg3[%c0_3, %c0_4] : memref<16x1xf32, #tpu.memory_space<vmem>>, vector<16x1xf32>
    %3 = vector.broadcast %2 : vector<16x1xf32> to vector<16x640xf32>
    %4 = vector.broadcast %0 : vector<1x640xf32> to vector<16x640xf32>
    %5 = arith.mulf %3, %4 : vector<16x640xf32>
    %6 = math.sin %5 : vector<16x640xf32>
    %7 = math.cos %5 : vector<16x640xf32>
    %c0_5 = arith.constant 0 : index
    %c0_6 = arith.constant 0 : index
    %8 = vector.load %arg4[%c0_5, %c0_6] : memref<32x16xf32, #tpu.memory_space<vmem>>, vector<32x16xf32>
    %cst = arith.constant dense<0.000000e+00> : vector<32x640xf32>
    %9 = tpu.matmul %8, %6, %cst {dimension_numbers = #tpu.dot_dimension_numbers<[1], [0], [0], [1], [0, 0, 1, 1], [], []>} : vector<32x16xf32>, vector<16x640xf32>, vector<32x640xf32> -> vector<32x640xf32>
    %c0_7 = arith.constant 0 : index
    %c0_8 = arith.constant 0 : index
    %10 = vector.load %arg5[%c0_7, %c0_8] : memref<32x16xf32, #tpu.memory_space<vmem>>, vector<32x16xf32>
    %cst_9 = arith.constant dense<0.000000e+00> : vector<32x640xf32>
    %11 = tpu.matmul %10, %7, %cst_9 {dimension_numbers = #tpu.dot_dimension_numbers<[1], [0], [0], [1], [0, 0, 1, 1], [], []>} : vector<32x16xf32>, vector<16x640xf32>, vector<32x640xf32> -> vector<32x640xf32>
    %12 = arith.addf %9, %11 : vector<32x640xf32>
    %c0_10 = arith.constant 0 : index
    %c0_11 = arith.constant 0 : index
    %13 = vector.load %arg6[%c0_10, %c0_11] : memref<32x1xf32, #tpu.memory_space<vmem>>, vector<32x1xf32>
    %14 = vector.broadcast %13 : vector<32x1xf32> to vector<32x640xf32>
    %15 = arith.addf %12, %14 : vector<32x640xf32>
    %16 = arith.negf %15 : vector<32x640xf32>
    %17 = math.exp %16 : vector<32x640xf32>
    %cst_12 = arith.constant 1.000000e+00 : f32
    %18 = vector.broadcast %cst_12 : f32 to vector<32x640xf32>
    %19 = arith.addf %18, %17 : vector<32x640xf32>
    %20 = arith.divf %18, %19 : vector<32x640xf32>
    %21 = arith.mulf %15, %20 : vector<32x640xf32>
    %c0_13 = arith.constant 0 : index
    %c0_14 = arith.constant 0 : index
    %22 = vector.load %arg7[%c0_13, %c0_14] : memref<32x7xf32, #tpu.memory_space<vmem>>, vector<32x7xf32>
    %cst_15 = arith.constant dense<0.000000e+00> : vector<32x640xf32>
    %23 = tpu.matmul %22, %1, %cst_15 {dimension_numbers = #tpu.dot_dimension_numbers<[1], [0], [0], [1], [0, 0, 1, 1], [], []>} : vector<32x7xf32>, vector<7x640xf32>, vector<32x640xf32> -> vector<32x640xf32>
    %24 = arith.addf %23, %21 : vector<32x640xf32>
    %c0_16 = arith.constant 0 : index
    %c0_17 = arith.constant 0 : index
    %25 = vector.load %arg8[%c0_16, %c0_17] : memref<32x1xf32, #tpu.memory_space<vmem>>, vector<32x1xf32>
    %26 = vector.broadcast %25 : vector<32x1xf32> to vector<32x640xf32>
    %27 = arith.addf %24, %26 : vector<32x640xf32>
    %28 = arith.negf %27 : vector<32x640xf32>
    %29 = math.exp %28 : vector<32x640xf32>
    %cst_18 = arith.constant 1.000000e+00 : f32
    %30 = vector.broadcast %cst_18 : f32 to vector<32x640xf32>
    %31 = arith.addf %30, %29 : vector<32x640xf32>
    %32 = arith.divf %30, %31 : vector<32x640xf32>
    %33 = arith.mulf %27, %32 : vector<32x640xf32>
    %c0_19 = arith.constant 0 : index
    %c0_20 = arith.constant 0 : index
    %34 = vector.load %arg9[%c0_19, %c0_20] : memref<32x32xf32, #tpu.memory_space<vmem>>, vector<32x32xf32>
    %cst_21 = arith.constant dense<0.000000e+00> : vector<32x640xf32>
    %35 = tpu.matmul %34, %33, %cst_21 {dimension_numbers = #tpu.dot_dimension_numbers<[1], [0], [0], [1], [0, 0, 1, 1], [], []>} : vector<32x32xf32>, vector<32x640xf32>, vector<32x640xf32> -> vector<32x640xf32>
    %36 = arith.addf %35, %21 : vector<32x640xf32>
    %c0_22 = arith.constant 0 : index
    %c0_23 = arith.constant 0 : index
    %37 = vector.load %arg10[%c0_22, %c0_23] : memref<32x1xf32, #tpu.memory_space<vmem>>, vector<32x1xf32>
    %38 = vector.broadcast %37 : vector<32x1xf32> to vector<32x640xf32>
    %39 = arith.addf %36, %38 : vector<32x640xf32>
    %40 = arith.negf %39 : vector<32x640xf32>
    %41 = math.exp %40 : vector<32x640xf32>
    %cst_24 = arith.constant 1.000000e+00 : f32
    %42 = vector.broadcast %cst_24 : f32 to vector<32x640xf32>
    %43 = arith.addf %42, %41 : vector<32x640xf32>
    %44 = arith.divf %42, %43 : vector<32x640xf32>
    %45 = arith.mulf %39, %44 : vector<32x640xf32>
    %c0_25 = arith.constant 0 : index
    %c0_26 = arith.constant 0 : index
    %46 = vector.load %arg11[%c0_25, %c0_26] : memref<7x32xf32, #tpu.memory_space<vmem>>, vector<7x32xf32>
    %cst_27 = arith.constant dense<0.000000e+00> : vector<7x640xf32>
    %47 = tpu.matmul %46, %45, %cst_27 {dimension_numbers = #tpu.dot_dimension_numbers<[1], [0], [0], [1], [0, 0, 1, 1], [], []>} : vector<7x32xf32>, vector<32x640xf32>, vector<7x640xf32> -> vector<7x640xf32>
    %c0_28 = arith.constant 0 : index
    %c0_29 = arith.constant 0 : index
    %48 = vector.load %arg12[%c0_28, %c0_29] : memref<7x1xf32, #tpu.memory_space<vmem>>, vector<7x1xf32>
    %49 = vector.broadcast %48 : vector<7x1xf32> to vector<7x640xf32>
    %50 = arith.addf %47, %49 : vector<7x640xf32>
    %cst_30 = arith.constant 2.000000e+00 : f32
    %51 = vector.broadcast %cst_30 : f32 to vector<1x640xf32>
    %52 = arith.mulf %51, %0 : vector<1x640xf32>
    %cst_31 = arith.constant 3.21887589 : f32
    %53 = vector.broadcast %cst_31 : f32 to vector<1x640xf32>
    %54 = arith.mulf %52, %53 : vector<1x640xf32>
    %55 = math.exp %54 : vector<1x640xf32>
    %cst_32 = arith.constant 1.000000e+00 : f32
    %56 = vector.broadcast %cst_32 : f32 to vector<1x640xf32>
    %57 = arith.subf %55, %56 : vector<1x640xf32>
    %cst_33 = arith.constant 2.000000e+00 : f32
    %cst_34 = arith.constant 3.21887589 : f32
    %58 = arith.mulf %cst_33, %cst_34 : f32
    %59 = vector.broadcast %58 : f32 to vector<1x640xf32>
    %60 = arith.divf %57, %59 : vector<1x640xf32>
    %61 = math.rsqrt %60 : vector<1x640xf32>
    %62 = vector.broadcast %61 : vector<1x640xf32> to vector<7x640xf32>
    %63 = arith.mulf %50, %62 : vector<7x640xf32>
    %c0_35 = arith.constant 0 : index
    %c0_36 = arith.constant 0 : index
    %64 = vector.load %arg13[%c0_35, %c0_36] : memref<7x640xf32, #tpu.memory_space<vmem>>, vector<7x640xf32>
    tpu.vector_store %arg13[%c0_35, %c0_36], %63 {strides = array<i32>} : memref<7x640xf32, #tpu.memory_space<vmem>>, vector<7x640xf32>,
    return
  }
  func.func @transform_0(%arg0: i32) -> (i32, i32) {
    %c0_i32 = arith.constant 0 : i32
    %c0_i32_0 = arith.constant 0 : i32
    return %c0_i32, %arg0 : i32, i32
  }
  func.func @transform_1(%arg0: i32) -> (i32, i32) {
    %c0_i32 = arith.constant 0 : i32
    %c0_i32_0 = arith.constant 0 : i32
    return %c0_i32, %arg0 : i32, i32
  }
  func.func @transform_2(%arg0: i32) -> (i32, i32) {
    %c0_i32 = arith.constant 0 : i32
    %c0_i32_0 = arith.constant 0 : i32
    %c0_i32_1 = arith.constant 0 : i32
    return %c0_i32, %c0_i32_0 : i32, i32
  }
  func.func @transform_3(%arg0: i32) -> (i32, i32) {
    %c0_i32 = arith.constant 0 : i32
    %c0_i32_0 = arith.constant 0 : i32
    %c0_i32_1 = arith.constant 0 : i32
    return %c0_i32, %c0_i32_0 : i32, i32
  }
  func.func @transform_4(%arg0: i32) -> (i32, i32) {
    %c0_i32 = arith.constant 0 : i32
    %c0_i32_0 = arith.constant 0 : i32
    %c0_i32_1 = arith.constant 0 : i32
    return %c0_i32, %c0_i32_0 : i32, i32
  }
  func.func @transform_5(%arg0: i32) -> (i32, i32) {
    %c0_i32 = arith.constant 0 : i32
    %c0_i32_0 = arith.constant 0 : i32
    %c0_i32_1 = arith.constant 0 : i32
    return %c0_i32, %c0_i32_0 : i32, i32
  }
  func.func @transform_6(%arg0: i32) -> (i32, i32) {
    %c0_i32 = arith.constant 0 : i32
    %c0_i32_0 = arith.constant 0 : i32
    %c0_i32_1 = arith.constant 0 : i32
    return %c0_i32, %c0_i32_0 : i32, i32
  }
  func.func @transform_7(%arg0: i32) -> (i32, i32) {
    %c0_i32 = arith.constant 0 : i32
    %c0_i32_0 = arith.constant 0 : i32
    %c0_i32_1 = arith.constant 0 : i32
    return %c0_i32, %c0_i32_0 : i32, i32
  }
  func.func @transform_8(%arg0: i32) -> (i32, i32) {
    %c0_i32 = arith.constant 0 : i32
    %c0_i32_0 = arith.constant 0 : i32
    %c0_i32_1 = arith.constant 0 : i32
    return %c0_i32, %c0_i32_0 : i32, i32
  }
  func.func @transform_9(%arg0: i32) -> (i32, i32) {
    %c0_i32 = arith.constant 0 : i32
    %c0_i32_0 = arith.constant 0 : i32
    %c0_i32_1 = arith.constant 0 : i32
    return %c0_i32, %c0_i32_0 : i32, i32
  }
  func.func @transform_10(%arg0: i32) -> (i32, i32) {
    %c0_i32 = arith.constant 0 : i32
    %c0_i32_0 = arith.constant 0 : i32
    %c0_i32_1 = arith.constant 0 : i32
    return %c0_i32, %c0_i32_0 : i32, i32
  }
  func.func @transform_11(%arg0: i32) -> (i32, i32) {
    %c0_i32 = arith.constant 0 : i32
    %c0_i32_0 = arith.constant 0 : i32
    %c0_i32_1 = arith.constant 0 : i32
    return %c0_i32, %c0_i32_0 : i32, i32
  }
  func.func @transform_12(%arg0: i32) -> (i32, i32) {
    %c0_i32 = arith.constant 0 : i32
    %c0_i32_0 = arith.constant 0 : i32
    return %c0_i32, %arg0 : i32, i32
  }
}

</mosaic_0001>

<bundles_post_ra>
// kernel: tpu_custom_call.1
= control target key start
LH: loop header
LB: loop body
LE: loop exit
PB: predicated region body
PF: predicated region fallthrough
CT: control target
= control target key end

     0   :  { %v4778_v1 = vmov 0   ;;  %s6862_s0 = inlined_call_operand.vmem [shape: f32[1,640], index: 0, kind: input, shape index: {}]   ;;  %s6863_s1 = inlined_call_operand.vmem [shape: f32[7,640], index: 1, kind: input, shape index: {}]   ;;  %s6864_s2 = inlined_call_operand.vmem [shape: f32[16,1], index: 2, kind: input, shape index: {}]   ;;  %s6865_s3 = inlined_call_operand.vmem [shape: f32[32,16], index: 3, kind: input, shape index: {}]   ;;  %s6866_s4 = inlined_call_operand.vmem [shape: f32[32,16], index: 4, kind: input, shape index: {}]   ;;  %s6867_s5 = inlined_call_operand.vmem [shape: f32[32,1], index: 5, kind: input, shape index: {}]   ;;  %s6868_s6 = inlined_call_operand.vmem [shape: f32[32,7], index: 6, kind: input, shape index: {}]   ;;  %s6869_s7 = inlined_call_operand.vmem [shape: f32[32,1], index: 7, kind: input, shape index: {}]   ;;  %s6870_s8 = inlined_call_operand.vmem [shape: f32[32,32], index: 8, kind: input, shape index: {}]   ;;  %s6871_s9 = inlined_call_operand.vmem [shape: f32[32,1], index: 9, kind: input, shape index: {}]   ;;  %s6872_s10 = inlined_call_operand.vmem [shape: f32[7,32], index: 10, kind: input, shape index: {}]   ;;  %s6873_s11 = inlined_call_operand.vmem [shape: f32[7,1], index: 11, kind: input, shape index: {}]   ;;  %s6874_s12 = inlined_call_operand.hbm [shape: f32[7,640], index: 12, kind: output, shape index: {}]  }
   0x1   :  { %v49_v0 = vld [vmem:[%s6864_s2 + $0x8] sm:$0xff]  ;;  %4467 = vset.pattern.permute.xlu0 %v4778_v1  ;;  %4468 = vset.pattern.permute.xlu1 %v4778_v1  ;;  %v48_v2 = vld [vmem:[%s6864_s2] sm:$0xff] }
   0x2   :  { %57 = vperm.xlu0 %4467, %v49_v0  }
   0x3   :  { %17 = vsyncpa [#allocation3], 0  ;;  %v2726_v3 = vld [vmem:[%s6867_s5 + $0x8] sm:$0xff]  ;;  %v3208_v4 = vld [vmem:[%s6869_s7 + $0x18] sm:$0xff]  ;;  %v61_v9 = vlaneseq }
   0x4   :  { %v3206_v5 = vld [vmem:[%s6869_s7 + $0x8] sm:$0xff]  ;;  %v3672_v6 = vld [vmem:[%s6871_s9 + $0x18] sm:$0xff]  ;;  %v3854_v8 = vld [vmem:[%s6873_s11] sm:$0x7f] }
   0x5   :  { %v3670_v7 = vld [vmem:[%s6871_s9 + $0x8] sm:$0xff]  ;;  %v4877_v10 = vshrl.u32 %v61_v9, 7  ;;  %v42_v16 = vld [vmem:[%s6862_s0] sm:$0x1f] }
   0x6   :  { %52 = vperm.xlu0 %4467, %v48_v2  }
   0x7   :  { %6911 = vst [vmem:[#allocation5_spill] sm:$0xff] %v4877_v10  ;;  %v6879_v11 = vsub.s32 0, %v4877_v10  ;;  %v6877_v12 = vsub.s32 1, %v4877_v10  ;;  %v6878_v13 = vsub.s32 2, %v4877_v10  ;;  %v6876_v14 = vsub.s32 3, %v4877_v10 }
   0x8   :  { %v6875_v15 = vsub.s32 4, %v4877_v10  ;;  %v6931_v10 = vmov 920167782  }
   0x9   :  { %v64_v17 = vrot.slane %v42_v16, %v6879_v11  ;;  %v68_v18 = vrot.slane %v42_v16, %v6877_v12  ;;  %v72_v19 = vrot.slane %v42_v16, %v6878_v13  ;;  %v76_v20 = vrot.slane %v42_v16, %v6876_v14 }
   0xa   :  { %2736 = vperm.xlu0 %4467, %v2726_v3   ;;  %v80_v21 = vrot.slane %v42_v16, %v6875_v15  ;;  %v6895_v3 = vmov 2475754826  }
   0xe   :  { %3226 = vperm.xlu0 %4467, %v3208_v4  }
  0x12   :  { %3216 = vperm.xlu0 %4467, %v3206_v5  }
  0x16   :  { %3690 = vperm.xlu0 %4467, %v3672_v6  }
  0x1a   :  { %3680 = vperm.xlu0 %4467, %v3670_v7  }
  0x1e   :  { %3857 = vperm.xlu0 %4467, %v3854_v8   ;;  %v6908_v8 = vmov 2131351028  }
  0x7d   :  { %v58_v22 = vpop.permute.xlu0 %57 }
  0x7e   :  { %v4897_v23 = vmul.f32 %v64_v17, %v58_v22  ;;  %v4899_v24 = vmul.f32 %v68_v18, %v58_v22  ;;  %v4901_v25 = vmul.f32 %v72_v19, %v58_v22  ;;  %v4903_v26 = vmul.f32 %v76_v20, %v58_v22 }
  0x7f   :  { %v4905_v27 = vmul.f32 %v80_v21, %v58_v22 }
  0x80   :  { %6912 = vst [vmem:[#allocation6_spill] sm:$0xff] %v4899_v24  ;;  %v619_v28 = vand.u32 2139095040, %v4897_v23  ;;  %v723_v29 = vand.u32 2139095040, %v4899_v24  ;;  %v931_v33 = vand.u32 2139095040, %v4903_v26  ;;  %v827_v36 = vand.u32 2139095040, %v4901_v25 }
  0x81   :  { %v53_v30 = vpop.permute.xlu0 %52  ;;  %v1035_v40 = vand.u32 2139095040, %v4905_v27  ;;  %v720_v62 = vand.u32 2147483647, %v4899_v24 }
  0x82   :  { %v724_v31 = vshrl.u32 %v723_v29, 23  ;;  %v620_v32 = vshrl.u32 %v619_v28, 23  ;;  %v4910_v34 = vmul.f32 %v72_v19, %v53_v30  ;;  %v4913_v37 = vmul.f32 %v76_v20, %v53_v30 }
  0x83   :  { %v4915_v38 = vmul.f32 %v80_v21, %v53_v30  ;;  %v932_v42 = vshrl.u32 %v931_v33, 23  ;;  %v828_v43 = vshrl.u32 %v827_v36, 23  ;;  %v4918_v44 = vmul.f32 %v64_v17, %v53_v30 }
  0x84   :  { %v4157_v35 = vadd.s32 4294967169, %v724_v31  ;;  %v4153_v41 = vadd.s32 4294967169, %v620_v32  ;;  %v1036_v45 = vshrl.u32 %v1035_v40, 23  ;;  %v4920_v49 = vmul.f32 %v68_v18, %v53_v30 }
  0x85   :  { %6913 = vst [vmem:[#allocation7_spill] sm:$0xff] %v4918_v44  ;;  %v4165_v48 = vadd.s32 4294967169, %v932_v42  ;;  %v4161_v50 = vadd.s32 4294967169, %v828_v43  ;;  %v99_v51 = vand.u32 2139095040, %v4918_v44  ;;  %v307_v2 = vand.u32 2139095040, %v4910_v34 }
  0x86   :  { %v730_v39 = vadd.s32 1, %v4157_v35  ;;  %v626_v46 = vadd.s32 1, %v4153_v41  ;;  %6914 = vst [vmem:[#allocation8_spill] sm:$0xff] %v4920_v49  ;;  %v4169_v53 = vadd.s32 4294967169, %v1036_v45  ;;  %v203_v55 = vand.u32 2139095040, %v4920_v49 }
  0x87   :  { %v938_v54 = vadd.s32 1, %v4165_v48  ;;  %v834_v56 = vadd.s32 1, %v4161_v50  ;;  %v100_v57 = vshrl.u32 %v99_v51, 23  ;;  %v727_v7 = vand.u32 8388607, %v720_v62 }
  0x88   :  { %vm731_vm0 = vcmp.gt.s32.totalorder %v730_v39, 0  ;;  %vm627_vm1 = vcmp.gt.s32.totalorder %v626_v46, 0  ;;  %v1042_v60 = vadd.s32 1, %v4169_v53  ;;  %v204_v61 = vshrl.u32 %v203_v55, 23 }
  0x89   :  { %v732_v47 = vsel %vm731_vm0, %v730_v39, 0  ;;  %v628_v58 = vsel %vm627_vm1, %v626_v46, 0  ;;  %vm939_vm2 = vcmp.gt.s32.totalorder %v938_v54, 0  ;;  %vm835_vm3 = vcmp.gt.s32.totalorder %v834_v56, 0 }
  0x8a   :  { %v734_v52 = vand.u32 31, %v732_v47  ;;  %v4925_v63 = vand.u32 31, %v628_v58  ;;  %v4133_v0 = vadd.s32 4294967169, %v100_v57  ;;  %v4927_v1 = vsel %vm939_vm2, %v938_v54, 0 }
  0x8b   :  { %vm1043_vm4 = vcmp.gt.s32.totalorder %v1042_v60, 0  ;;  %v4931_v5 = vsel %vm835_vm3, %v834_v56, 0  ;;  %v4137_v6 = vadd.s32 4294967169, %v204_v61  ;;  %v4936_v16 = vshrl.u32 %v628_v58, 5 }
  0x8c   :  { %v735_v59 = vsub.s32 32, %v734_v52  ;;  %v733_v17 = vshrl.u32 %v732_v47, 5  ;;  %v6904_v18 = vmov 683565275   ;;  %v740_v20 = vshll.u32 %v6895_v3, %v734_v52 }
  0x8d   :  { %v737_v19 = vshll.u32 %v6904_v18, %v734_v52  ;;  %v4941_v21 = vsub.s32 32, %v4925_v63  ;;  %v4944_v22 = vand.u32 31, %v4927_v1  ;;  %v4947_v28 = vsel %vm1043_vm4, %v1042_v60, 0 }
  0x8e   :  { %v738_v4 = vshrl.u32 %v6895_v3, %v735_v59  ;;  %v741_v9 = vshrl.u32 %v6908_v8, %v735_v59  ;;  %v4949_v29 = vadd.s32 1, %v4133_v0  ;;  %v743_v32 = vshll.u32 %v6908_v8, %v734_v52 }
  0x8f   :  { %v6893_v33 = vmov 2102212464   ;;  %v210_v36 = vadd.s32 1, %v4137_v6  ;;  %v728_v39 = vor.u32 8388608, %v727_v7  ;;  %v6897_v41 = vmov 920167782  }
  0x90   :  { %v739_v30 = vor.u32 %v738_v4, %v737_v19  ;;  %v742_v31 = vor.u32 %v741_v9, %v740_v20  ;;  %v744_v35 = vshrl.u32 %v6893_v33, %v735_v59  ;;  %v746_v40 = vshll.u32 %v6893_v33, %v734_v52 }
  0x91   :  { %v747_v42 = vshrl.u32 %v6897_v41, %v735_v59  ;;  %v736_v43 = vshrl.u32 %v6904_v18, %v735_v59  ;;  %v749_v46 = vshll.u32 %v6897_v41, %v734_v52  ;;  %v6880_v47 = vmov 1326507024  }
  0x92   :  { %v745_v45 = vor.u32 %v744_v35, %v743_v32  ;;  %v750_v48 = vshrl.u32 %v6880_v47, %v735_v59  ;;  %vm752_vm5 = vcmp.lt.s32.totalorder %v733_v17, 1  ;;  %vm753_vm6 = vcmp.lt.s32.totalorder %v733_v17, 2 }
  0x93   :  { %v748_v50 = vor.u32 %v747_v42, %v746_v40  ;;  %vm755_vm7 = vcmp.lt.s32.totalorder %v733_v17, 4  ;;  %vm754_vm8 = vcmp.lt.s32.totalorder %v733_v17, 3  ;;  %v760_v54 = vsel %vm752_vm5, %v739_v30, %v742_v31 }
  0x94   :  { %v751_v51 = vor.u32 %v750_v48, %v749_v46  ;;  %v757_v53 = vsel %vm755_vm7, %v745_v45, 2102212464  ;;  %v756_v55 = vsel %vm752_vm5, %v736_v43, %v739_v30  ;;  %v764_v58 = vsel %vm752_vm5, %v742_v31, %v745_v45 }
  0x95   :  { %v758_v56 = vsel %vm754_vm8, %v742_v31, %v757_v53  ;;  %v761_v57 = vsel %vm755_vm7, %v748_v50, 920167782  ;;  %v768_v0 = vshll.u32 %v728_v39, 8  ;;  %v616_v52 = vand.u32 2147483647, %v4897_v23 }
  0x96   :  { %v762_v60 = vsel %vm754_vm8, %v745_v45, %v761_v57  ;;  %v765_v61 = vsel %vm755_vm7, %v751_v51, 1326507024  ;;  %v308_v4 = vshrl.u32 %v307_v2, 23  ;;  %v411_v59 = vand.u32 2139095040, %v4913_v37 }
  0x97   :  { %v763_v6 = vsel %vm753_vm6, %v760_v54, %v762_v60  ;;  %v766_v7 = vsel %vm754_vm8, %v748_v50, %v765_v61  ;;  %vm211_vm9 = vcmp.gt.s32.totalorder %v210_v36, 0  ;;  %v759_v30 = vsel %vm753_vm6, %v756_v55, %v758_v56 }
  0x98   :  { %v767_v9 = vsel %vm753_vm6, %v764_v58, %v766_v7  ;;  %v4962_v19 = vmul.u32.u64.low %v768_v0, %v763_v6  ;;  %v4963_v20 = vmul.u32.u64.high %v768_v0, %v763_v6, %v4962_v19  ;;  %v623_v2 = vand.u32 8388607, %v616_v52 }
  0x99   :  { %v4967_v31 = vmul.u32.u64.low %v768_v0, %v767_v9  ;;  %v4968_v32 = vmul.u32.u64.high %v768_v0, %v767_v9, %v4967_v31  ;;  %v633_v35 = vshll.u32 %v6904_v18, %v4925_v63  ;;  %v634_v39 = vshrl.u32 %v6895_v3, %v4941_v21 }
  0x9a   :  { %v636_v40 = vshll.u32 %v6895_v3, %v4925_v63  ;;  %v637_v42 = vshrl.u32 %v6908_v8, %v4941_v21  ;;  %v4980_v17 = vsel %vm211_vm9, %v210_v36, 0  ;;  %v639_v43 = vshll.u32 %v6908_v8, %v4925_v63 }
  0x9b   :  { %v640_v45 = vshrl.u32 %v6893_v33, %v4941_v21  ;;  %v642_v46 = vshll.u32 %v6893_v33, %v4925_v63  ;;  %vm107_vm10 = vcmp.gt.s32.totalorder %v4949_v29, 0  ;;  %v778_v48 = vadd.s32 1, %v4963_v20 }
  0x9c   :  { %v635_v50 = vor.u32 %v634_v39, %v633_v35  ;;  %v638_v51 = vor.u32 %v637_v42, %v636_v40  ;;  %v643_v53 = vshrl.u32 %v6897_v41, %v4941_v21  ;;  %v775_v36 = vmul.u32 %v768_v0, %v759_v30 }
  0x9d   :  { %vm777_vm11 = vc.u32 %v4968_v32, %v4962_v19  ;;  %v624_v54 = vor.u32 8388608, %v623_v2  ;;  %v641_v55 = vor.u32 %v640_v45, %v639_v43  ;;  %v645_v58 = vshll.u32 %v6897_v41, %v4925_v63 }
  0x9e   :  { %v779_v56 = vsel %vm777_vm11, %v778_v48, %v4963_v20  ;;  %v644_v57 = vor.u32 %v643_v53, %v642_v46  ;;  %v646_v60 = vshrl.u32 %v6880_v47, %v4941_v21  ;;  %v5000_v61 = vand.u32 31, %v4980_v17 }
  0x9f   :  { %v780_v6 = vadd.s32 %v779_v56, %v775_v36  ;;  %v632_v0 = vshrl.u32 %v6904_v18, %v4941_v21  ;;  %vm648_vm12 = vcmp.lt.s32.totalorder %v4936_v16, 1  ;;  %vm650_vm13 = vcmp.lt.s32.totalorder %v4936_v16, 3 }
  0xa0   :  { %v647_v7 = vor.u32 %v646_v60, %v645_v58  ;;  %vm651_vm14 = vcmp.lt.s32.totalorder %v4936_v16, 4  ;;  %v656_v9 = vsel %vm648_vm12, %v635_v50, %v638_v51  ;;  %v660_v31 = vsel %vm648_vm12, %v638_v51, %v641_v55 }
  0xa1   :  { %v781_v20 = vadd.s32 536870912, %v780_v6  ;;  %v653_v63 = vsel %vm651_vm14, %v641_v55, 2102212464  ;;  %v657_v30 = vsel %vm651_vm14, %v644_v57, 920167782  ;;  %vm649_vm15 = vcmp.lt.s32.totalorder %v4936_v16, 2 }
  0xa2   :  { %v658_v2 = vsel %vm650_vm13, %v641_v55, %v657_v30  ;;  %v661_v35 = vsel %vm651_vm14, %v647_v7, 1326507024  ;;  %v664_v39 = vshll.u32 %v624_v54, 8  ;;  %v652_v21 = vsel %vm648_vm12, %v632_v0, %v635_v50 }
  0xa3   :  { %v5008_v40 = vshrl.u32 %v781_v20, 30  ;;  %v659_v42 = vsel %vm649_vm15, %v656_v9, %v658_v2  ;;  %v662_v43 = vsel %vm650_vm13, %v644_v57, %v661_v35  ;;  %v654_v45 = vsel %vm650_vm13, %v638_v51, %v653_v63 }
  0xa4   :  { %v663_v46 = vsel %vm649_vm15, %v660_v31, %v662_v43  ;;  %v5014_v48 = vmul.u32.u64.low %v664_v39, %v659_v42  ;;  %v5015_v53 = vmul.u32.u64.high %v664_v39, %v659_v42, %v5014_v48  ;;  %v5019_v36 = vand.u32 31, %v4947_v28 }
  0xa5   :  { %v783_v54 = vshll.u32 %v5008_v40, 30  ;;  %v5022_v55 = vmul.u32.u64.low %v664_v39, %v663_v46  ;;  %v5023_v56 = vmul.u32.u64.high %v664_v39, %v663_v46, %v5022_v55  ;;  %v5026_v50 = vand.u32 31, %v4931_v5 }
  0xa6   :  { %v4141_v57 = vadd.s32 4294967169, %v308_v4  ;;  %v515_v51 = vand.u32 2139095040, %v4915_v38  ;;  %v108_v58 = vsel %vm107_vm10, %v4949_v29, 0  ;;  %v412_v60 = vshrl.u32 %v411_v59, 23 }
  0xa7   :  { %v5034_v0 = vsub.s32 %v780_v6, %v783_v54  ;;  %v655_v7 = vsel %vm649_vm15, %v652_v21, %v654_v45  ;;  %v5039_v9 = vshrl.u32 %v4927_v1, 5  ;;  %v5042_v20 = vsub.s32 32, %v4944_v22 }
  0xa8   :  { %v5045_v4 = vsub.s32 32, %v5000_v61  ;;  %v674_v63 = vadd.s32 1, %v5015_v53  ;;  %v5049_v29 = vshrl.u32 %v4947_v28, 5  ;;  %v5052_v59 = vsub.s32 32, %v5019_v36 }
  0xa9   :  { %v786_v16 = vsub.s32 0, %v5034_v0  ;;  %vm673_vm0 = vc.u32 %v5023_v56, %v5014_v48  ;;  %v5057_v1 = vshrl.u32 %v108_v58, 5  ;;  %v5059_v6 = vshrl.u32 %v515_v51, 23 }
  0xaa   :  { %v671_v30 = vmul.u32 %v664_v39, %v655_v7  ;;  %v675_v31 = vsel %vm673_vm0, %v674_v63, %v5015_v53  ;;  %v5062_v2 = vand.u32 31, %v108_v58  ;;  %v5064_v35 = vadd.s32 1, %v4141_v57 }
  0xab   :  { %v5066_v28 = vadd.s32 4294967169, %v412_v60  ;;  %v4158_v21 = vmin.u32 %v786_v16, %v5034_v0  ;;  %v200_v43 = vand.u32 2147483647, %v4920_v49  ;;  %v218_v45 = vshrl.u32 %v6895_v3, %v5045_v4 }
  0xac   :  { %v676_v42 = vadd.s32 %v675_v31, %v671_v30  ;;  %v221_v46 = vshrl.u32 %v6908_v8, %v5045_v4  ;;  %v224_v53 = vshrl.u32 %v6893_v33, %v5045_v4  ;;  %v226_v54 = vshll.u32 %v6893_v33, %v5000_v61 }
  0xad   :  { %v788_v39 = vclz %v4158_v21  ;;  %v227_v55 = vshrl.u32 %v6897_v41, %v5045_v4  ;;  %v5081_v57 = vshrl.u32 %v4980_v17, 5  ;;  %v217_v58 = vshll.u32 %v6904_v18, %v5000_v61 }
  0xae   :  { %v677_v51 = vadd.s32 536870912, %v676_v42  ;;  %v230_v60 = vshrl.u32 %v6880_v47, %v5045_v4  ;;  %vm722_vm1 = vcmp.lt.s32.totalorder %v4899_v24, 0  ;;  %v220_v63 = vshll.u32 %v6895_v3, %v5000_v61 }
  0xaf   :  { %v4159_v7 = vadd.s32 4294967294, %v788_v39  ;;  %v223_v16 = vshll.u32 %v6908_v8, %v5000_v61  ;;  %v228_v30 = vor.u32 %v227_v55, %v226_v54  ;;  %v776_v17 = vadd.s32 %v4962_v19, %v4968_v32 }
  0xb0   :  { %v678_v31 = vshrl.u32 %v677_v51, 30  ;;  %v207_v21 = vand.u32 8388607, %v200_v43  ;;  %v229_v15 = vshll.u32 %v6897_v41, %v5000_v61  ;;  %v219_v14 = vor.u32 %v218_v45, %v217_v58 }
  0xb1   :  { %vm4160_vm2 = vcmp.lt.s32.totalorder %v4159_v7, 0  ;;  %v222_v39 = vor.u32 %v221_v46, %v220_v63  ;;  %v225_v12 = vor.u32 %v224_v53, %v223_v16  ;;  %vm235_vm3 = vcmp.lt.s32.totalorder %v5081_v57, 4 }
  0xb2   :  { %v791_v13 = vsel %vm4160_vm2, 0, %v4159_v7  ;;  %v679_v11 = vshll.u32 %v678_v31, 30  ;;  %v231_v47 = vor.u32 %v230_v60, %v229_v15  ;;  %vm5101_vm4 = vcmp.le.f32.partialorder %v720_v62, 0.7853982 }
  0xb3   :  { %v792_v32 = vsub.s32 32, %v791_v13  ;;  %v796_v54 = vsub.s32 4294967266, %v791_v13  ;;  %v806_v55 = vsub.s32 4, %v5008_v40  ;;  %v241_v61 = vsel %vm235_vm3, %v228_v30, 920167782 }
  0xb4   :  { %v5108_v45 = vsub.s32 %v676_v42, %v679_v11  ;;  %v208_v46 = vor.u32 8388608, %v207_v21  ;;  %vm232_vm5 = vcmp.lt.s32.totalorder %v5081_v57, 1  ;;  %vm234_vm6 = vcmp.lt.s32.totalorder %v5081_v57, 3 }
  0xb5   :  { %v793_v15 = vshll.u32 %v5034_v0, %v791_v13  ;;  %v794_v62 = vshrl.u32 %v776_v17, %v792_v32  ;;  %v797_v53 = vadd.s32 127, %v796_v54  ;;  %v240_v51 = vsel %vm232_vm5, %v219_v14, %v222_v39 }
  0xb6   :  { %v682_v58 = vsub.s32 0, %v5108_v45  ;;  %v242_v60 = vsel %vm234_vm6, %v225_v12, %v241_v61  ;;  %v244_v11 = vsel %vm232_vm5, %v222_v39, %v225_v12  ;;  %v245_v42 = vsel %vm235_vm3, %v231_v47, 1326507024 }
  0xb7   :  { %v795_v7 = vor.u32 %v794_v62, %v793_v15  ;;  %v798_v63 = vshll.u32 %v797_v53, 23  ;;  %v237_v13 = vsel %vm235_vm3, %v225_v12, 2102212464  ;;  %v246_v0 = vsel %vm234_vm6, %v228_v30, %v245_v42 }
  0xb8   :  { %v807_v16 = vsel %vm722_vm1, %v806_v55, %v5008_v40  ;;  %v4154_v17 = vmin.u32 %v682_v58, %v5108_v45  ;;  %v216_v21 = vshrl.u32 %v6904_v18, %v5045_v4  ;;  %vm233_vm7 = vcmp.lt.s32.totalorder %v5081_v57, 2 }
  0xb9   :  { %v799_v47 = vor.u32 4788187, %v798_v63  ;;  %v243_v32 = vsel %vm233_vm7, %v240_v51, %v242_v60  ;;  %v247_v12 = vsel %vm233_vm7, %v244_v11, %v246_v0  ;;  %v248_v54 = vshll.u32 %v208_v46, 8 }
  0xba   :  { %v684_v30 = vclz %v4154_v17  ;;  %v702_v61 = vsub.s32 4, %v678_v31  ;;  %v236_v40 = vsel %vm232_vm5, %v216_v21, %v219_v14  ;;  %v238_v55 = vsel %vm234_vm6, %v222_v39, %v237_v13 }
  0xbb   :  { %v800_v15 = vand.u32 2147483647, %v799_v47  ;;  %v802_v4 = vcvt.s32.f32 %v795_v7  ;;  %v5141_v62 = vmul.u32.u64.low %v248_v54, %v247_v12  ;;  %v5142_v53 = vmul.u32.u64.high %v248_v54, %v247_v12, %v5141_v62 }
  0xbc   :  { %v5146_v51 = vsel %vm5101_vm4, 0, %v807_v16  ;;  %v4155_v58 = vadd.s32 4294967294, %v684_v30  ;;  %v5148_v60 = vmul.u32.u64.low %v248_v54, %v243_v32  ;;  %v5149_v46 = vmul.u32.u64.high %v248_v54, %v243_v32, %v5148_v60 }
  0xbd   :  { %v5153_v11 = vsub.s32 32, %v5062_v2  ;;  %v5156_v14 = vadd.s32 4294967169, %v5059_v6  ;;  %v803_v39 = vmul.f32 %v802_v4, %v800_v15  ;;  %vm618_vm8 = vcmp.lt.s32.totalorder %v4897_v23, 0 }
  0xbe   :  { %vm5161_vm9 = vcmp.le.f32.partialorder %v616_v52, 0.7853982  ;;  %vm4156_vm10 = vcmp.lt.s32.totalorder %v4155_v58, 0  ;;  %v703_v7 = vsel %vm618_vm8, %v702_v61, %v678_v31  ;;  %v239_v63 = vsel %vm233_vm7, %v236_v40, %v238_v55 }
  0xbf   :  { %v804_v13 = vxor.u32 2147483648, %v803_v39  ;;  %v5170_v6 = vand.u32 3, %v5146_v51  ;;  %v687_v0 = vsel %vm4156_vm10, 0, %v4155_v58  ;;  %vm257_vm11 = vc.u32 %v5142_v53, %v5148_v60 }
  0xc0   :  { %v672_v52 = vadd.s32 %v5014_v48, %v5023_v56  ;;  %v688_v16 = vsub.s32 32, %v687_v0  ;;  %v692_v17 = vsub.s32 4294967266, %v687_v0  ;;  %v258_v21 = vadd.s32 1, %v5149_v46 }
  0xc1   :  { %v805_v31 = vsel %vm722_vm1, %v804_v13, %v803_v39  ;;  %v689_v57 = vshll.u32 %v5108_v45, %v687_v0  ;;  %v705_v47 = vsel %vm5161_vm9, 0, %v703_v7  ;;  %v255_v32 = vmul.u32 %v248_v54, %v239_v63 }
  0xc2   :  { %v808_v12 = vsel %vm5101_vm4, %v4899_v24, %v805_v31  ;;  %v690_v30 = vshrl.u32 %v672_v52, %v688_v16  ;;  %v693_v61 = vadd.s32 127, %v692_v17  ;;  %v259_v48 = vsel %vm257_vm11, %v258_v21, %v5149_v46 }
  0xc3   :  { %4469 = vcosq.f32 %v808_v12  ;;  %v260_v56 = vadd.s32 %v259_v48, %v255_v32  ;;  %v96_v40 = vand.u32 2147483647, %v4918_v44  ;;  %v113_v55 = vshll.u32 %v6904_v18, %v5062_v2 }
  0xc4   :  { %4471 = vsinq.f32 %v808_v12  ;;  %v691_v45 = vor.u32 %v690_v30, %v689_v57  ;;  %v694_v15 = vshll.u32 %v693_v61, 23  ;;  %v114_v54 = vshrl.u32 %v6895_v3, %v5153_v11 }
  0xc5   :  { %v261_v4 = vadd.s32 536870912, %v260_v56  ;;  %v116_v19 = vshll.u32 %v6895_v3, %v5062_v2  ;;  %v117_v62 = vshrl.u32 %v6908_v8, %v5153_v11  ;;  %v120_v58 = vshrl.u32 %v6893_v33, %v5153_v11 }
  0xc6   :  { %v695_v46 = vor.u32 4788187, %v694_v15  ;;  %v119_v39 = vshll.u32 %v6908_v8, %v5062_v2  ;;  %v122_v7 = vshll.u32 %v6893_v33, %v5062_v2  ;;  %v123_v63 = vshrl.u32 %v6897_v41, %v5153_v11 }
  0xc7   :  { %v698_v13 = vcvt.s32.f32 %v691_v45  ;;  %v5203_v0 = vshrl.u32 %v261_v4, 30  ;;  %v103_v52 = vand.u32 8388607, %v96_v40  ;;  %v6919_v16 = vmov 1326507024  }
  0xc8   :  { %v126_v17 = vshrl.u32 %v6919_v16, %v5153_v11  ;;  %v696_v21 = vand.u32 2147483647, %v695_v46  ;;  %v121_v31 = vor.u32 %v120_v58, %v119_v39  ;;  %v124_v57 = vor.u32 %v123_v63, %v122_v7 }
  0xc9   :  { %v125_v32 = vshll.u32 %v6897_v41, %v5062_v2  ;;  %v5212_v12 = vadd.s32 1, %v5066_v28  ;;  %v263_v30 = vshll.u32 %v5203_v0, 30  ;;  %v115_v61 = vor.u32 %v114_v54, %v113_v55 }
  0xca   :  { %v118_v48 = vor.u32 %v117_v62, %v116_v19  ;;  %vm1852_vm12 = vcmp.eq.s32.totalorder %v5170_v6, 2  ;;  %v699_v45 = vmul.f32 %v698_v13, %v696_v21  ;;  %v709_v15 = vadd.s32 3, %v705_v47 }
  0xcb   :  { %v127_v4 = vor.u32 %v126_v17, %v125_v32  ;;  %vm131_vm13 = vcmp.lt.s32.totalorder %v5057_v1, 4  ;;  %vm1849_vm14 = vcmp.eq.s32.totalorder %v5170_v6, 0  ;;  %v5218_v58 = vand.u32 3, %v705_v47 }
  0xcc   :  { %v5220_v46 = vsub.s32 %v260_v56, %v263_v30  ;;  %v104_v2 = vor.u32 8388608, %v103_v52  ;;  %v137_v28 = vsel %vm131_vm13, %v124_v57, 920167782  ;;  %v700_v39 = vxor.u32 2147483648, %v699_v45 }
  0xcd   :  { %vm128_vm15 = vcmp.lt.s32.totalorder %v5057_v1, 1  ;;  %vm130_vm0 = vcmp.lt.s32.totalorder %v5057_v1, 3  ;;  %v133_v55 = vsel %vm131_vm13, %v121_v31, 2102212464  ;;  %vm812_vm1 = vweird.f32 %v4899_v24 }
  0xce   :  { %v266_v54 = vsub.s32 0, %v5220_v46  ;;  %v112_v47 = vshrl.u32 %v6904_v18, %v5153_v11  ;;  %v136_v56 = vsel %vm128_vm15, %v115_v61, %v118_v48  ;;  %v138_v19 = vsel %vm130_vm0, %v121_v31, %v137_v28 }
  0xcf   :  { %v701_v62 = vsel %vm618_vm8, %v700_v39, %v699_v45  ;;  %vm129_vm2 = vcmp.lt.s32.totalorder %v5057_v1, 2  ;;  %v140_v7 = vsel %vm128_vm15, %v118_v48, %v121_v31  ;;  %v141_v63 = vsel %vm131_vm13, %v127_v4, 1326507024 }
  0xd0   :  { %v704_v13 = vsel %vm5161_vm9, %v4897_v23, %v701_v62  ;;  %v4138_v52 = vmin.u32 %v266_v54, %v5220_v46  ;;  %v132_v11 = vsel %vm128_vm15, %v112_v47, %v115_v61  ;;  %v134_v17 = vsel %vm130_vm0, %v118_v48, %v133_v55  ;;  %v5245_v21 = vpop.eup %4469 }
  0xd1   :  { %4473 = vcosq.f32 %v704_v13  ;;  %v139_v32 = vsel %vm129_vm2, %v136_v56, %v138_v19  ;;  %v142_v31 = vsel %vm130_vm0, %v124_v57, %v141_v63  ;;  %v144_v30 = vshll.u32 %v104_v2, 8  ;;  %v5251_v45 = vpop.eup %4471 }
  0xd2   :  { %v6882_v42 = vxor.u32 2147483648, %v5245_v21  ;;  %4475 = vsinq.f32 %v704_v13  ;;  %v268_v4 = vclz %v4138_v52  ;;  %v143_v61 = vsel %vm129_vm2, %v140_v7, %v142_v31 }
  0xd3   :  { %v6883_v48 = vxor.u32 2147483648, %v5251_v45  ;;  %v5257_v28 = vmul.u32.u64.low %v144_v30, %v143_v61  ;;  %v5258_v39 = vmul.u32.u64.high %v144_v30, %v143_v61, %v5257_v28  ;;  %v6884_v47 = vmov 0.0  }
  0xd4   :  { %v1854_v57 = vsel %vm1852_vm12, %v6882_v42, %v5251_v45  ;;  %v4139_v2 = vadd.s32 4294967294, %v268_v4  ;;  %v5265_v55 = vmul.u32.u64.low %v144_v30, %v139_v32  ;;  %v5266_v54 = vmul.u32.u64.high %v144_v30, %v139_v32, %v5265_v55  ;;  %2251 = vmatprep.mubr.f32.mxu0 %v6884_v47  ;;  %2269 = vmatprep.mubr.f32.mxu1 %v6884_v47 }
  0xd5   :  { %vm1848_vm3 = vcmp.lt.s32.totalorder %v5170_v6, 2  ;;  %v1851_v56 = vsel %vm1849_vm14, %v5245_v21, %v6883_v48  ;;  %vm202_vm4 = vcmp.lt.s32.totalorder %v4920_v49, 0  ;;  %v286_v19 = vsub.s32 4, %v5203_v0 }
  0xd6   :  { %v1855_v62 = vsel %vm1848_vm3, %v1851_v56, %v1854_v57  ;;  %vm5281_vm5 = vcmp.le.f32.partialorder %v200_v43, 0.7853982  ;;  %vm4140_vm6 = vcmp.lt.s32.totalorder %v4139_v2, 0  ;;  %v135_v63 = vsel %vm129_vm2, %v132_v11, %v134_v17 }
  0xd7   :  { %v1856_v13 = vsel %vm812_vm1, nan, %v1855_v62  ;;  %v710_v6 = vand.u32 3, %v709_v15  ;;  %v271_v52 = vsel %vm4140_vm6, 0, %v4139_v2  ;;  %vm153_vm7 = vc.u32 %v5258_v39, %v5265_v55 }
  0xd8   :  { %2215 = vmatprep.subr.mxu0 %v1856_v13  ;;  %4413 = vmatprep.subr.mxu1 %v1856_v13  ;;  %vm1749_vm8 = vcmp.eq.s32.totalorder %v5218_v58, 2  ;;  %v256_v43 = vadd.s32 %v5148_v60, %v5142_v53  ;;  %v272_v32 = vsub.s32 32, %v271_v52  ;;  %v276_v31 = vsub.s32 4294967266, %v271_v52 }
  0xd9   :  { %v154_v1 = vadd.s32 1, %v5266_v54  ;;  %vm1746_vm9 = vcmp.eq.s32.totalorder %v5218_v58, 0  ;;  %v273_v11 = vshll.u32 %v5220_v46, %v271_v52  ;;  %v287_v15 = vsel %vm202_vm4, %v286_v19, %v5203_v0 }
  0xda   :  { %v151_v17 = vmul.u32 %v144_v30, %v135_v63  ;;  %v6886_v4 = vand.u32 2147483647, %v4903_v26  ;;  %vm1745_vm10 = vcmp.lt.s32.totalorder %v5218_v58, 2  ;;  %v274_v61 = vshrl.u32 %v256_v43, %v272_v32 }
  0xdb   :  { %v277_v28 = vadd.s32 127, %v276_v31  ;;  %v155_v53 = vsel %vm153_vm7, %v154_v1, %v5266_v54  ;;  %v946_v60 = vshrl.u32 %v6895_v3, %v5042_v20  ;;  %vm708_vm11 = vweird.f32 %v4897_v23 }
  0xdc   :  { %vm711_vm12 = vcmp.lt.s32.totalorder %v710_v6, 2  ;;  %vm712_vm13 = vcmp.eq.s32.totalorder %v710_v6, 0  ;;  %v156_v0 = vadd.s32 %v155_v53, %v151_v17  ;;  %v949_v46 = vshrl.u32 %v6908_v8, %v5042_v20 }
  0xdd   :  { %vm715_vm14 = vcmp.eq.s32.totalorder %v710_v6, 2  ;;  %v275_v30 = vor.u32 %v274_v61, %v273_v11  ;;  %v278_v57 = vshll.u32 %v277_v28, 23  ;;  %v945_v2 = vshll.u32 %v6904_v18, %v4944_v22 }
  0xde   :  { %v5315_v54 = vsel %vm5281_vm5, 0, %v287_v15  ;;  %v157_v56 = vadd.s32 536870912, %v156_v0  ;;  %v948_v19 = vshll.u32 %v6895_v3, %v4944_v22  ;;  %v952_v62 = vshrl.u32 %v6893_v33, %v5042_v20  ;;  %v4474_v63 = vpop.eup %4473 }
  0xdf   :  { %v279_v13 = vor.u32 4788187, %v278_v57  ;;  %v935_v52 = vand.u32 8388607, %v6886_v4  ;;  %v947_v43 = vor.u32 %v946_v60, %v945_v2  ;;  %v951_v32 = vshll.u32 %v6908_v8, %v4944_v22  ;;  %v4476_v31 = vpop.eup %4475 }
  0xe0   :  { %v716_v1 = vxor.u32 2147483648, %v4474_v63  ;;  %v5325_v11 = vshrl.u32 %v157_v56, 30  ;;  %v950_v15 = vor.u32 %v949_v46, %v948_v19  ;;  %v954_v17 = vshll.u32 %v6893_v33, %v4944_v22 }
  0xe1   :  { %vm419_vm15 = vcmp.gt.s32.totalorder %v5212_v12, 0  ;;  %v713_v61 = vxor.u32 2147483648, %v4476_v31  ;;  %v280_v28 = vand.u32 2147483647, %v279_v13  ;;  %v282_v53 = vcvt.s32.f32 %v275_v30 }
  0xe2   :  { %v955_v57 = vshrl.u32 %v6897_v41, %v5042_v20  ;;  %v717_v60 = vsel %vm715_vm14, %v716_v1, %v4476_v31  ;;  %v1751_v2 = vsel %vm1749_vm8, %v716_v1, %v4476_v31  ;;  %v159_v56 = vshll.u32 %v5325_v11, 30 }
  0xe3   :  { %v953_v42 = vor.u32 %v952_v62, %v951_v32  ;;  %v714_v46 = vsel %vm712_vm13, %v4474_v63, %v713_v61  ;;  %v1748_v19 = vsel %vm1746_vm9, %v4474_v63, %v713_v61  ;;  %v283_v48 = vmul.f32 %v282_v53, %v280_v28 }
  0xe4   :  { %v958_v30 = vshrl.u32 %v6919_v16, %v5042_v20  ;;  %v718_v13 = vsel %vm711_vm12, %v714_v46, %v717_v60  ;;  %v1752_v47 = vsel %vm1745_vm10, %v1748_v19, %v1751_v2  ;;  %v5344_v4 = vsub.s32 %v156_v0, %v159_v56 }
  0xe5   :  { %v957_v31 = vshll.u32 %v6897_v41, %v4944_v22  ;;  %v5350_v62 = vsel %vm708_vm11, nan, %v718_v13  ;;  %v1753_v63 = vsel %vm708_vm11, nan, %v1752_v47  ;;  %v284_v32 = vxor.u32 2147483648, %v283_v48 }
  0xe6   :  { %6922 = vst [vmem:[#allocation9_spill] sm:$0xff] %v5350_v62  ;;  %v956_v1 = vor.u32 %v955_v57, %v954_v17  ;;  %2216 = vmatpush1.msra.mxu0 %v1753_v63  ;;  %4415 = vmatpush1.msra.mxu1 %v1753_v63  ;;  %v162_v6 = vsub.s32 0, %v5344_v4  ;;  %v936_v58 = vor.u32 8388608, %v935_v52  ;;  %v944_v0 = vshrl.u32 %v6904_v18, %v5042_v20 }
  0xe7   :  { %vm963_vm0 = vcmp.lt.s32.totalorder %v5039_v9, 4  ;;  %v285_v22 = vsel %vm202_vm4, %v284_v32, %v283_v48  ;;  %v959_v61 = vor.u32 %v958_v30, %v957_v31  ;;  %vm960_vm2 = vcmp.lt.s32.totalorder %v5039_v9, 1 }
  0xe8   :  { %v965_v23 = vsel %vm963_vm0, %v953_v42, 2102212464  ;;  %v288_v47 = vsel %vm5281_vm5, %v4920_v49, %v285_v22  ;;  %v4134_v52 = vmin.u32 %v162_v6, %v5344_v4  ;;  %vm961_vm3 = vcmp.lt.s32.totalorder %v5039_v9, 2 }
  0xe9   :  { %v968_v20 = vsel %vm960_vm2, %v947_v43, %v950_v15  ;;  %4477 = vcosq.f32 %v288_v47  ;;  %vm962_vm6 = vcmp.lt.s32.totalorder %v5039_v9, 3  ;;  %v964_v17 = vsel %vm960_vm2, %v944_v0, %v947_v43 }
  0xea   :  { %v969_v48 = vsel %vm963_vm0, %v956_v1, 920167782  ;;  %4479 = vsinq.f32 %v288_v47  ;;  %v164_v28 = vclz %v4134_v52  ;;  %v966_v53 = vsel %vm962_vm6, %v950_v15, %v965_v23 }
  0xeb   :  { %v970_v57 = vsel %vm962_vm6, %v953_v42, %v969_v48  ;;  %v972_v60 = vsel %vm960_vm2, %v950_v15, %v953_v42  ;;  %v973_v2 = vsel %vm963_vm0, %v959_v61, 1326507024  ;;  %v976_v56 = vshll.u32 %v936_v58, 8 }
  0xec   :  { %v971_v7 = vsel %vm961_vm3, %v968_v20, %v970_v57  ;;  %v5378_v46 = vsel %vm419_vm15, %v5212_v12, 0  ;;  %v4135_v43 = vadd.s32 4294967294, %v164_v28  ;;  %v182_v19 = vsub.s32 4, %v5325_v11 }
  0xed   :  { %v974_v30 = vsel %vm962_vm6, %v956_v1, %v973_v2  ;;  %v5382_v13 = vand.u32 3, %v5315_v54  ;;  %v5386_v42 = vmul.u32.u64.low %v976_v56, %v971_v7  ;;  %v5387_v15 = vmul.u32.u64.high %v976_v56, %v971_v7, %v5386_v42 }
  0xee   :  { %v975_v31 = vsel %vm961_vm3, %v972_v60, %v974_v30  ;;  %vm4136_vm4 = vcmp.lt.s32.totalorder %v4135_v43, 0  ;;  %v967_v63 = vsel %vm961_vm3, %v964_v17, %v966_v53  ;;  %vm5397_vm5 = vcmp.le.f32.partialorder %v96_v40, 0.7853982 }
  0xef   :  { %v5392_v12 = vmul.u32.u64.low %v976_v56, %v975_v31  ;;  %v5393_v32 = vmul.u32.u64.high %v976_v56, %v975_v31, %v5392_v12  ;;  %vm98_vm7 = vcmp.lt.s32.totalorder %v4918_v44, 0  ;;  %v167_v6 = vsel %vm4136_vm4, 0, %v4135_v43 }
  0xf0   :  { %v1032_v58 = vand.u32 2147483647, %v4905_v27  ;;  %v152_v0 = vadd.s32 %v5265_v55, %v5258_v39  ;;  %v168_v22 = vsub.s32 32, %v167_v6  ;;  %v172_v9 = vsub.s32 4294967266, %v167_v6 }
  0xf1   :  { %v183_v61 = vsel %vm98_vm7, %v182_v19, %v5325_v11  ;;  %vm1334_vm8 = vcmp.eq.s32.totalorder %v5382_v13, 0  ;;  %v169_v40 = vshll.u32 %v5344_v4, %v167_v6  ;;  %v983_v23 = vmul.u32 %v976_v56, %v967_v63 }
  0xf2   :  { %v986_v47 = vadd.s32 1, %v5387_v15  ;;  %vm1333_vm9 = vcmp.lt.s32.totalorder %v5382_v13, 2  ;;  %v170_v52 = vshrl.u32 %v152_v0, %v168_v22  ;;  %v173_v20 = vadd.s32 127, %v172_v9 }
  0xf3   :  { %vm985_vm10 = vc.u32 %v5393_v32, %v5386_v42  ;;  %v1050_v39 = vshrl.u32 %v6895_v3, %v5052_v59  ;;  %vm292_vm11 = vweird.f32 %v4920_v49  ;;  %vm1337_vm12 = vcmp.eq.s32.totalorder %v5382_v13, 2 }
  0xf4   :  { %v5420_v55 = vsel %vm5397_vm5, 0, %v183_v61  ;;  %v987_v4 = vsel %vm985_vm10, %v986_v47, %v5387_v15  ;;  %v1039_v11 = vand.u32 8388607, %v1032_v58  ;;  %v171_v17 = vor.u32 %v170_v52, %v169_v40 }
  0xf5   :  { %v174_v48 = vshll.u32 %v173_v20, 23  ;;  %v988_v28 = vadd.s32 %v987_v4, %v983_v23  ;;  %v1049_v53 = vshll.u32 %v6904_v18, %v5019_v36  ;;  %v1048_v57 = vshrl.u32 %v6904_v18, %v5052_v59 }
  0xf6   :  { %v1052_v7 = vshll.u32 %v6895_v3, %v5019_v36  ;;  %v1053_v60 = vshrl.u32 %v6908_v8, %v5052_v59  ;;  %v1059_v2 = vshrl.u32 %v6897_v41, %v5052_v59  ;;  %v5435_v56 = vpop.eup %4477  ;;  %v1056_v31 = vshrl.u32 %v6893_v33, %v5052_v59 }
  0xf7   :  { %v175_v43 = vor.u32 4788187, %v174_v48  ;;  %v989_v19 = vadd.s32 536870912, %v988_v28  ;;  %v1051_v30 = vor.u32 %v1050_v39, %v1049_v53  ;;  %v5439_v15 = vpop.eup %4479  ;;  %v6887_v63 = vxor.u32 2147483648, %v5435_v56 }
  0xf8   :  { %v1055_v12 = vshll.u32 %v6908_v8, %v5019_v36  ;;  %v1058_v6 = vshll.u32 %v6893_v33, %v5019_v36  ;;  %v1062_v0 = vshrl.u32 %v6919_v16, %v5052_v59  ;;  %v6890_v22 = vxor.u32 2147483648, %v5439_v15 }
  0xf9   :  { %v176_v9 = vand.u32 2147483647, %v175_v43  ;;  %v178_v61 = vcvt.s32.f32 %v171_v17  ;;  %v990_v40 = vshrl.u32 %v989_v19, 30  ;;  %v1339_v23 = vsel %vm1337_vm12, %v6887_v63, %v5439_v15 }
  0xfa   :  { %v1054_v47 = vor.u32 %v1053_v60, %v1052_v7  ;;  %v1060_v52 = vor.u32 %v1059_v2, %v1058_v6  ;;  %v1061_v20 = vshll.u32 %v6897_v41, %v5019_v36  ;;  %vm315_vm13 = vcmp.gt.s32.totalorder %v5064_v35, 0 }
  0xfb   :  { %v1336_v59 = vsel %vm1334_vm8, %v5435_v56, %v6890_v22  ;;  %v179_v39 = vmul.f32 %v178_v61, %v176_v9  ;;  %v991_v4 = vshll.u32 %v990_v40, 30  ;;  %v1057_v17 = vor.u32 %v1056_v31, %v1055_v12 }
  0xfc   :  { %v1340_v48 = vsel %vm1333_vm9, %v1336_v59, %v1339_v23  ;;  %v1040_v53 = vor.u32 8388608, %v1039_v11  ;;  %v1063_v7 = vor.u32 %v1062_v0, %v1061_v20  ;;  %vm1064_vm14 = vcmp.lt.s32.totalorder %v5049_v29, 1 }
  0xfd   :  { %v1341_v36 = vsel %vm292_vm11, nan, %v1340_v48  ;;  %v180_v60 = vxor.u32 2147483648, %v179_v39  ;;  %v5467_v2 = vsub.s32 %v988_v28, %v991_v4  ;;  %vm1067_vm15 = vcmp.lt.s32.totalorder %v5049_v29, 4 }
  0xfe   :  { %2217 = vmatprep.subr.mxu0 %v1341_v36  ;;  %4414 = vmatprep.subr.mxu1 %v1341_v36  ;;  %v1014_v43 = vsub.s32 4, %v990_v40  ;;  %vm1065_vm0 = vcmp.lt.s32.totalorder %v5049_v29, 2  ;;  %vm1066_vm2 = vcmp.lt.s32.totalorder %v5049_v29, 3  ;;  %v1073_v13 = vsel %vm1067_vm15, %v1060_v52, 920167782 }
  0xff   :  { %v181_v11 = vsel %vm98_vm7, %v180_v60, %v179_v39  ;;  %v994_v19 = vsub.s32 0, %v5467_v2  ;;  %v1069_v31 = vsel %vm1067_vm15, %v1057_v17, 2102212464  ;;  %v1072_v28 = vsel %vm1064_vm14, %v1051_v30, %v1054_v47 }
 0x100   :  { %v184_v12 = vsel %vm5397_vm5, %v4918_v44, %v181_v11  ;;  %v1074_v6 = vsel %vm1066_vm2, %v1057_v17, %v1073_v13  ;;  %v1076_v0 = vsel %vm1064_vm14, %v1054_v47, %v1057_v17  ;;  %v1077_v9 = vsel %vm1067_vm15, %v1063_v7, 1326507024 }
 0x101   :  { %4481 = vcosq.f32 %v184_v12  ;;  %v4166_v61 = vmin.u32 %v994_v19, %v5467_v2  ;;  %v1068_v23 = vsel %vm1064_vm14, %v1048_v57, %v1051_v30  ;;  %v1080_v20 = vshll.u32 %v1040_v53, 8 }
 0x102   :  { %4483 = vsinq.f32 %v184_v12  ;;  %v1070_v59 = vsel %vm1066_vm2, %v1054_v47, %v1069_v31  ;;  %v1075_v1 = vsel %vm1065_vm0, %v1072_v28, %v1074_v6  ;;  %v1078_v39 = vsel %vm1066_vm2, %v1060_v52, %v1077_v9 }
 0x103   :  { %v996_v4 = vclz %v4166_v61  ;;  %v1079_v17 = vsel %vm1065_vm0, %v1076_v0, %v1078_v39  ;;  %v5495_v48 = vmul.u32.u64.low %v1080_v20, %v1075_v1  ;;  %v5496_v7 = vmul.u32.u64.high %v1080_v20, %v1075_v1, %v5495_v48 }
 0x104   :  { %v5500_v57 = vand.u32 3, %v5420_v55  ;;  %v5502_v30 = vmul.u32.u64.low %v1080_v20, %v1079_v17  ;;  %v5503_v53 = vmul.u32.u64.high %v1080_v20, %v1079_v17, %v5502_v30  ;;  %v5506_v47 = vshrl.u32 %v4931_v5, 5 }
 0x105   :  { %v5509_v36 = vsub.s32 32, %v5026_v50  ;;  %v4167_v52 = vadd.s32 4294967294, %v996_v4  ;;  %v1071_v60 = vsel %vm1065_vm0, %v1068_v23, %v1070_v59  ;;  %v5516_v13 = vsel %vm315_vm13, %v5064_v35, 0 }
 0x106   :  { %v5519_v11 = vand.u32 31, %v5378_v46  ;;  %v5522_v19 = vadd.s32 1, %v5156_v14  ;;  %vm930_vm3 = vcmp.lt.s32.totalorder %v4903_v26, 0  ;;  %v6925_v5 = vand.u32 2147483647, %v4903_v26 }
 0x107   :  { %vm4168_vm4 = vcmp.lt.s32.totalorder %v4167_v52, 0  ;;  %v1015_v29 = vsel %vm930_vm3, %v1014_v43, %v990_v40  ;;  %v1090_v35 = vadd.s32 1, %v5496_v7  ;;  %vm1234_vm5 = vcmp.eq.s32.totalorder %v5500_v57, 2 }
 0x108   :  { %vm5527_vm6 = vcmp.le.f32.partialorder %v6925_v5, 0.7853982  ;;  %v984_v14 = vadd.s32 %v5386_v42, %v5393_v32  ;;  %v999_v28 = vsel %vm4168_vm4, 0, %v4167_v52  ;;  %v1087_v12 = vmul.u32 %v1080_v20, %v1071_v60 }
 0x109   :  { %vm1089_vm7 = vc.u32 %v5503_v53, %v5495_v48  ;;  %vm1231_vm8 = vcmp.eq.s32.totalorder %v5500_v57, 0  ;;  %v1000_v6 = vsub.s32 32, %v999_v28  ;;  %v1004_v0 = vsub.s32 4294967266, %v999_v28 }
 0x10a   :  { %v1091_v9 = vsel %vm1089_vm7, %v1090_v35, %v5496_v7  ;;  %v6892_v40 = vand.u32 2147483647, %v4901_v25  ;;  %vm1230_vm9 = vcmp.lt.s32.totalorder %v5500_v57, 2  ;;  %v5545_v43 = vsel %vm5527_vm6, 0, %v1015_v29 }
 0x10b   :  { %v1092_v42 = vadd.s32 %v1091_v9, %v1087_v12  ;;  %v841_v32 = vshll.u32 %v6904_v18, %v5026_v50  ;;  %v842_v61 = vshrl.u32 %v6895_v3, %v5509_v36  ;;  %vm188_vm10 = vweird.f32 %v4918_v44 }
 0x10c   :  { %vm2174_vm12 = vcmask 130048   ;;  %v1001_v23 = vshll.u32 %v5467_v2, %v999_v28  ;;  %v1002_v20 = vshrl.u32 %v984_v14, %v1000_v6  ;;  %v1005_v59 = vadd.s32 127, %v1004_v0 }
 0x10d   :  { %v845_v1 = vshrl.u32 %v6908_v8, %v5509_v36  ;;  %v1093_v39 = vadd.s32 536870912, %v1092_v42  ;;  %v844_v4 = vshll.u32 %v6895_v3, %v5026_v50  ;;  %v848_v17 = vshrl.u32 %v6893_v33, %v5509_v36 }
 0x10e   :  { %v851_v7 = vshrl.u32 %v6897_v41, %v5509_v36  ;;  %v1003_v30 = vor.u32 %v1002_v20, %v1001_v23  ;;  %v1006_v52 = vshll.u32 %v1005_v59, 23  ;;  %v831_v2 = vand.u32 8388607, %v6892_v40  ;;  %v5565_v5 = vpop.eup %4481 }
 0x10f   :  { %v854_v60 = vshrl.u32 %v6919_v16, %v5509_v36  ;;  %v5567_v29 = vshrl.u32 %v1093_v39, 30  ;;  %v843_v35 = vor.u32 %v842_v61, %v841_v32  ;;  %v847_v14 = vshll.u32 %v6908_v8, %v5026_v50  ;;  %v5573_v12 = vpop.eup %4483 }
 0x110   :  { %v850_v28 = vshll.u32 %v6893_v33, %v5026_v50  ;;  %v6888_v6 = vxor.u32 2147483648, %v5565_v5  ;;  %v1007_v0 = vor.u32 4788187, %v1006_v52  ;;  %v846_v9 = vor.u32 %v845_v1, %v844_v4 }
 0x111   :  { %v853_v23 = vshll.u32 %v6897_v41, %v5026_v50  ;;  %v6889_v20 = vxor.u32 2147483648, %v5573_v12  ;;  %v1095_v59 = vshll.u32 %v5567_v29, 30  ;;  %v849_v32 = vor.u32 %v848_v17, %v847_v14 }
 0x112   :  { %v852_v61 = vor.u32 %v851_v7, %v850_v28  ;;  %vm523_vm13 = vcmp.gt.s32.totalorder %v5522_v19, 0  ;;  %v1236_v39 = vsel %vm1234_vm5, %v6888_v6, %v5573_v12  ;;  %v1008_v63 = vand.u32 2147483647, %v1007_v0 }
 0x113   :  { %v1010_v52 = vcvt.s32.f32 %v1003_v30  ;;  %v855_v1 = vor.u32 %v854_v60, %v853_v23  ;;  %v1233_v50 = vsel %vm1231_vm8, %v5565_v5, %v6889_v20  ;;  %v5591_v4 = vsub.s32 %v1092_v42, %v1095_v59  ;;  %v5600_v30 = vld [vmem:[%s6866_s4] sm:$0xff]  ;;  %v5605_v60 = vld [vmem:[%s6866_s4 + $0x18] sm:$0xff] }
 0x114   :  { %v832_v17 = vor.u32 8388608, %v831_v2  ;;  %v840_v7 = vshrl.u32 %v6904_v18, %v5509_v36  ;;  %v1237_v14 = vsel %vm1230_vm9, %v1233_v50, %v1236_v39  ;;  %vm856_vm14 = vcmp.lt.s32.totalorder %v5506_v47, 1 }
 0x115   :  { %v1011_v28 = vmul.f32 %v1010_v52, %v1008_v63  ;;  %vm857_vm15 = vcmp.lt.s32.totalorder %v5506_v47, 2  ;;  %v1238_v36 = vsel %vm188_vm10, nan, %v1237_v14  ;;  %v1098_v57 = vsub.s32 0, %v5591_v4 }
 0x116   :  { %vm859_vm0 = vcmp.lt.s32.totalorder %v5506_v47, 4  ;;  %v864_v42 = vsel %vm856_vm14, %v843_v35, %v846_v9  ;;  %2218 = vmatpush1.msra.mxu0 %v1238_v36  ;;  %4416 = vmatpush1.msra.mxu1 %v1238_v36  ;;  %v868_v63 = vsel %vm856_vm14, %v846_v9, %v849_v32  ;;  %vm858_vm2 = vcmp.lt.s32.totalorder %v5506_v47, 3 }
 0x117   :  { %v1012_v2 = vxor.u32 2147483648, %v1011_v28  ;;  %v865_v0 = vsel %vm859_vm0, %v852_v61, 920167782  ;;  %v869_v23 = vsel %vm859_vm0, %v855_v1, 1326507024  ;;  %4213 = vmatmul.mubr.msk.f32.vlgmr.msra.gmra.mxu0 %vm2174_vm12, %v5600_v30  ;;  %4216 = vmatmul.mubr.msk.f32.vlgmr.msra.gmra.mxu1 %vm2174_vm12, %v5605_v60  ;;  %v4170_v59 = vmin.u32 %v1098_v57, %v5591_v4 }
 0x118   :  { %v860_v39 = vsel %vm856_vm14, %v840_v7, %v843_v35  ;;  %v861_v52 = vsel %vm859_vm0, %v849_v32, 2102212464  ;;  %v866_v14 = vsel %vm858_vm2, %v849_v32, %v865_v0  ;;  %v870_v36 = vsel %vm858_vm2, %v852_v61, %v869_v23 }
 0x119   :  { %v1013_v50 = vsel %vm930_vm3, %v1012_v2, %v1011_v28  ;;  %v872_v1 = vshll.u32 %v832_v17, 8  ;;  %v6928_v6 = vmov 0.0   ;;  %v1100_v20 = vclz %v4170_v59 }
 0x11a   :  { %2257 = vmatprep.mubr.f32.mxu0 %v6928_v6  ;;  %2340 = vmatprep.mubr.f32.mxu1 %v6928_v6  ;;  %v1016_v57 = vsel %vm5527_vm6, %v4903_v26, %v1013_v50  ;;  %v867_v22 = vsel %vm857_vm15, %v864_v42, %v866_v14  ;;  %v871_v35 = vsel %vm857_vm15, %v868_v63, %v870_v36  ;;  %v5644_v31 = vand.u32 31, %v5516_v13 }
 0x11b   :  { %4485 = vcosq.f32 %v1016_v57  ;;  %v862_v7 = vsel %vm858_vm2, %v846_v9, %v861_v52  ;;  %v5636_v32 = vmul.u32.u64.low %v872_v1, %v871_v35  ;;  %v5637_v61 = vmul.u32.u64.high %v872_v1, %v871_v35, %v5636_v32  ;;  %v5653_v9 = vld [vmem:[%s6866_s4 + $0x8] sm:$0xff] }
 0x11c   :  { %4487 = vsinq.f32 %v1016_v57  ;;  %v4171_v17 = vadd.s32 4294967294, %v1100_v20  ;;  %v5639_v28 = vmul.u32.u64.low %v872_v1, %v867_v22  ;;  %v5640_v2 = vmul.u32.u64.high %v872_v1, %v867_v22, %v5639_v28  ;;  %4214 = vmatmul.mubr.msk.f32.gmra.mxu0 %vm2174_vm12, %v5653_v9  ;;  %v5687_v57 = vld [vmem:[%s6866_s4 + $0x10] sm:$0xff] }
 0x11d   :  { %v5647_v0 = vshrl.u32 %v5378_v46, 5  ;;  %v1118_v42 = vsub.s32 4, %v5567_v29  ;;  %v5658_v20 = vsel %vm523_vm13, %v5522_v19, 0  ;;  %v5661_v22 = vand.u32 3, %v5545_v43  ;;  %2263 = vmatprep.mubr.f32.mxu0 %v6928_v6 }
 0x11e   :  { %vm4172_vm3 = vcmp.lt.s32.totalorder %v4171_v17, 0  ;;  %v863_v46 = vsel %vm857_vm15, %v860_v39, %v862_v7  ;;  %v423_v63 = vsub.s32 32, %v5519_v11  ;;  %vm1034_vm6 = vcmp.lt.s32.totalorder %v4905_v27, 0 }
 0x11f   :  { %v1103_v23 = vsel %vm4172_vm3, 0, %v4171_v17  ;;  %vm881_vm4 = vc.u32 %v5637_v61, %v5639_v28  ;;  %v1088_v19 = vadd.s32 %v5495_v48, %v5503_v53  ;;  %v882_v47 = vadd.s32 1, %v5640_v2 }
 0x120   :  { %v1104_v59 = vsub.s32 32, %v1103_v23  ;;  %v1108_v52 = vsub.s32 4294967266, %v1103_v23  ;;  %v5676_v39 = vand.u32 31, %v5658_v20  ;;  %v5681_v50 = vsel %vm1034_vm6, %v1118_v42, %v5567_v29  ;;  %4215 = vmatmul.mubr.msk.f32.gmra.mxu0 %vm2174_vm12, %v5687_v57 }
 0x121   :  { %v879_v14 = vmul.u32 %v872_v1, %v863_v46  ;;  %v6891_v36 = vand.u32 2147483647, %v4913_v37  ;;  %vm2058_vm5 = vcmp.eq.s32.totalorder %v5661_v22, 2  ;;  %v1105_v48 = vshll.u32 %v5591_v4, %v1103_v23  ;;  %4364 = vmatprep.mubr.msk.f32.mxu0 %vm2174_vm12, %v5600_v30 }
 0x122   :  { %v1106_v53 = vshrl.u32 %v1088_v19, %v1104_v59  ;;  %v1109_v35 = vadd.s32 127, %v1108_v52  ;;  %v883_v7 = vsel %vm881_vm4, %v882_v47, %v5640_v2  ;;  %vm2055_vm7 = vcmp.eq.s32.totalorder %v5661_v22, 0 }
 0x123   :  { %v884_v29 = vadd.s32 %v883_v7, %v879_v14  ;;  %v426_v1 = vshrl.u32 %v6895_v3, %v423_v63  ;;  %v429_v32 = vshrl.u32 %v6908_v8, %v423_v63  ;;  %v432_v17 = vshrl.u32 %v6893_v33, %v423_v63 }
 0x124   :  { %vm2054_vm8 = vcmp.lt.s32.totalorder %v5661_v22, 2  ;;  %v1107_v4 = vor.u32 %v1106_v53, %v1105_v48  ;;  %v1110_v42 = vshll.u32 %v1109_v35, 23  ;;  %v434_v2 = vshll.u32 %v6893_v33, %v5519_v11 }
 0x125   :  { %v435_v46 = vshrl.u32 %v6897_v41, %v423_v63  ;;  %vm1020_vm9 = vweird.f32 %v4903_v26  ;;  %v885_v23 = vadd.s32 536870912, %v884_v29  ;;  %v415_v19 = vand.u32 8388607, %v6891_v36 }
 0x126   :  { %v425_v59 = vshll.u32 %v6904_v18, %v5519_v11  ;;  %v428_v30 = vshll.u32 %v6895_v3, %v5519_v11  ;;  %vm5713_vm13 = vcmp.le.f32.partialorder %v1032_v58, 0.7853982  ;;  %v1111_v47 = vor.u32 4788187, %v1110_v42 }
 0x127   :  { %v431_v14 = vshll.u32 %v6908_v8, %v5519_v11  ;;  %v436_v48 = vor.u32 %v435_v46, %v434_v2  ;;  %v438_v53 = vshrl.u32 %v6919_v16, %v423_v63  ;;  %v5720_v35 = vshrl.u32 %v885_v23, 30 }
 0x128   :  { %v424_v7 = vshrl.u32 %v6904_v18, %v423_v63  ;;  %v427_v36 = vor.u32 %v426_v1, %v425_v59  ;;  %v430_v40 = vor.u32 %v429_v32, %v428_v30  ;;  %v5723_v33 = vpop.eup %4485  ;;  %v1112_v3 = vand.u32 2147483647, %v1111_v47 }
 0x129   :  { %v1114_v58 = vcvt.s32.f32 %v1107_v4  ;;  %v433_v41 = vor.u32 %v432_v17, %v431_v14  ;;  %v437_v42 = vshll.u32 %v6931_v10, %v5519_v11  ;;  %v5727_v44 = vpop.eup %4487  ;;  %v6902_v2 = vxor.u32 2147483648, %v5723_v33 }
 0x12a   :  { %v887_v46 = vshll.u32 %v5720_v35, 30  ;;  %v416_v23 = vor.u32 8388608, %v415_v19  ;;  %vm443_vm14 = vcmp.lt.s32.totalorder %v5647_v0, 4  ;;  %v6903_v63 = vxor.u32 2147483648, %v5727_v44 }
 0x12b   :  { %v1115_v1 = vmul.f32 %v1114_v58, %v1112_v3  ;;  %v439_v32 = vor.u32 %v438_v53, %v437_v42  ;;  %v449_v4 = vsel %vm443_vm14, %v436_v48, 920167782  ;;  %v2060_v11 = vsel %vm2058_vm5, %v6902_v2, %v5727_v44 }
 0x12c   :  { %v5740_v17 = vsub.s32 %v884_v29, %v887_v46  ;;  %vm440_vm15 = vcmp.lt.s32.totalorder %v5647_v0, 1  ;;  %vm442_vm0 = vcmp.lt.s32.totalorder %v5647_v0, 3  ;;  %v2057_v3 = vsel %vm2055_vm7, %v5723_v33, %v6903_v63 }
 0x12d   :  { %v1116_v19 = vxor.u32 2147483648, %v1115_v1  ;;  %v448_v59 = vsel %vm440_vm15, %v427_v36, %v430_v40  ;;  %v450_v30 = vsel %vm442_vm0, %v433_v41, %v449_v4  ;;  %v2061_v29 = vsel %vm2054_vm8, %v2057_v3, %v2060_v11 }
 0x12e   :  { %v890_v47 = vsub.s32 0, %v5740_v17  ;;  %vm441_vm2 = vcmp.lt.s32.totalorder %v5647_v0, 2  ;;  %v445_v14 = vsel %vm443_vm14, %v433_v41, 2102212464  ;;  %v2062_v53 = vsel %vm1020_vm9, nan, %v2061_v29 }
 0x12f   :  { %v1117_v58 = vsel %vm1034_vm6, %v1116_v19, %v1115_v1  ;;  %v452_v42 = vsel %vm440_vm15, %v430_v40, %v433_v41  ;;  %v453_v22 = vsel %vm443_vm14, %v439_v32, 1326507024  ;;  %2304 = vmatprep.subr.mxu1 %v2062_v53  ;;  %v5773_v4 = vsel %vm5713_vm13, 0, %v5681_v50 }
 0x130   :  { %v1120_v46 = vsel %vm5713_vm13, %v4905_v27, %v1117_v58  ;;  %v4162_v11 = vmin.u32 %v890_v47, %v5740_v17  ;;  %v451_v1 = vsel %vm441_vm2, %v448_v59, %v450_v30  ;;  %v444_v41 = vsel %vm440_vm15, %v424_v7, %v427_v36 }
 0x131   :  { %4489 = vcosq.f32 %v1120_v46  ;;  %v454_v32 = vsel %vm442_vm0, %v436_v48, %v453_v22  ;;  %v456_v3 = vshll.u32 %v416_v23, 8  ;;  %v446_v52 = vsel %vm442_vm0, %v430_v40, %v445_v14 }
 0x132   :  { %4491 = vsinq.f32 %v1120_v46  ;;  %v892_v19 = vclz %v4162_v11  ;;  %v455_v50 = vsel %vm441_vm2, %v452_v42, %v454_v32  ;;  %v5794_v36 = vand.u32 3, %v5773_v4 }
 0x133   :  { %v5786_v29 = vmul.u32.u64.low %v456_v3, %v455_v50  ;;  %v5787_v47 = vmul.u32.u64.high %v456_v3, %v455_v50, %v5786_v29  ;;  %v5789_v59 = vmul.u32.u64.low %v456_v3, %v451_v1  ;;  %v5790_v30 = vmul.u32.u64.high %v456_v3, %v451_v1, %v5789_v59 }
 0x134   :  { %v4163_v48 = vadd.s32 4294967294, %v892_v19  ;;  %v527_v7 = vsub.s32 32, %v5676_v39  ;;  %v447_v23 = vsel %vm441_vm2, %v444_v41, %v446_v52  ;;  %v5800_v40 = vsub.s32 32, %v5644_v31 }
 0x135   :  { %v5803_v14 = vshrl.u32 %v5658_v20, 5  ;;  %v880_v53 = vadd.s32 %v5639_v28, %v5637_v61  ;;  %vm465_vm6 = vc.u32 %v5787_v47, %v5789_v59  ;;  %v466_v22 = vadd.s32 1, %v5790_v30 }
 0x136   :  { %vm4164_vm3 = vcmp.lt.s32.totalorder %v4163_v48, 0  ;;  %vm2161_vm4 = vcmp.eq.s32.totalorder %v5794_v36, 2  ;;  %v463_v11 = vmul.u32 %v456_v3, %v447_v23  ;;  %v6907_v20 = vand.u32 2147483647, %v4915_v38 }
 0x137   :  { %v895_v58 = vsel %vm4164_vm3, 0, %v4163_v48  ;;  %vm2158_vm5 = vcmp.eq.s32.totalorder %v5794_v36, 0  ;;  %v467_v61 = vsel %vm465_vm6, %v466_v22, %v5790_v30  ;;  %v528_v28 = vshrl.u32 %v6904_v18, %v527_v7 }
 0x138   :  { %v896_v0 = vsub.s32 32, %v895_v58  ;;  %v900_v46 = vsub.s32 4294967266, %v895_v58  ;;  %v6932_v1 = vmov 2475754826   ;;  %v533_v32 = vshrl.u32 %v6908_v8, %v527_v7 }
 0x139   :  { %v530_v41 = vshrl.u32 %v6932_v1, %v527_v7  ;;  %vm2157_vm7 = vcmp.lt.s32.totalorder %v5794_v36, 2  ;;  %v897_v19 = vshll.u32 %v5740_v17, %v895_v58  ;;  %v468_v29 = vadd.s32 %v467_v61, %v463_v11 }
 0x13a   :  { %v898_v52 = vshrl.u32 %v880_v53, %v896_v0  ;;  %v901_v50 = vadd.s32 127, %v900_v46  ;;  %vm1124_vm8 = vweird.f32 %v4905_v27  ;;  %v529_v3 = vshll.u32 %v6904_v18, %v5676_v39 }
 0x13b   :  { %v6933_v48 = vmov 2102212464   ;;  %v539_v22 = vshrl.u32 %v6931_v10, %v527_v7  ;;  %vm826_vm13 = vcmp.lt.s32.totalorder %v4901_v25, 0  ;;  %v469_v17 = vadd.s32 536870912, %v468_v29 }
 0x13c   :  { %v536_v30 = vshrl.u32 %v6933_v48, %v527_v7  ;;  %v538_v23 = vshll.u32 %v6933_v48, %v5676_v39  ;;  %v899_v2 = vor.u32 %v898_v52, %v897_v19  ;;  %v902_v63 = vshll.u32 %v901_v50, 23 }
 0x13d   :  { %v532_v53 = vshll.u32 %v6932_v1, %v5676_v39  ;;  %v519_v58 = vand.u32 8388607, %v6907_v20  ;;  %v535_v0 = vshll.u32 %v6908_v8, %v5676_v39  ;;  %v542_v11 = vshrl.u32 %v6919_v16, %v527_v7 }
 0x13e   :  { %v540_v46 = vor.u32 %v539_v22, %v538_v23  ;;  %v5835_v61 = vpop.eup %4489  ;;  %v6934_v18 = vand.u32 2147483647, %v4901_v25  ;;  %v903_v52 = vor.u32 4788187, %v902_v63  ;;  %v5843_v50 = vshrl.u32 %v469_v17, 30 }
 0x13f   :  { %v531_v42 = vor.u32 %v530_v41, %v529_v3  ;;  %v534_v49 = vor.u32 %v533_v32, %v532_v53  ;;  %v5845_v20 = vpop.eup %4491  ;;  %v1132_v8 = vxor.u32 2147483648, %v5835_v61  ;;  %v906_v23 = vcvt.s32.f32 %v899_v2 }
 0x140   :  { %vm5839_vm14 = vcmp.le.f32.partialorder %v6934_v18, 0.7853982  ;;  %v537_v22 = vor.u32 %v536_v30, %v535_v0  ;;  %v541_v7 = vshll.u32 %v6931_v10, %v5676_v39  ;;  %v1129_v62 = vxor.u32 2147483648, %v5845_v20 }
 0x141   :  { %v904_v18 = vand.u32 2147483647, %v903_v52  ;;  %v471_v24 = vshll.u32 %v5843_v50, 30  ;;  %vm547_vm15 = vcmp.lt.s32.totalorder %v5803_v14, 4  ;;  %v2163_v63 = vsel %vm2161_vm4, %v1132_v8, %v5845_v20 }
 0x142   :  { %v520_v41 = vor.u32 8388608, %v519_v58  ;;  %v543_v32 = vor.u32 %v542_v11, %v541_v7  ;;  %v553_v2 = vsel %vm547_vm15, %v540_v46, 920167782  ;;  %v2160_v39 = vsel %vm2158_vm5, %v5835_v61, %v1129_v62 }
 0x143   :  { %v907_v3 = vmul.f32 %v906_v23, %v904_v18  ;;  %v5865_v30 = vsub.s32 %v468_v29, %v471_v24  ;;  %vm544_vm0 = vcmp.lt.s32.totalorder %v5803_v14, 1  ;;  %v2164_v17 = vsel %vm2157_vm7, %v2160_v39, %v2163_v63 }
 0x144   :  { %vm546_vm2 = vcmp.lt.s32.totalorder %v5803_v14, 3  ;;  %v549_v53 = vsel %vm547_vm15, %v537_v22, 2102212464  ;;  %v552_v58 = vsel %vm544_vm0, %v531_v42, %v534_v49  ;;  %v2165_v0 = vsel %vm1124_vm8, nan, %v2164_v17 }
 0x145   :  { %v908_v11 = vxor.u32 2147483648, %v907_v3  ;;  %v474_v24 = vsub.s32 0, %v5865_v30  ;;  %v554_v29 = vsel %vm546_vm2, %v537_v22, %v553_v2  ;;  %4360 = vmatprep.subr.mxu0 %v2165_v0  ;;  %v6937_v36 = vsub.s32 4, %v5720_v35 }
 0x146   :  { %vm545_vm3 = vcmp.lt.s32.totalorder %v5803_v14, 2  ;;  %v556_v23 = vsel %vm544_vm0, %v534_v49, %v537_v22  ;;  %v557_v7 = vsel %vm547_vm15, %v543_v32, 1326507024  ;;  %4361 = vmatpush3.msra.mxu0 %v2165_v0  ;;  %v548_v2 = vsel %vm544_vm0, %v528_v28, %v531_v42 }
 0x147   :  { %v911_v52 = vsel %vm826_vm13, %v6937_v36, %v5720_v35  ;;  %v909_v18 = vsel %vm826_vm13, %v908_v11, %v907_v3  ;;  %v4146_v63 = vmin.u32 %v474_v24, %v5865_v30  ;;  %v550_v35 = vsel %vm546_vm2, %v534_v49, %v549_v53 }
 0x148   :  { %v912_v39 = vsel %vm5839_vm14, %v4901_v25, %v909_v18  ;;  %v555_v22 = vsel %vm545_vm3, %v552_v58, %v554_v29  ;;  %v558_v32 = vsel %vm546_vm2, %v540_v46, %v557_v7  ;;  %v560_v3 = vshll.u32 %v520_v41, 8 }
 0x149   :  { %v5906_v17 = vsel %vm5839_vm14, 0, %v911_v52  ;;  %4493 = vcosq.f32 %v912_v39  ;;  %v476_v42 = vclz %v4146_v63  ;;  %v559_v49 = vsel %vm545_vm3, %v556_v23, %v558_v32 }
 0x14a   :  { %4495 = vsinq.f32 %v912_v39  ;;  %v5910_v28 = vmul.u32.u64.low %v560_v3, %v559_v49  ;;  %v5911_v53 = vmul.u32.u64.high %v560_v3, %v559_v49, %v5910_v28  ;;  %v304_v0 = vand.u32 2147483647, %v4910_v34 }
 0x14b   :  { %v4147_v58 = vadd.s32 4294967294, %v476_v42  ;;  %v551_v46 = vsel %vm545_vm3, %v548_v2, %v550_v35  ;;  %v5916_v41 = vmul.u32.u64.low %v560_v3, %v555_v22  ;;  %v5917_v11 = vmul.u32.u64.high %v560_v3, %v555_v22, %v5916_v41 }
 0x14c   :  { %v5921_v19 = vshrl.u32 %v5516_v13, 5  ;;  %v5924_v24 = vand.u32 3, %v5906_v17  ;;  %v464_v29 = vadd.s32 %v5789_v59, %v5787_v47  ;;  %v567_v52 = vmul.u32 %v560_v3, %v551_v46 }
 0x14d   :  { %vm4148_vm6 = vcmp.lt.s32.totalorder %v4147_v58, 0  ;;  %vm569_vm4 = vc.u32 %v5911_v53, %v5916_v41  ;;  %v5932_v14 = vand.u32 8388607, %v304_v0  ;;  %v570_v13 = vadd.s32 1, %v5917_v11 }
 0x14e   :  { %v479_v36 = vsel %vm4148_vm6, 0, %v4147_v58  ;;  %v322_v18 = vshrl.u32 %v6932_v1, %v5800_v40  ;;  %v6938_v47 = vmov 2131351028   ;;  %v328_v2 = vshrl.u32 %v6933_v48, %v5800_v40 }
 0x14f   :  { %v480_v23 = vsub.s32 32, %v479_v36  ;;  %v484_v7 = vsub.s32 4294967266, %v479_v36  ;;  %v481_v63 = vshll.u32 %v5865_v30, %v479_v36  ;;  %v325_v59 = vshrl.u32 %v6938_v47, %v5800_v40 }
 0x150   :  { %v330_v35 = vshll.u32 %v6933_v48, %v5644_v31  ;;  %vm1952_vm5 = vcmp.eq.s32.totalorder %v5924_v24, 0  ;;  %v571_v32 = vsel %vm569_vm4, %v570_v13, %v5917_v11  ;;  %v331_v3 = vshrl.u32 %v6931_v10, %v5800_v40 }
 0x151   :  { %v482_v39 = vshrl.u32 %v464_v29, %v480_v23  ;;  %v485_v22 = vadd.s32 127, %v484_v7  ;;  %vm1951_vm7 = vcmp.lt.s32.totalorder %v5924_v24, 2  ;;  %v572_v30 = vadd.s32 %v571_v32, %v567_v52 }
 0x152   :  { %v6939_v42 = vmov 683565275   ;;  %v324_v28 = vshll.u32 %v6932_v1, %v5644_v31  ;;  %v334_v48 = vshrl.u32 %v6919_v16, %v5800_v40  ;;  %vm916_vm13 = vweird.f32 %v4901_v25  ;;  %v2728_v16 = vld [vmem:[%s6867_s5 + $0x18] sm:$0xff] }
 0x153   :  { %v321_v49 = vshll.u32 %v6939_v42, %v5644_v31  ;;  %v483_v58 = vor.u32 %v482_v39, %v481_v63  ;;  %v486_v46 = vshll.u32 %v485_v22, 23  ;;  %v327_v11 = vshll.u32 %v6938_v47, %v5644_v31  ;;  %2746 = vperm.xlu1 %4468, %v2728_v16  }
 0x154   :  { %v332_v29 = vor.u32 %v331_v3, %v330_v35  ;;  %vm1955_vm14 = vcmp.eq.s32.totalorder %v5924_v24, 2  ;;  %vm410_vm15 = vcmp.lt.s32.totalorder %v4913_v37, 0  ;;  %v573_v36 = vadd.s32 536870912, %v572_v30 }
 0x155   :  { %v320_v52 = vshrl.u32 %v6939_v42, %v5800_v40  ;;  %v333_v1 = vshll.u32 %v6931_v10, %v5644_v31  ;;  %v487_v23 = vor.u32 4788187, %v486_v46  ;;  %v323_v7 = vor.u32 %v322_v18, %v321_v49  ;;  %v2727_v10 = vld [vmem:[%s6867_s5 + $0x10] sm:$0xff] }
 0x156   :  { %v326_v13 = vor.u32 %v325_v59, %v324_v28  ;;  %v329_v63 = vor.u32 %v328_v2, %v327_v11  ;;  %v5967_v47 = vpop.eup %4493  ;;  %v5969_v35 = vshrl.u32 %v573_v36, 30  ;;  %v312_v39 = vor.u32 8388608, %v5932_v14  ;;  %v2725_v36 = vld [vmem:[%s6867_s5] sm:$0xff] }
 0x157   :  { %v335_v22 = vor.u32 %v334_v48, %v333_v1  ;;  %vm339_vm0 = vcmp.lt.s32.totalorder %v5921_v19, 4  ;;  %v5976_v31 = vpop.eup %4495  ;;  %v924_v40 = vxor.u32 2147483648, %v5967_v47  ;;  %v488_v18 = vand.u32 2147483647, %v487_v23  ;;  %2741 = vperm.xlu1 %4468, %v2727_v10  }
 0x158   :  { %v490_v59 = vcvt.s32.f32 %v483_v58  ;;  %v345_v2 = vsel %vm339_vm0, %v332_v29, 920167782  ;;  %v921_v32 = vxor.u32 2147483648, %v5976_v31  ;;  %v575_v14 = vshll.u32 %v5969_v35, 30 }
 0x159   :  { %vm336_vm2 = vcmp.lt.s32.totalorder %v5921_v19, 1  ;;  %vm338_vm3 = vcmp.lt.s32.totalorder %v5921_v19, 3  ;;  %v1957_v3 = vsel %vm1955_vm14, %v924_v40, %v5976_v31  ;;  %v349_v11 = vsel %vm339_vm0, %v335_v22, 1326507024 }
 0x15a   :  { %v491_v42 = vmul.f32 %v490_v59, %v488_v18  ;;  %v344_v49 = vsel %vm336_vm2, %v323_v7, %v326_v13  ;;  %v348_v28 = vsel %vm336_vm2, %v326_v13, %v329_v63  ;;  %v1954_v48 = vsel %vm1952_vm5, %v5967_v47, %v921_v32 }
 0x15b   :  { %v576_v58 = vsub.s32 %v572_v30, %v575_v14  ;;  %v346_v46 = vsel %vm338_vm3, %v329_v63, %v345_v2  ;;  %v1958_v1 = vsel %vm1951_vm7, %v1954_v48, %v1957_v3  ;;  %vm337_vm6 = vcmp.lt.s32.totalorder %v5921_v19, 2  ;;  %2731 = vperm.xlu1 %4468, %v2725_v36  }
 0x15c   :  { %v492_v16 = vxor.u32 2147483648, %v491_v42  ;;  %v350_v23 = vsel %vm338_vm3, %v332_v29, %v349_v11  ;;  %v1959_v30 = vsel %vm916_vm13, nan, %v1958_v1  ;;  %v341_v22 = vsel %vm339_vm0, %v329_v63, 2102212464  ;;  %v3207_v11 = vld [vmem:[%s6869_s7 + $0x10] sm:$0xff] }
 0x15d   :  { %v578_v10 = vsub.s32 0, %v576_v58  ;;  %v351_v18 = vsel %vm337_vm6, %v348_v28, %v350_v23  ;;  %2305 = vmatpush1.msra.mxu1 %v1959_v30  ;;  %v6940_v24 = vand.u32 2147483647, %v4913_v37  ;;  %v347_v2 = vsel %vm337_vm6, %v344_v49, %v346_v46  ;;  %v3205_v23 = vld [vmem:[%s6869_s7] sm:$0xff] }
 0x15e   :  { %v493_v29 = vsel %vm410_vm15, %v492_v16, %v491_v42  ;;  %v352_v14 = vshll.u32 %v312_v39, 8  ;;  %v494_v63 = vsub.s32 4, %v5843_v50  ;;  %v340_v48 = vsel %vm336_vm2, %v320_v52, %v323_v7 }
 0x15f   :  { %vm6019_vm4 = vcmp.le.f32.partialorder %v6940_v24, 0.7853982  ;;  %v4150_v28 = vmin.u32 %v578_v10, %v576_v58  ;;  %v342_v42 = vsel %vm338_vm3, %v326_v13, %v341_v22  ;;  %v1021_v16 = vadd.s32 3, %v5545_v43  ;;  %3221 = vperm.xlu1 %4468, %v3207_v11  }
 0x160   :  { %v496_v3 = vsel %vm6019_vm4, %v4913_v37, %v493_v29  ;;  %v6038_v39 = vmul.u32.u64.low %v352_v14, %v351_v18  ;;  %v6039_v49 = vmul.u32.u64.high %v352_v14, %v351_v18, %v6038_v39  ;;  %v495_v52 = vsel %vm410_vm15, %v494_v63, %v5843_v50 }
 0x161   :  { %4497 = vcosq.f32 %v496_v3  ;;  %v580_v46 = vclz %v4150_v28  ;;  %v6041_v36 = vmul.u32.u64.low %v352_v14, %v347_v2  ;;  %v6042_v1 = vmul.u32.u64.high %v352_v14, %v347_v2, %v6041_v36  ;;  %v3671_v2 = vld [vmem:[%s6871_s9 + $0x10] sm:$0xff] }
 0x162   :  { %4499 = vsinq.f32 %v496_v3  ;;  %v343_v13 = vsel %vm337_vm6, %v340_v48, %v342_v42  ;;  %v6059_v43 = vsel %vm6019_vm4, 0, %v495_v52  ;;  %v1022_v22 = vand.u32 3, %v1021_v16 }
 0x163   :  { %v4151_v7 = vadd.s32 4294967294, %v580_v46  ;;  %vm361_vm5 = vc.u32 %v6039_v49, %v6041_v36  ;;  %v362_v30 = vadd.s32 1, %v6042_v1  ;;  %v359_v50 = vmul.u32 %v352_v14, %v343_v13  ;;  %3211 = vperm.xlu1 %4468, %v3205_v23  }
 0x164   :  { %v568_v19 = vadd.s32 %v5916_v41, %v5911_v53  ;;  %vm1024_vm14 = vcmp.eq.s32.totalorder %v1022_v22, 0  ;;  %v6943_v14 = vxor.u32 2147483648, %v5727_v44  ;;  %v1538_v11 = vand.u32 3, %v6059_v43 }
 0x165   :  { %vm4152_vm7 = vcmp.lt.s32.totalorder %v4151_v7, 0  ;;  %v363_v29 = vsel %vm361_vm5, %v362_v30, %v6042_v1  ;;  %vm1027_vm15 = vcmp.eq.s32.totalorder %v1022_v22, 2  ;;  %vm1023_vm0 = vcmp.lt.s32.totalorder %v1022_v22, 2 }
 0x166   :  { %v583_v10 = vsel %vm4152_vm7, 0, %v4151_v7  ;;  %v364_v63 = vadd.s32 %v363_v29, %v359_v50  ;;  %v1026_v48 = vsel %vm1024_vm14, %v5723_v33, %v6943_v14  ;;  %v6944_v39 = vxor.u32 2147483648, %v5723_v33 }
 0x167   :  { %v584_v18 = vsub.s32 32, %v583_v10  ;;  %v588_v24 = vsub.s32 4294967266, %v583_v10  ;;  %v585_v59 = vshll.u32 %v576_v58, %v583_v10  ;;  %3685 = vperm.xlu1 %4468, %v3671_v2   ;;  %v3669_v58 = vld [vmem:[%s6871_s9] sm:$0xff]  ;;  %vm1543_vm2 = vcmp.eq.s32.totalorder %v1538_v11, 2 }
 0x168   :  { %v365_v53 = vadd.s32 536870912, %v364_v63  ;;  %v1029_v46 = vsel %vm1027_vm15, %v6944_v39, %v5727_v44  ;;  %v1125_v22 = vadd.s32 3, %v5773_v4  ;;  %vm1540_vm3 = vcmp.eq.s32.totalorder %v1538_v11, 0 }
 0x169   :  { %v586_v3 = vshrl.u32 %v568_v19, %v584_v18  ;;  %v589_v28 = vadd.s32 127, %v588_v24  ;;  %v1030_v16 = vsel %vm1023_vm0, %v1026_v48, %v1029_v46  ;;  %vm500_vm6 = vweird.f32 %v4913_v37 }
 0x16a   :  { %v6077_v1 = vshrl.u32 %v365_v53, 30  ;;  %v6083_v13 = vsel %vm1020_vm9, nan, %v1030_v16  ;;  %vm1539_vm9 = vcmp.lt.s32.totalorder %v1538_v11, 2  ;;  %vm514_vm4 = vcmp.lt.s32.totalorder %v4915_v38, 0 }
 0x16b   :  { %v587_v41 = vor.u32 %v586_v3, %v585_v59  ;;  %v590_v42 = vshll.u32 %v589_v28, 23  ;;  %3675 = vperm.xlu1 %4468, %v3669_v58   ;;  %v1126_v3 = vand.u32 3, %v1125_v22  ;;  %v598_v11 = vsub.s32 4, %v5969_v35 }
 0x16c   :  { %v367_v44 = vshll.u32 %v6077_v1, 30 }
 0x16d   :  { %v591_v7 = vor.u32 4788187, %v590_v42  ;;  %v594_v50 = vcvt.s32.f32 %v587_v41  ;;  %vm1128_vm7 = vcmp.eq.s32.totalorder %v1126_v3, 0  ;;  %vm1131_vm14 = vcmp.eq.s32.totalorder %v1126_v3, 2 }
 0x16e   :  { %v6079_v52 = vpop.eup %4497  ;;  %v368_v19 = vsub.s32 %v364_v63, %v367_v44  ;;  %v6945_v63 = vand.u32 2147483647, %v4915_v38  ;;  %v1130_v42 = vsel %vm1128_vm7, %v5835_v61, %v1129_v62  ;;  %vm1127_vm15 = vcmp.lt.s32.totalorder %v1126_v3, 2 }
 0x16f   :  { %v6085_v23 = vpop.eup %4499  ;;  %v508_v30 = vxor.u32 2147483648, %v6079_v52  ;;  %v592_v10 = vand.u32 2147483647, %v591_v7  ;;  %v1133_v39 = vsel %vm1131_vm14, %v1132_v8, %v5845_v20  ;;  %v599_v7 = vsel %vm514_vm4, %v598_v11, %v5969_v35 }
 0x170   :  { %v505_v33 = vxor.u32 2147483648, %v6085_v23  ;;  %v370_v2 = vsub.s32 0, %v368_v19  ;;  %vm6103_vm5 = vcmp.le.f32.partialorder %v6945_v63, 0.7853982  ;;  %v1134_v58 = vsel %vm1127_vm15, %v1130_v42, %v1133_v39 }
 0x171   :  { %v1545_v26 = vsel %vm1543_vm2, %v508_v30, %v6085_v23  ;;  %v595_v24 = vmul.f32 %v594_v50, %v592_v10  ;;  %v6121_v16 = vsel %vm1124_vm8, nan, %v1134_v58  ;;  %v360_v44 = vadd.s32 %v6041_v36, %v6039_v49 }
 0x172   :  { %v1542_v18 = vsel %vm1540_vm3, %v6079_v52, %v505_v33  ;;  %v4142_v28 = vmin.u32 %v370_v2, %v368_v19  ;;  %v6130_v8 = vsel %vm6103_vm5, 0, %v599_v7  ;;  %v917_v20 = vadd.s32 3, %v5906_v17 }
 0x173   :  { %v1546_v29 = vsel %vm1539_vm9, %v1542_v18, %v1545_v26  ;;  %v596_v4 = vxor.u32 2147483648, %v595_v24  ;;  %v501_v26 = vadd.s32 3, %v6059_v43  ;;  %v1641_v35 = vand.u32 3, %v6130_v8 }
 0x174   :  { %v1547_v59 = vsel %vm500_vm6, nan, %v1546_v29  ;;  %v372_v41 = vclz %v4142_v28  ;;  %v918_v29 = vand.u32 3, %v917_v20  ;;  %vm604_vm8 = vweird.f32 %v4915_v38 }
 0x175   :  { %2306 = vmatprep.subr.mxu1 %v1547_v59  ;;  %v597_v48 = vsel %vm514_vm4, %v596_v4, %v595_v24  ;;  %v502_v49 = vand.u32 3, %v501_v26  ;;  %vm1642_vm2 = vcmp.lt.s32.totalorder %v1641_v35, 2  ;;  %vm306_vm3 = vcmp.lt.s32.totalorder %v4910_v34, 0 }
 0x176   :  { %v600_v53 = vsel %vm6103_vm5, %v4915_v38, %v597_v48  ;;  %v4143_v46 = vadd.s32 4294967294, %v372_v41  ;;  %vm1643_vm9 = vcmp.eq.s32.totalorder %v1641_v35, 0  ;;  %vm1646_vm4 = vcmp.eq.s32.totalorder %v1641_v35, 2  ;;  %v2911_v38 = vld [vmem:[%s6868_s6 + $0x10] sm:$0xff] }
 0x177   :  { %4501 = vcosq.f32 %v600_v53  ;;  %vm920_vm5 = vcmp.eq.s32.totalorder %v918_v29, 0  ;;  %vm923_vm7 = vcmp.eq.s32.totalorder %v918_v29, 2  ;;  %vm504_vm14 = vcmp.eq.s32.totalorder %v502_v49, 0 }
 0x178   :  { %4503 = vsinq.f32 %v600_v53  ;;  %vm4144_vm0 = vcmp.lt.s32.totalorder %v4143_v46, 0  ;;  %v922_v28 = vsel %vm920_vm5, %v5967_v47, %v921_v32  ;;  %v925_v14 = vsel %vm923_vm7, %v924_v40, %v5976_v31 }
 0x179   :  { %v375_v62 = vsel %vm4144_vm0, 0, %v4143_v46  ;;  %vm507_vm15 = vcmp.eq.s32.totalorder %v502_v49, 2  ;;  %v506_v32 = vsel %vm504_vm14, %v6079_v52, %v505_v33  ;;  %vm6164_vm0 = vcmp.le.f32.partialorder %v304_v0, 0.7853982 }
 0x17a   :  { %v376_v10 = vsub.s32 32, %v375_v62  ;;  %v380_v50 = vsub.s32 4294967266, %v375_v62  ;;  %v377_v27 = vshll.u32 %v368_v19, %v375_v62  ;;  %v509_v53 = vsel %vm507_vm15, %v508_v30, %v6085_v23 }
 0x17b   :  { %v390_v31 = vsub.s32 4, %v6077_v1  ;;  %v813_v30 = vadd.s32 3, %v5146_v51  ;;  %v293_v51 = vadd.s32 3, %v5315_v54  ;;  %v6950_v62 = vxor.u32 2147483648, %v5251_v45 }
 0x17c   :  { %v378_v61 = vshrl.u32 %v360_v44, %v376_v10  ;;  %v381_v22 = vadd.s32 127, %v380_v50  ;;  %v6951_v54 = vxor.u32 2147483648, %v5245_v21  ;;  %v6953_v35 = vxor.u32 2147483648, %v5435_v56 }
 0x17d   :  { %v391_v23 = vsel %vm306_vm3, %v390_v31, %v6077_v1  ;;  %v814_v58 = vand.u32 3, %v813_v30  ;;  %v294_v37 = vand.u32 3, %v293_v51 }
 0x17e   :  { %v379_v18 = vor.u32 %v378_v61, %v377_v27  ;;  %v382_v24 = vshll.u32 %v381_v22, 23  ;;  %v393_v1 = vsel %vm6164_vm0, 0, %v391_v23  ;;  %v6952_v27 = vxor.u32 2147483648, %v5439_v15 }
 0x17f   :  { %v397_v25 = vadd.s32 3, %v393_v1  ;;  %vm299_vm5 = vcmp.eq.s32.totalorder %v294_v37, 2 }
 0x180   :  { %v383_v2 = vor.u32 4788187, %v382_v24  ;;  %v386_v19 = vcvt.s32.f32 %v379_v18  ;;  %v301_v18 = vsel %vm299_vm5, %v6953_v35, %v5439_v15 }
 0x181   :  { %v398_v50 = vand.u32 3, %v397_v25 }
 0x182   :  { %v384_v17 = vand.u32 2147483647, %v383_v2 }
 0x184   :  { %v6136_v36 = vpop.eup %4501  ;;  %v387_v3 = vmul.f32 %v386_v19, %v384_v17 }
 0x185   :  { %v6139_v59 = vpop.eup %4503  ;;  %v612_v43 = vxor.u32 2147483648, %v6136_v36 }
 0x186   :  { %v609_v4 = vxor.u32 2147483648, %v6139_v59  ;;  %v388_v11 = vxor.u32 2147483648, %v387_v3 }
 0x187   :  { %v1648_v63 = vsel %vm1646_vm4, %v612_v43, %v6139_v59  ;;  %vm503_vm4 = vcmp.lt.s32.totalorder %v502_v49, 2 }
 0x188   :  { %v1645_v48 = vsel %vm1643_vm9, %v6136_v36, %v609_v4  ;;  %vm919_vm9 = vcmp.lt.s32.totalorder %v918_v29, 2  ;;  %v389_v33 = vsel %vm306_vm3, %v388_v11, %v387_v3  ;;  %v510_v0 = vsel %vm503_vm4, %v506_v32, %v509_v53  ;;  %v6220_v11 = vld [vmem:[%s6865_s3] sm:$0xff]  ;;  %v6957_v32 = vld [vmem:[#allocation9_spill] sm:$0xff] }
 0x189   :  { %v1649_v41 = vsel %vm1642_vm2, %v1645_v48, %v1648_v63  ;;  %v926_v42 = vsel %vm919_vm9, %v922_v28, %v925_v14  ;;  %v392_v52 = vsel %vm6164_vm0, %v4910_v34, %v389_v33  ;;  %v511_v46 = vsel %vm500_vm6, nan, %v510_v0  ;;  %v44_v33 = vld [vmem:[%s6863_s1 + $0x8] sm:$0x7f] }
 0x18a   :  { %v1650_v40 = vsel %vm604_vm8, nan, %v1649_v41  ;;  %4505 = vcosq.f32 %v392_v52  ;;  %v927_v39 = vsel %vm916_vm13, nan, %v926_v42  ;;  %vm816_vm13 = vcmp.eq.s32.totalorder %v814_v58, 0  ;;  %v2167_v42 = vld [vmem:[%s6865_s3 + $0x8] sm:$0xff] }
 0x18b   :  { %4362 = vmatprep.subr.mxu0 %v1650_v40  ;;  %4507 = vsinq.f32 %v392_v52  ;;  %vm819_vm6 = vcmp.eq.s32.totalorder %v814_v58, 2  ;;  %v818_v44 = vsel %vm816_vm13, %v5245_v21, %v6950_v62  ;;  %vm815_vm2 = vcmp.lt.s32.totalorder %v814_v58, 2  ;;  %v47_v52 = vld [vmem:[%s6863_s1 + $0x20] sm:$0x7f] }
 0x18c   :  { %4363 = vmatpush3.msra.mxu0 %v1650_v40  ;;  %v821_v10 = vsel %vm819_vm6, %v6951_v54, %v5251_v45  ;;  %vm296_vm3 = vcmp.eq.s32.totalorder %v294_v37, 0  ;;  %v6954_v21 = vxor.u32 2147483648, %v5573_v12  ;;  %v6955_v29 = vxor.u32 2147483648, %v5565_v5 }
 0x18d   :  { %2579 = vmatprep.subr.mxu0 %v6083_v13  ;;  %4365 = vmatmul.mubr.msk.f32.vlgmr.msra.gmra.mxu0 %vm2174_vm12, %v5653_v9  ;;  %v189_v13 = vadd.s32 3, %v5420_v55  ;;  %v1435_v55 = vand.u32 3, %v393_v1  ;;  %v822_v20 = vsel %vm815_vm2, %v818_v44, %v821_v10  ;;  %v298_v61 = vsel %vm296_vm3, %v5435_v56, %v6952_v27  ;;  %v45_v1 = vld [vmem:[%s6863_s1 + $0x10] sm:$0x7f] }
 0x18e   :  { %2580 = vmatpush1.msra.mxu0 %v927_v39  ;;  %4367 = vmatprep.mubr.msk.f32.mxu0 %vm2174_vm12, %v5687_v57  ;;  %vm403_vm0 = vcmp.eq.s32.totalorder %v398_v50, 2  ;;  %vm400_vm4 = vcmp.eq.s32.totalorder %v398_v50, 0  ;;  %vm399_vm6 = vcmp.lt.s32.totalorder %v398_v50, 2  ;;  %vm396_vm2 = vweird.f32 %v4910_v34  ;;  %v4753_v34 = vld [vmem:[%s6866_s4] sm:$0xff]  ;;  %v4754_v39 = vld [vmem:[%s6866_s4 + $0x18] sm:$0xff] }
 0x18f   :  { %2581 = vmatprep.subr.mxu0 %v511_v46  ;;  %v190_v7 = vand.u32 3, %v189_v13  ;;  %vm1440_vm15 = vcmp.eq.s32.totalorder %v1435_v55, 2  ;;  %vm1437_vm9 = vcmp.eq.s32.totalorder %v1435_v55, 0  ;;  %vm1436_vm13 = vcmp.lt.s32.totalorder %v1435_v55, 2  ;;  %v2910_v46 = vld [vmem:[%s6868_s6 + $0x8] sm:$0xff] }
 0x190   :  { %vm295_vm3 = vcmp.lt.s32.totalorder %v294_v37, 2  ;;  %v605_v40 = vadd.s32 3, %v6130_v8  ;;  %v43_v8 = vld [vmem:[%s6863_s1] sm:$0x7f] }
 0x191   :  { %4368 = vmatmul.mubr.msk.f32.gmra.mxu0 %vm2174_vm12, %v5605_v60  ;;  %vm192_vm7 = vcmp.eq.s32.totalorder %v190_v7, 0  ;;  %vm195_vm14 = vcmp.eq.s32.totalorder %v190_v7, 2  ;;  %v302_v63 = vsel %vm295_vm3, %v298_v61, %v301_v18  ;;  %vm191_vm5 = vcmp.lt.s32.totalorder %v190_v7, 2 }
 0x192   :  { %2615 = vmatprep.mubr.f32.mxu0 %v6928_v6  ;;  %v194_v45 = vsel %vm192_vm7, %v5565_v5, %v6954_v21  ;;  %v197_v2 = vsel %vm195_vm14, %v6955_v29, %v5573_v12  ;;  %v823_v12 = vsel %vm812_vm1, nan, %v822_v20  ;;  %v303_v41 = vsel %vm292_vm11, nan, %v302_v63 }
 0x193   :  { %v198_v48 = vsel %vm191_vm5, %v194_v45, %v197_v2  ;;  %vm2926_vm1 = vcmask 1046528   ;;  %v606_v0 = vand.u32 3, %v605_v40  ;;  %vm2913_vm14 = vcmask 56320  }
 0x194   :  { %v199_v31 = vsel %vm188_vm10, nan, %v198_v48 }
 0x195   :  { %vm608_vm11 = vcmp.eq.s32.totalorder %v606_v0, 0  ;;  %vm611_vm10 = vcmp.eq.s32.totalorder %v606_v0, 2  ;;  %vm607_vm7 = vcmp.lt.s32.totalorder %v606_v0, 2 }
 0x196   :  { %v610_v23 = vsel %vm608_vm11, %v6136_v36, %v609_v4  ;;  %v613_v30 = vsel %vm611_vm10, %v612_v43, %v6139_v59  ;;  %v2909_v36 = vld [vmem:[%s6868_s6] sm:$0xff]  ;;  %v46_v43 = vld [vmem:[%s6863_s1 + $0x18] sm:$0x7f] }
 0x197   :  { %v4506_v60 = vpop.eup %4505  ;;  %v614_v4 = vsel %vm607_vm7, %v610_v23, %v613_v30 }
 0x198   :  { %v4508_v22 = vpop.eup %4507  ;;  %v404_v26 = vxor.u32 2147483648, %v4506_v60  ;;  %v615_v59 = vsel %vm604_vm8, nan, %v614_v4  ;;  %vm4786_vm8 = vmmov 0  }
 0x199   :  { %v401_v24 = vxor.u32 2147483648, %v4508_v22 }
 0x19a   :  { %v1442_v49 = vsel %vm1440_vm15, %v404_v26, %v4508_v22  ;;  %v405_v17 = vsel %vm403_vm0, %v404_v26, %v4508_v22 }
 0x19b   :  { %v1439_v19 = vsel %vm1437_vm9, %v4506_v60, %v401_v24  ;;  %v402_v56 = vsel %vm400_vm4, %v4506_v60, %v401_v24 }
 0x19c   :  { %v1443_v15 = vsel %vm1436_vm13, %v1439_v19, %v1442_v49  ;;  %v406_v3 = vsel %vm399_vm6, %v402_v56, %v405_v17  ;;  %v6368_v49 = vpop.permute.xlu0 %2736 }
 0x19d   :  { %v1444_v28 = vsel %vm396_vm2, nan, %v1443_v15  ;;  %v407_v14 = vsel %vm396_vm2, nan, %v406_v3 }
 0x19e   :  { %2307 = vmatpush1.msra.mxu1 %v1444_v28  ;;  %2582 = vmatpush1.msra.mxu0 %v407_v14 }
 0x19f   :  { %4217 = vmatmul.mubr.msk.f32.vlgmr.msra.gmra.mxu1 %vm2174_vm12, %v4753_v34  ;;  %2490 = vmatprep.subr.mxu1 %v823_v12 }
 0x1a0   :  { %2491 = vmatpush1.msra.mxu1 %v6957_v32  ;;  %2346 = vmatprep.mubr.f32.mxu1 %v6928_v6 }
 0x1a1   :  { %2492 = vmatprep.subr.mxu1 %v303_v41  ;;  %4229 = vmatmul.mubr.msk.f32.vlgmr.msra.gmra.mxu0 %vm2174_vm12, %v6220_v11 }
 0x1a2   :  { %2493 = vmatpush1.msra.mxu1 %v199_v31  ;;  %2621 = vmatprep.mubr.f32.mxu0 %v6928_v6 }
 0x1a3   :  { %4218 = vmatmul.mubr.msk.f32.gmra.mxu1 %vm2174_vm12, %v5653_v9  ;;  %4370 = vmatprep.subr.mxu1 %v6121_v16  ;;  %v2168_v9 = vld [vmem:[%s6865_s3 + $0x10] sm:$0xff] }
 0x1a4   :  { %2352 = vmatprep.mubr.f32.mxu1 %v6928_v6  ;;  %4257 = vmatprep.subr.msk.mxu0 %vm2926_vm1, %v44_v33 }
 0x1a5   :  { %4230 = vmatmul.mubr.msk.f32.gmra.mxu0 %vm2174_vm12, %v2167_v42 }
 0x1a6   :  { %2627 = vmatprep.mubr.f32.mxu0 %v6928_v6  ;;  %4258 = vmatpush1.msk.msra.mxu0 %vm2926_vm1, %v43_v8 }
 0x1a7   :  { %4219 = vmatmul.mubr.msk.f32.gmra.mxu1 %vm2174_vm12, %v5687_v57  ;;  %4380 = vmatprep.subr.msk.mxu0 %vm2926_vm1, %v47_v52  ;;  %v2169_v57 = vld [vmem:[%s6865_s3 + $0x18] sm:$0xff] }
 0x1a8   :  { %2358 = vmatprep.mubr.f32.mxu1 %v6928_v6 }
 0x1a9   :  { %4231 = vmatmul.mubr.msk.f32.gmra.mxu0 %vm2174_vm12, %v2168_v9 }
 0x1aa   :  { %2633 = vmatprep.mubr.f32.mxu0 %v6928_v6 }
 0x1ab   :  { %4220 = vmatmul.mubr.msk.f32.gmra.mxu1 %vm2174_vm12, %v4754_v39 }
 0x1ac   :  { %2526 = vmatprep.mubr.f32.mxu1 %v6928_v6 }
 0x1ad   :  { %4232 = vmatmul.mubr.msk.f32.gmra.mxu0 %vm2174_vm12, %v2169_v57 }
 0x1ae   :  { %3006 = vmatprep.mubr.f32.mxu0 %v6928_v6 }
 0x1af   :  { %4225 = vmatmul.mubr.msk.f32.vlgmr.msra.gmra.mxu1 %vm2174_vm12, %v6220_v11 }
 0x1b0   :  { %4371 = vmatpush3.msra.mxu1 %v6121_v16  ;;  %2532 = vmatprep.mubr.f32.mxu1 %v6928_v6  ;;  %v2912_v16 = vld [vmem:[%s6868_s6 + $0x18] sm:$0xff] }
 0x1b1   :  { %4372 = vmatprep.subr.mxu1 %v615_v59  ;;  %4259 = vmatmul.mubr.msk.f32.vlgmr.msra.gmra.mxu0 %vm2913_vm14, %v2909_v36 }
 0x1b2   :  { %4373 = vmatpush3.msra.mxu1 %v615_v59  ;;  %3012 = vmatprep.mubr.f32.mxu0 %v6928_v6 }
 0x1b3   :  { %4226 = vmatmul.mubr.msk.f32.gmra.mxu1 %vm2174_vm12, %v2167_v42  ;;  %4263 = vmatprep.subr.msk.mxu1 %vm2926_vm1, %v46_v43 }
 0x1b4   :  { %2538 = vmatprep.mubr.f32.mxu1 %v6928_v6  ;;  %4381 = vmatpush3.msk.msra.mxu0 %vm2926_vm1, %v47_v52 }
 0x1b5   :  { %4260 = vmatmul.mubr.msk.f32.gmra.mxu0 %vm2913_vm14, %v2910_v46 }
 0x1b6   :  { %3018 = vmatprep.mubr.f32.mxu0 %v6928_v6 }
 0x1b7   :  { %4227 = vmatmul.mubr.msk.f32.gmra.mxu1 %vm2174_vm12, %v2168_v9 }
 0x1b8   :  { %2544 = vmatprep.mubr.f32.mxu1 %v6928_v6 }
 0x1b9   :  { %4261 = vmatmul.mubr.msk.f32.gmra.mxu0 %vm2913_vm14, %v2911_v38 }
 0x1ba   :  { %3024 = vmatprep.mubr.f32.mxu0 %v6928_v6 }
 0x1bb   :  { %4228 = vmatmul.mubr.msk.f32.gmra.mxu1 %vm2174_vm12, %v2169_v57 }
 0x1bc   :  { %4374 = vmatprep.mubr.msk.f32.mxu1 %vm2174_vm12, %v6220_v11 }
 0x1bd   :  { %4262 = vmatmul.mubr.msk.f32.gmra.mxu0 %vm2913_vm14, %v2912_v16 }
 0x1be   :  { %4382 = vmatprep.mubr.msk.f32.mxu0 %vm2913_vm14, %v2909_v36 }
 0x1bf   :  { %4375 = vmatmul.mubr.msk.f32.vlgmr.msra.gmra.mxu1 %vm2174_vm12, %v2167_v42 }
 0x1c0   :  { %4377 = vmatprep.mubr.msk.f32.mxu1 %vm2174_vm12, %v2168_v9  ;;  %4264 = vmatpush1.msk.msra.mxu1 %vm2926_vm1, %v45_v1 }
 0x1c1   :  { %4383 = vmatmul.mubr.msk.f32.vlgmr.msra.gmra.mxu0 %vm2913_vm14, %v2910_v46 }
 0x1c2   :  { %4385 = vmatprep.mubr.msk.f32.mxu0 %vm2913_vm14, %v2911_v38 }
 0x1c3   :  { %4378 = vmatmul.mubr.msk.f32.gmra.mxu1 %vm2174_vm12, %v2169_v57  ;;  %vm3393_vm12 = vcmask 261120  }
 0x1c4   :  { %3095 = vmatprep.mubr.f32.mxu1 %v6928_v6 }
 0x1c5   :  { %4386 = vmatmul.mubr.msk.f32.gmra.mxu0 %vm2913_vm14, %v2912_v16 }
 0x1c6   :  { %3559 = vmatprep.mubr.f32.mxu0 %v6928_v6 }
 0x1c7   :  { %4265 = vmatmul.mubr.msk.f32.vlgmr.msra.gmra.mxu1 %vm2913_vm14, %v2909_v36 }
 0x1c8   :  { %3101 = vmatprep.mubr.f32.mxu1 %v6928_v6 }
 0x1cb   :  { %4266 = vmatmul.mubr.msk.f32.gmra.mxu1 %vm2913_vm14, %v2910_v46 }
 0x1cc   :  { %3107 = vmatprep.mubr.f32.mxu1 %v6928_v6 }
 0x1ce   :  { %v6351_v54 = vpop.permute.xlu1 %2746 }
 0x1cf   :  { %4267 = vmatmul.mubr.msk.f32.gmra.mxu1 %vm2913_vm14, %v2911_v38 }
 0x1d0   :  { %3113 = vmatprep.mubr.f32.mxu1 %v6928_v6 }
 0x1d2   :  { %v6359_v60 = vpop.permute.xlu1 %2741 }
 0x1d3   :  { %4268 = vmatmul.mubr.msk.f32.gmra.mxu1 %vm2913_vm14, %v2912_v16 }
 0x1d4   :  { %3470 = vmatprep.mubr.f32.mxu1 %v6928_v6 }
 0x1d6   :  { %v6363_v26 = vpop.permute.xlu1 %2731 }
 0x1d7   :  { %v2253_v51 = vpop.f32.mrf.mxu0  ;;  %v6353_v10 = vpop.f32.mrf.mxu1 }
 0x1d9   :  { %v2255_v13 = vpop.f32.mrf.mxu0  ;;  %v6357_v50 = vpop.f32.mrf.mxu1 }
 0x1dc   :  { %v6339_v58 = vpop.f32.mrf.mxu0 }
 0x1de   :  { %v6341_v25 = vpop.f32.mrf.mxu0 }
 0x1e0   :  { %v6343_v37 = vpop.f32.mrf.mxu0 }
 0x1e2   :  { %v6345_v7 = vpop.f32.mrf.mxu0 }
 0x24d   :  { %v6347_v62 = vpop.f32.mrf.mxu0 }
 0x24f   :  { %v6349_v44 = vpop.f32.mrf.mxu0 }
 0x251   :  { %v6355_v55 = vpop.f32.mrf.mxu0 }
 0x253   :  { %v6361_v20 = vpop.f32.mrf.mxu0 }
 0x25f   :  { %v2342_v27 = vpop.f32.mrf.mxu1 }
 0x261   :  { %v2344_v61 = vpop.f32.mrf.mxu1  ;;  %v2617_v22 = vpop.f32.mrf.mxu0 }
 0x262   :  { %v2618_v35 = vadd.f32 %v2617_v22, %v2342_v27 }
 0x263   :  { %v2348_v18 = vpop.f32.mrf.mxu1  ;;  %v2619_v21 = vpop.f32.mrf.mxu0 }
 0x264   :  { %v6366_v45 = vadd.f32 %v6363_v26, %v2618_v35  ;;  %v2620_v24 = vadd.f32 %v2619_v21, %v2344_v61 }
 0x265   :  { %v2350_v29 = vpop.f32.mrf.mxu1  ;;  %v2623_v2 = vpop.f32.mrf.mxu0 }
 0x266   :  { %v4239_v17 = vmul.f32 -1.442695, %v6366_v45  ;;  %v6372_v19 = vadd.f32 %v6363_v26, %v2620_v24  ;;  %v2624_v56 = vadd.f32 %v2623_v2, %v2348_v18 }
 0x267   :  { %v2354_v15 = vpop.f32.mrf.mxu1  ;;  %v2625_v3 = vpop.f32.mrf.mxu0 }
 0x268   :  { %4509 = vpow2.f32 %v4239_v17  ;;  %v4240_v28 = vmul.f32 -1.442695, %v6372_v19  ;;  %v6376_v63 = vadd.f32 %v6368_v49, %v2624_v56  ;;  %v2626_v14 = vadd.f32 %v2625_v3, %v2350_v29 }
 0x269   :  { %v2356_v5 = vpop.f32.mrf.mxu1  ;;  %v2629_v12 = vpop.f32.mrf.mxu0 }
 0x26a   :  { %4511 = vpow2.f32 %v4240_v28  ;;  %v4244_v48 = vmul.f32 -1.442695, %v6376_v63  ;;  %v6380_v11 = vadd.f32 %v6368_v49, %v2626_v14  ;;  %v2630_v34 = vadd.f32 %v2629_v12, %v2354_v15 }
 0x26b   :  { %v2360_v32 = vpop.f32.mrf.mxu1  ;;  %v2631_v53 = vpop.f32.mrf.mxu0 }
 0x26c   :  { %4513 = vpow2.f32 %v4244_v48  ;;  %v6383_v41 = vadd.f32 %v6359_v60, %v2630_v34  ;;  %v2632_v47 = vadd.f32 %v2631_v53, %v2356_v5  ;;  %v4245_v40 = vmul.f32 -1.442695, %v6380_v11 }
 0x26d   :  { %v2362_v31 = vpop.f32.mrf.mxu1  ;;  %v2635_v33 = vpop.f32.mrf.mxu0 }
 0x26e   :  { %v4249_v42 = vmul.f32 -1.442695, %v6383_v41  ;;  %v6388_v8 = vadd.f32 %v6359_v60, %v2632_v47  ;;  %v2636_v52 = vadd.f32 %v2635_v33, %v2360_v32 }
 0x26f   :  { %v2528_v0 = vpop.f32.mrf.mxu1  ;;  %v2637_v9 = vpop.f32.mrf.mxu0 }
 0x270   :  { %v2529_v23 = vadd.f32 %v2528_v0, %v2253_v51  ;;  %4515 = vpow2.f32 %v4249_v42  ;;  %v4250_v30 = vmul.f32 -1.442695, %v6388_v8  ;;  %v6392_v57 = vadd.f32 %v6351_v54, %v2636_v52 }
 0x271   :  { %v2530_v39 = vpop.f32.mrf.mxu1  ;;  %4517 = vpow2.f32 %v4245_v40  ;;  %v2638_v4 = vadd.f32 %v2637_v9, %v2362_v31 }
 0x272   :  { %v6395_v36 = vadd.f32 %v6363_v26, %v2529_v23  ;;  %v2531_v59 = vadd.f32 %v2530_v39, %v2255_v13  ;;  %4519 = vpow2.f32 %v4250_v30  ;;  %v4254_v43 = vmul.f32 -1.442695, %v6392_v57 }
 0x273   :  { %v2534_v46 = vpop.f32.mrf.mxu1  ;;  %v6399_v38 = vadd.f32 %v6351_v54, %v2638_v4 }
 0x274   :  { %v4237_v16 = vmul.f32 -1.442695, %v6395_v36  ;;  %v6403_v1 = vadd.f32 %v6363_v26, %v2531_v59  ;;  %v2535_v51 = vadd.f32 %v2534_v46, %v6339_v58  ;;  %4521 = vpow2.f32 %v4254_v43  ;;  %v6441_v46 = vpop.f32.mrf.mxu0 }
 0x275   :  { %v4510_v27 = vpop.eup %4509  ;;  %v2536_v61 = vpop.f32.mrf.mxu1  ;;  %v4255_v22 = vmul.f32 -1.442695, %v6399_v38 }
 0x276   :  { %4523 = vpow2.f32 %v4237_v16  ;;  %v2831_v13 = vadd.f32 1.0, %v4510_v27  ;;  %v4238_v35 = vmul.f32 -1.442695, %v6403_v1  ;;  %v6409_v18 = vadd.f32 %v6368_v49, %v2535_v51 }
 0x277   :  { %v4512_v21 = vpop.eup %4511  ;;  %v2537_v24 = vadd.f32 %v2536_v61, %v6341_v25  ;;  %v2540_v29 = vpop.f32.mrf.mxu1  ;;  %4525 = vpow2.f32 %v4255_v22 }
 0x278   :  { %v2832_v2 = vadd.f32 1.0, %v4512_v21  ;;  %v4242_v17 = vmul.f32 -1.442695, %v6409_v18  ;;  %v2541_v58 = vadd.f32 %v2540_v29, %v6343_v37  ;;  %4527 = vpow2.f32 %v4238_v35  ;;  %v6453_v29 = vpop.f32.mrf.mxu0 }
 0x279   :  { %v4514_v56 = vpop.eup %4513  ;;  %v6415_v15 = vadd.f32 %v6368_v49, %v2537_v24  ;;  %v2542_v3 = vpop.f32.mrf.mxu1  ;;  %4529 = vrcp.f32 %v2831_v13 }
 0x27a   :  { %v2836_v28 = vadd.f32 1.0, %v4514_v56  ;;  %v6418_v14 = vadd.f32 %v6359_v60, %v2541_v58  ;;  %v2543_v25 = vadd.f32 %v2542_v3, %v6345_v7  ;;  %4531 = vpow2.f32 %v4242_v17 }
 0x27b   :  { %v4243_v5 = vmul.f32 -1.442695, %v6415_v15  ;;  %v2546_v12 = vpop.f32.mrf.mxu1  ;;  %4533 = vrcp.f32 %v2832_v2 }
 0x27c   :  { %v4247_v37 = vmul.f32 -1.442695, %v6418_v14  ;;  %v6424_v48 = vadd.f32 %v6359_v60, %v2543_v25  ;;  %v2547_v32 = vadd.f32 %v2546_v12, %v6353_v10  ;;  %v6463_v12 = vpop.f32.mrf.mxu0 }
 0x27d   :  { %v4516_v34 = vpop.eup %4515  ;;  %4535 = vpow2.f32 %v4243_v5  ;;  %v2548_v53 = vpop.f32.mrf.mxu1 }
 0x27e   :  { %v4518_v47 = vpop.eup %4517  ;;  %4537 = vrcp.f32 %v2836_v28  ;;  %v2841_v31 = vadd.f32 1.0, %v4516_v34  ;;  %v4248_v7 = vmul.f32 -1.442695, %v6424_v48  ;;  %v2549_v40 = vadd.f32 %v2548_v53, %v6357_v50 }
 0x27f   :  { %v4520_v33 = vpop.eup %4519  ;;  %4539 = vpow2.f32 %v4247_v37  ;;  %v6430_v42 = vadd.f32 %v6351_v54, %v2547_v32  ;;  %v4376_v52 = vpop.f32.mrf.mxu1  ;;  %v2837_v30 = vadd.f32 1.0, %v4518_v47 }
 0x280   :  { %4541 = vrcp.f32 %v2841_v31  ;;  %v2842_v0 = vadd.f32 1.0, %v4520_v33  ;;  %v6433_v9 = vadd.f32 %v6351_v54, %v2549_v40  ;;  %v2712_v10 = vadd.f32 %v4376_v52, %v6347_v62  ;;  %v6472_v47 = vpop.permute.xlu1 %3221 }
 0x281   :  { %v4522_v23 = vpop.eup %4521  ;;  %4543 = vpow2.f32 %v4248_v7  ;;  %v4252_v39 = vmul.f32 -1.442695, %v6430_v42  ;;  %v2706_v4 = vpop.f32.mrf.mxu1 }
 0x282   :  { %4545 = vrcp.f32 %v2842_v0  ;;  %v2846_v50 = vadd.f32 1.0, %v4522_v23  ;;  %v4253_v59 = vmul.f32 -1.442695, %v6433_v9  ;;  %v6439_v43 = vadd.f32 %v6368_v49, %v2712_v10  ;;  %v6476_v0 = vpop.f32.mrf.mxu0 }
 0x283   :  { %v4524_v16 = vpop.eup %4523  ;;  %4547 = vpow2.f32 %v4252_v39  ;;  %v2707_v51 = vadd.f32 %v2706_v4, %v6349_v44  ;;  %v4379_v62 = vpop.f32.mrf.mxu1 }
 0x284   :  { %v2829_v27 = vadd.f32 1.0, %v4524_v16  ;;  %4549 = vrcp.f32 %v2846_v50  ;;  %v4246_v61 = vmul.f32 -1.442695, %v6439_v43  ;;  %v2722_v22 = vadd.f32 %v4379_v62, %v6355_v55  ;;  %v4526_v13 = vpop.eup %4525 }
 0x285   :  { %4551 = vpow2.f32 %v4253_v59  ;;  %v6447_v35 = vadd.f32 %v6363_v26, %v2707_v51  ;;  %v2716_v49 = vpop.f32.mrf.mxu1  ;;  %v4528_v21 = vpop.eup %4527  ;;  %v2847_v31 = vadd.f32 1.0, %v4526_v13 }
 0x286   :  { %4553 = vrcp.f32 %v2837_v30  ;;  %v6450_v24 = vadd.f32 %v6351_v54, %v2722_v22  ;;  %v2717_v44 = vadd.f32 %v2716_v49, %v6361_v20  ;;  %v4530_v2 = vpop.eup %4529  ;;  %v2830_v17 = vadd.f32 1.0, %v4528_v21 }
 0x287   :  { %4555 = vrcp.f32 %v2829_v27  ;;  %v4241_v55 = vmul.f32 -1.442695, %v6447_v35  ;;  %v3097_v58 = vpop.f32.mrf.mxu1  ;;  %v4532_v56 = vpop.eup %4531  ;;  %v6468_v32 = vmul.f32 %v4530_v2, %v6366_v45 }
 0x288   :  { %4557 = vpow2.f32 %v4246_v61  ;;  %v4256_v26 = vmul.f32 -1.442695, %v6450_v24  ;;  %v6458_v3 = vadd.f32 %v6359_v60, %v2717_v44  ;;  %v4534_v28 = vpop.eup %4533  ;;  %v2834_v54 = vadd.f32 1.0, %v4532_v56  ;;  %v6488_v61 = vpop.f32.mrf.mxu0 }
 0x289   :  { %4559 = vrcp.f32 %v2830_v17  ;;  %v6460_v25 = vpop.f32.mrf.mxu1  ;;  %v3098_v30 = vadd.f32 %v3097_v58, %v6468_v32 }
 0x28a   :  { %v4536_v20 = vpop.eup %4535  ;;  %4561 = vpow2.f32 %v4241_v55  ;;  %v4251_v5 = vmul.f32 -1.442695, %v6458_v3  ;;  %v6498_v55 = vmul.f32 %v4534_v28, %v6372_v19  ;;  %v6511_v19 = vpop.permute.xlu0 %3226 }
 0x28b   :  { %v6465_v37 = vpop.eup %4537  ;;  %4563 = vrcp.f32 %v2834_v54  ;;  %v2835_v34 = vadd.f32 1.0, %v4536_v20  ;;  %v6470_v60 = vpop.f32.mrf.mxu1 }
 0x28c   :  { %v4540_v53 = vpop.eup %4539  ;;  %4565 = vpow2.f32 %v4256_v26  ;;  %v3022_v26 = vpop.f32.mrf.mxu0 }
 0x28d   :  { %v4542_v7 = vpop.eup %4541  ;;  %4567 = vrcp.f32 %v2835_v34  ;;  %v2839_v40 = vadd.f32 1.0, %v4540_v53  ;;  %v6474_v33 = vpop.f32.mrf.mxu1 }
 0x28e   :  { %v4544_v52 = vpop.eup %4543  ;;  %4569 = vpow2.f32 %v4251_v5  ;;  %v6479_v10 = vmul.f32 %v4542_v7, %v6383_v41  ;;  %v6486_v41 = vpop.permute.xlu1 %3211 }
 0x28f   :  { %v4546_v45 = vpop.eup %4545  ;;  %4571 = vrcp.f32 %v2839_v40  ;;  %v2840_v23 = vadd.f32 1.0, %v4544_v52  ;;  %v3109_v39 = vpop.f32.mrf.mxu1  ;;  %v6494_v21 = vadd.f32 %v6486_v41, %v3098_v30  ;;  %v3100_v52 = vadd.f32 %v6460_v25, %v6498_v55 }
 0x290   :  { %v4548_v4 = vpop.eup %4547  ;;  %4573 = vrcp.f32 %v2847_v31  ;;  %v3110_v16 = vadd.f32 %v3109_v39, %v6479_v10  ;;  %v6484_v51 = vmul.f32 %v4546_v45, %v6388_v8  ;;  %v3026_v39 = vpop.f32.mrf.mxu0 }
 0x291   :  { %v4550_v50 = vpop.eup %4549  ;;  %4575 = vrcp.f32 %v2840_v23  ;;  %v2844_v59 = vadd.f32 1.0, %v4548_v4  ;;  %v3111_v62 = vpop.f32.mrf.mxu1  ;;  %v4276_v34 = vmul.f32 -1.442695, %v6494_v21 }
 0x292   :  { %v4552_v27 = vpop.eup %4551  ;;  %v6491_v22 = vmul.f32 %v4550_v50, %v6392_v57  ;;  %v3112_v44 = vadd.f32 %v3111_v62, %v6484_v51  ;;  %v6501_v58 = vadd.f32 %v6472_v47, %v3110_v16 }
 0x293   :  { %v4554_v13 = vpop.eup %4553  ;;  %4577 = vrcp.f32 %v2844_v59  ;;  %v2845_v49 = vadd.f32 1.0, %v4552_v27  ;;  %v3115_v2 = vpop.f32.mrf.mxu1 }
 0x294   :  { %v4556_v8 = vpop.eup %4555  ;;  %v3116_v54 = vadd.f32 %v3115_v2, %v6491_v22  ;;  %v6509_v53 = vadd.f32 %v6472_v47, %v3112_v44  ;;  %v6539_v44 = vadd.f32 %v6486_v41, %v3100_v52  ;;  %v6546_v2 = vpop.permute.xlu0 %3216 }
 0x295   :  { %v4558_v17 = vpop.eup %4557  ;;  %4579 = vrcp.f32 %v2845_v49 }
 0x296   :  { %v4560_v57 = vpop.eup %4559  ;;  %v2838_v56 = vadd.f32 1.0, %v4558_v17  ;;  %v6522_v4 = vadd.f32 %v6511_v19, %v3116_v54  ;;  %v4287_v25 = vmul.f32 -1.442695, %v6509_v53  ;;  %v3028_v17 = vpop.f32.mrf.mxu0 }
 0x297   :  { %v4562_v20 = vpop.eup %4561  ;;  %v6505_v5 = vmul.f32 %v4560_v57, %v6403_v1  ;;  %v4286_v1 = vmul.f32 -1.442695, %v6501_v58 }
 0x298   :  { %v4564_v31 = vpop.eup %4563  ;;  %4581 = vrcp.f32 %v2838_v56  ;;  %v2833_v28 = vadd.f32 1.0, %v4562_v20  ;;  %v4291_v57 = vmul.f32 -1.442695, %v6522_v4  ;;  %v4384_v20 = vpop.f32.mrf.mxu0 }
 0x299   :  { %v4566_v7 = vpop.eup %4565  ;;  %v3011_v40 = vadd.f32 %v6453_v29, %v6505_v5  ;;  %v6519_v30 = vmul.f32 %v4564_v31, %v6409_v18  ;;  %v6529_v29 = vmul.f32 %v6465_v37, %v6376_v63  ;;  %v6533_v18 = vmul.f32 %v4556_v8, %v6395_v36 }
 0x29a   :  { %v4568_v45 = vpop.eup %4567  ;;  %4583 = vrcp.f32 %v2833_v28  ;;  %v2848_v23 = vadd.f32 1.0, %v4566_v7  ;;  %v6544_v63 = vmul.f32 %v4554_v13, %v6380_v11 }
 0x29b   :  { %v4570_v50 = vpop.eup %4569  ;;  %4585 = vpow2.f32 %v4276_v34  ;;  %v6525_v59 = vmul.f32 %v4568_v45, %v6415_v15  ;;  %v6536_v27 = vadd.f32 %v6486_v41, %v3011_v40  ;;  %v3015_v36 = vadd.f32 %v6463_v12, %v6519_v30  ;;  %v3186_v45 = vpop.f32.mrf.mxu0 }
 0x29c   :  { %v4572_v16 = vpop.eup %4571  ;;  %4587 = vrcp.f32 %v2848_v23  ;;  %v2843_v62 = vadd.f32 1.0, %v4570_v50  ;;  %v3009_v13 = vadd.f32 %v6441_v46, %v6533_v18  ;;  %v3104_v34 = vadd.f32 %v6470_v60, %v6529_v29  ;;  %v3117_v46 = vpop.f32.mrf.mxu1 }
 0x29d   :  { %v4574_v49 = vpop.eup %4573  ;;  %v3017_v15 = vadd.f32 %v6476_v0, %v6525_v59  ;;  %4589 = vpow2.f32 %v4286_v1  ;;  %v6551_v8 = vmul.f32 %v4572_v16, %v6418_v14  ;;  %v4275_v54 = vmul.f32 -1.442695, %v6536_v27 }
 0x29e   :  { %v4576_v37 = vpop.eup %4575  ;;  %4591 = vrcp.f32 %v2843_v62  ;;  %v6566_v12 = vmul.f32 %v4574_v49, %v6399_v38  ;;  %v6577_v40 = vadd.f32 %v6546_v2, %v3015_v36  ;;  %v4277_v38 = vmul.f32 -1.442695, %v6539_v44 }
 0x29f   :  { %v6555_v56 = vadd.f32 %v6546_v2, %v3017_v15  ;;  %v6558_v11 = vmul.f32 %v4576_v37, %v6424_v48  ;;  %4593 = vpow2.f32 %v4287_v25  ;;  %v3021_v14 = vadd.f32 %v6488_v61, %v6551_v8 }
 0x2a0   :  { %v4578_v0 = vpop.eup %4577  ;;  %v3106_v48 = vadd.f32 %v6474_v33, %v6544_v63  ;;  %4595 = vpow2.f32 %v4291_v57  ;;  %v6592_v52 = vadd.f32 %v6486_v41, %v3009_v13  ;;  %v3118_v1 = vadd.f32 %v3117_v46, %v6566_v12 }
 0x2a1   :  { %v3023_v31 = vadd.f32 %v3022_v26, %v6558_v11  ;;  %v6574_v28 = vmul.f32 %v4578_v0, %v6430_v42  ;;  %v6581_v61 = vadd.f32 %v6472_v47, %v3021_v14  ;;  %v4280_v60 = vmul.f32 -1.442695, %v6555_v56 }
 0x2a2   :  { %v4580_v7 = vpop.eup %4579  ;;  %4597 = vpow2.f32 %v4275_v54  ;;  %v6605_v62 = vadd.f32 %v6546_v2, %v3106_v48  ;;  %v4279_v37 = vmul.f32 -1.442695, %v6577_v40  ;;  %v6616_v0 = vadd.f32 %v6511_v19, %v3118_v1 }
 0x2a3   :  { %v6585_v33 = vadd.f32 %v6472_v47, %v3023_v31  ;;  %v3027_v26 = vadd.f32 %v3026_v39, %v6574_v28  ;;  %v6589_v42 = vmul.f32 %v4580_v7, %v6433_v9  ;;  %v4284_v50 = vmul.f32 -1.442695, %v6581_v61 }
 0x2a4   :  { %4599 = vpow2.f32 %v4277_v38  ;;  %v6602_v9 = vadd.f32 %v6546_v2, %v3104_v34  ;;  %v4274_v34 = vmul.f32 -1.442695, %v6592_v52  ;;  %v4282_v46 = vmul.f32 -1.442695, %v6605_v62 }
 0x2a5   :  { %v4582_v23 = vpop.eup %4581  ;;  %v4285_v25 = vmul.f32 -1.442695, %v6585_v33  ;;  %v6598_v16 = vadd.f32 %v6511_v19, %v3027_v26  ;;  %v3029_v39 = vadd.f32 %v3028_v17, %v6589_v42  ;;  %4601 = vpow2.f32 %v4280_v60 }
 0x2a6   :  { %v6608_v49 = vmul.f32 %v4582_v23, %v6439_v43  ;;  %v4387_v43 = vpop.f32.mrf.mxu0  ;;  %v4292_v26 = vmul.f32 -1.442695, %v6616_v0 }
 0x2a7   :  { %v4584_v15 = vpop.eup %4583  ;;  %v4289_v36 = vmul.f32 -1.442695, %v6598_v16  ;;  %v6613_v57 = vadd.f32 %v6511_v19, %v3029_v39  ;;  %4603 = vpow2.f32 %v4285_v25 }
 0x2a8   :  { %v4586_v17 = vpop.eup %4585  ;;  %v3192_v13 = vadd.f32 %v4384_v20, %v6608_v49  ;;  %v6620_v54 = vmul.f32 %v4584_v15, %v6447_v35  ;;  %4605 = vpow2.f32 %v4284_v50  ;;  %v4281_v35 = vmul.f32 -1.442695, %v6602_v9  ;;  %v3196_v50 = vpop.f32.mrf.mxu0 }
 0x2a9   :  { %v4588_v14 = vpop.eup %4587  ;;  %v4290_v48 = vmul.f32 -1.442695, %v6613_v57  ;;  %4607 = vpow2.f32 %v4289_v36  ;;  %v3311_v25 = vadd.f32 1.0, %v4586_v17 }
 0x2aa   :  { %v4590_v31 = vpop.eup %4589  ;;  %v3187_v7 = vadd.f32 %v3186_v45, %v6620_v54  ;;  %v6627_v38 = vmul.f32 %v4588_v14, %v6450_v24  ;;  %4609 = vpow2.f32 %v4279_v37  ;;  %v6632_v1 = vadd.f32 %v6546_v2, %v3192_v13 }
 0x2ab   :  { %v4592_v20 = vpop.eup %4591  ;;  %4611 = vpow2.f32 %v4290_v48  ;;  %v3321_v24 = vadd.f32 1.0, %v4590_v31 }
 0x2ac   :  { %v4594_v60 = vpop.eup %4593  ;;  %v3202_v23 = vadd.f32 %v4387_v43, %v6627_v38  ;;  %4613 = vpow2.f32 %v4274_v34  ;;  %v6636_v45 = vmul.f32 %v4592_v20, %v6458_v3  ;;  %v6639_v39 = vadd.f32 %v6486_v41, %v3187_v7 }
 0x2ad   :  { %4615 = vpow2.f32 %v4282_v46  ;;  %v4596_v37 = vpop.eup %4595  ;;  %v3322_v2 = vadd.f32 1.0, %v4594_v60  ;;  %v4283_v13 = vmul.f32 -1.442695, %v6632_v1 }
 0x2ae   :  { %v6642_v15 = vadd.f32 %v6511_v19, %v3202_v23  ;;  %4617 = vpow2.f32 %v4281_v35  ;;  %v3197_v36 = vadd.f32 %v3196_v50, %v6636_v45  ;;  %v4278_v41 = vmul.f32 -1.442695, %v6639_v39 }
 0x2af   :  { %4619 = vpow2.f32 %v4292_v26  ;;  %v4598_v17 = vpop.eup %4597  ;;  %v3326_v48 = vadd.f32 1.0, %v4596_v37 }
 0x2b0   :  { %4621 = vrcp.f32 %v3311_v25  ;;  %v4293_v3 = vmul.f32 -1.442695, %v6642_v15  ;;  %v6648_v43 = vadd.f32 %v6472_v47, %v3197_v36  ;;  %v3310_v46 = vadd.f32 1.0, %v4598_v17 }
 0x2b1   :  { %4623 = vrcp.f32 %v3321_v24  ;;  %v4600_v19 = vpop.eup %4599 }
 0x2b2   :  { %4625 = vrcp.f32 %v3322_v2  ;;  %v4288_v14 = vmul.f32 -1.442695, %v6648_v43  ;;  %v4602_v34 = vpop.eup %4601 }
 0x2b3   :  { %4627 = vpow2.f32 %v4283_v13  ;;  %v3315_v25 = vadd.f32 1.0, %v4602_v34  ;;  %v3312_v34 = vadd.f32 1.0, %v4600_v19 }
 0x2b4   :  { %v4604_v31 = vpop.eup %4603  ;;  %4629 = vpow2.f32 %v4293_v3 }
 0x2b5   :  { %v4606_v7 = vpop.eup %4605  ;;  %v3320_v20 = vadd.f32 1.0, %v4604_v31  ;;  %4631 = vpow2.f32 %v4278_v41 }
 0x2b6   :  { %v4608_v35 = vpop.eup %4607  ;;  %4633 = vpow2.f32 %v4288_v14  ;;  %v3319_v23 = vadd.f32 1.0, %v4606_v7 }
 0x2b7   :  { %v4610_v47 = vpop.eup %4609  ;;  %v3324_v60 = vadd.f32 1.0, %v4608_v35  ;;  %4635 = vrcp.f32 %v3326_v48 }
 0x2b8   :  { %v4612_v26 = vpop.eup %4611  ;;  %4637 = vrcp.f32 %v3310_v46  ;;  %v3314_v2 = vadd.f32 1.0, %v4610_v47 }
 0x2b9   :  { %v4614_v50 = vpop.eup %4613  ;;  %4639 = vrcp.f32 %v3320_v20  ;;  %v3325_v24 = vadd.f32 1.0, %v4612_v26 }
 0x2ba   :  { %v4616_v37 = vpop.eup %4615  ;;  %4641 = vrcp.f32 %v3324_v60  ;;  %v3309_v17 = vadd.f32 1.0, %v4614_v50 }
 0x2bb   :  { %v4618_v36 = vpop.eup %4617  ;;  %4643 = vrcp.f32 %v3325_v24  ;;  %v3317_v41 = vadd.f32 1.0, %v4616_v37 }
 0x2bc   :  { %v4620_v13 = vpop.eup %4619  ;;  %4645 = vrcp.f32 %v3319_v23  ;;  %v3316_v31 = vadd.f32 1.0, %v4618_v36 }
 0x2bd   :  { %v6652_v3 = vpop.eup %4621  ;;  %4647 = vrcp.f32 %v3315_v25  ;;  %v3327_v14 = vadd.f32 1.0, %v4620_v13 }
 0x2be   :  { %v4624_v48 = vpop.eup %4623  ;;  %4649 = vrcp.f32 %v3314_v2 }
 0x2bf   :  { %v4626_v46 = vpop.eup %4625  ;;  %4651 = vrcp.f32 %v3327_v14 }
 0x2c0   :  { %v4628_v7 = vpop.eup %4627  ;;  %4653 = vrcp.f32 %v3309_v17 }
 0x2c1   :  { %v4630_v20 = vpop.eup %4629  ;;  %4655 = vrcp.f32 %v3317_v41  ;;  %v3318_v26 = vadd.f32 1.0, %v4628_v7 }
 0x2c2   :  { %v4632_v35 = vpop.eup %4631  ;;  %4657 = vrcp.f32 %v3316_v31  ;;  %v3328_v47 = vadd.f32 1.0, %v4630_v20 }
 0x2c3   :  { %v4634_v60 = vpop.eup %4633  ;;  %4659 = vrcp.f32 %v3312_v34  ;;  %v3313_v24 = vadd.f32 1.0, %v4632_v35 }
 0x2c4   :  { %v4636_v23 = vpop.eup %4635  ;;  %4661 = vrcp.f32 %v3328_v47  ;;  %v3323_v50 = vadd.f32 1.0, %v4634_v60 }
 0x2c5   :  { %v4638_v25 = vpop.eup %4637 }
 0x2c6   :  { %v4640_v37 = vpop.eup %4639  ;;  %4663 = vrcp.f32 %v3323_v50 }
 0x2c7   :  { %v4642_v2 = vpop.eup %4641  ;;  %4665 = vrcp.f32 %v3318_v26  ;;  %v3380_v31 = vmul.f32 %v4640_v37, %v6585_v33  ;;  %v3386_v26 = vmul.f32 %v4636_v23, %v6522_v4  ;;  %v3382_v33 = vmul.f32 %v4626_v46, %v6509_v53 }
 0x2c8   :  { %v4644_v19 = vpop.eup %4643  ;;  %4667 = vrcp.f32 %v3313_v24  ;;  %v3384_v41 = vmul.f32 %v4642_v2, %v6598_v16  ;;  %v3371_v46 = vmul.f32 %v6652_v3, %v6494_v21  ;;  %v6712_v2 = vpop.permute.xlu0 %3690 }
 0x2c9   :  { %v4646_v36 = vpop.eup %4645  ;;  %v3385_v13 = vmul.f32 %v4644_v19, %v6613_v57 }
 0x2ca   :  { %v4648_v17 = vpop.eup %4647  ;;  %v3379_v7 = vmul.f32 %v4646_v36, %v6581_v61  ;;  %v3370_v61 = vmul.f32 %v4638_v25, %v6536_v27 }
 0x2cb   :  { %v4650_v14 = vpop.eup %4649  ;;  %3430 = vmatprep.subr.mxu1 %v3385_v13  ;;  %v3375_v47 = vmul.f32 %v4648_v17, %v6555_v56  ;;  %v3389_v56 = vld [vmem:[%s6870_s8] sm:$0xff] }
 0x2cc   :  { %v4652_v34 = vpop.eup %4651  ;;  %3431 = vmatpush1.msra.mxu1 %v3384_v41  ;;  %v3374_v57 = vmul.f32 %v4650_v14, %v6577_v40 }
 0x2cd   :  { %v4654_v20 = vpop.eup %4653  ;;  %v3387_v35 = vmul.f32 %v4652_v34, %v6616_v0  ;;  %3432 = vmatprep.subr.mxu1 %v3380_v31  ;;  %v3381_v0 = vmul.f32 %v4624_v48, %v6501_v58 }
 0x2ce   :  { %v4656_v60 = vpop.eup %4655  ;;  %3433 = vmatpush1.msra.mxu1 %v3379_v7  ;;  %v3369_v24 = vmul.f32 %v4654_v20, %v6592_v52 }
 0x2cf   :  { %v4658_v16 = vpop.eup %4657  ;;  %3519 = vmatprep.subr.mxu0 %v3387_v35  ;;  %3434 = vmatprep.subr.mxu1 %v3375_v47  ;;  %v3377_v40 = vmul.f32 %v4656_v60, %v6605_v62  ;;  %v6725_v47 = vpop.permute.xlu0 %3680 }
 0x2d0   :  { %v4660_v50 = vpop.eup %4659  ;;  %3520 = vmatpush1.msra.mxu0 %v3386_v26  ;;  %3435 = vmatpush1.msra.mxu1 %v3374_v57  ;;  %v3376_v53 = vmul.f32 %v4658_v16, %v6602_v9 }
 0x2d1   :  { %v4662_v4 = vpop.eup %4661  ;;  %3521 = vmatprep.subr.mxu0 %v3382_v33  ;;  %3436 = vmatprep.subr.mxu1 %v3370_v61  ;;  %v3372_v58 = vmul.f32 %v4660_v50, %v6539_v44 }
 0x2d2   :  { %3522 = vmatpush1.msra.mxu0 %v3381_v0  ;;  %3437 = vmatpush1.msra.mxu1 %v3369_v24  ;;  %v3388_v27 = vmul.f32 %v4662_v4, %v6642_v15  ;;  %v3390_v15 = vld [vmem:[%s6870_s8 + $0x8] sm:$0xff] }
 0x2d3   :  { %v4664_v52 = vpop.eup %4663  ;;  %3523 = vmatprep.subr.mxu0 %v3377_v40  ;;  %4294 = vmatmul.mubr.msk.f32.vlgmr.msra.gmra.mxu1 %vm3393_vm12, %v3389_v56 }
 0x2d4   :  { %v4666_v48 = vpop.eup %4665  ;;  %3524 = vmatpush1.msra.mxu0 %v3376_v53  ;;  %4388 = vmatprep.subr.mxu1 %v3388_v27  ;;  %v3383_v62 = vmul.f32 %v4664_v52, %v6648_v43  ;;  %v3391_v43 = vld [vmem:[%s6870_s8 + $0x10] sm:$0xff] }
 0x2d5   :  { %3525 = vmatprep.subr.mxu0 %v3372_v58  ;;  %4389 = vmatpush3.msra.mxu1 %v3388_v27  ;;  %v4668_v9 = vpop.eup %4667  ;;  %v3378_v44 = vmul.f32 %v4666_v48, %v6632_v1  ;;  %v3392_v1 = vld [vmem:[%s6870_s8 + $0x18] sm:$0xff] }
 0x2d6   :  { %3526 = vmatpush1.msra.mxu0 %v3371_v46  ;;  %4390 = vmatprep.subr.mxu1 %v3383_v62  ;;  %v3373_v21 = vmul.f32 %v4668_v9, %v6639_v39  ;;  %v6707_v39 = vpop.permute.xlu1 %3685 }
 0x2d7   :  { %4298 = vmatmul.mubr.msk.f32.vlgmr.msra.gmra.mxu0 %vm3393_vm12, %v3389_v56  ;;  %3476 = vmatprep.mubr.f32.mxu1 %v6928_v6 }
 0x2d8   :  { %3565 = vmatprep.mubr.f32.mxu0 %v6928_v6  ;;  %4391 = vmatpush3.msra.mxu1 %v3383_v62 }
 0x2d9   :  { %4295 = vmatmul.mubr.msk.f32.gmra.mxu1 %vm3393_vm12, %v3390_v15  ;;  %4392 = vmatprep.subr.mxu1 %v3378_v44 }
 0x2da   :  { %4393 = vmatpush3.msra.mxu1 %v3378_v44  ;;  %3482 = vmatprep.mubr.f32.mxu1 %v6928_v6  ;;  %v6710_v25 = vpop.permute.xlu1 %3675 }
 0x2db   :  { %4299 = vmatmul.mubr.msk.f32.gmra.mxu0 %vm3393_vm12, %v3390_v15  ;;  %4394 = vmatprep.subr.mxu1 %v3373_v21 }
 0x2dc   :  { %3571 = vmatprep.mubr.f32.mxu0 %v6928_v6  ;;  %4395 = vmatpush3.msra.mxu1 %v3373_v21 }
 0x2dd   :  { %4296 = vmatmul.mubr.msk.f32.gmra.mxu1 %vm3393_vm12, %v3391_v43 }
 0x2de   :  { %3488 = vmatprep.mubr.f32.mxu1 %v6928_v6 }
 0x2df   :  { %4300 = vmatmul.mubr.msk.f32.gmra.mxu0 %vm3393_vm12, %v3391_v43 }
 0x2e0   :  { %3577 = vmatprep.mubr.f32.mxu0 %v6928_v6 }
 0x2e1   :  { %4297 = vmatmul.mubr.msk.f32.gmra.mxu1 %vm3393_vm12, %v3392_v1 }
 0x2e2   :  { %4396 = vmatprep.mubr.msk.f32.mxu1 %vm3393_vm12, %v3389_v56 }
 0x2e3   :  { %4301 = vmatmul.mubr.msk.f32.gmra.mxu0 %vm3393_vm12, %v3392_v1 }
 0x2e4   :  { %3927 = vmatprep.mubr.f32.mxu0 %v6928_v6 }
 0x2e5   :  { %4397 = vmatmul.mubr.msk.f32.vlgmr.msra.gmra.mxu1 %vm3393_vm12, %v3390_v15 }
 0x2e6   :  { %4399 = vmatprep.mubr.msk.f32.mxu1 %vm3393_vm12, %v3391_v43 }
 0x2e9   :  { %4400 = vmatmul.mubr.msk.f32.gmra.mxu1 %vm3393_vm12, %v3392_v1 }
 0x2ea   :  { %3998 = vmatprep.mubr.f32.mxu1 %v6928_v6 }
 0x393   :  { %v3472_v3 = vpop.f32.mrf.mxu1 }
 0x394   :  { %v3473_v23 = vadd.f32 %v3472_v3, %v6533_v18 }
 0x395   :  { %v3474_v37 = vpop.f32.mrf.mxu1 }
 0x396   :  { %v6715_v19 = vadd.f32 %v6710_v25, %v3473_v23  ;;  %v3475_v36 = vadd.f32 %v3474_v37, %v6505_v5 }
 0x397   :  { %v3561_v13 = vpop.f32.mrf.mxu0 }
 0x398   :  { %v6719_v17 = vadd.f32 %v6710_v25, %v3475_v36  ;;  %v4306_v41 = vmul.f32 -1.442695, %v6715_v19  ;;  %v3562_v0 = vadd.f32 %v3561_v13, %v6468_v32 }
 0x399   :  { %v3563_v14 = vpop.f32.mrf.mxu0  ;;  %v3478_v31 = vpop.f32.mrf.mxu1 }
 0x39a   :  { %v4307_v18 = vmul.f32 -1.442695, %v6719_v17  ;;  %v3564_v34 = vadd.f32 %v3563_v14, %v6498_v55  ;;  %v3479_v7 = vadd.f32 %v3478_v31, %v6519_v30  ;;  %4669 = vpow2.f32 %v4306_v41 }
 0x39b   :  { %v3567_v20 = vpop.f32.mrf.mxu0  ;;  %v3480_v35 = vpop.f32.mrf.mxu1 }
 0x39c   :  { %v6728_v5 = vadd.f32 %v6725_v47, %v3479_v7  ;;  %v3481_v60 = vadd.f32 %v3480_v35, %v6525_v59  ;;  %4671 = vpow2.f32 %v4307_v18  ;;  %v6732_v16 = vadd.f32 %v6710_v25, %v3564_v34 }
 0x39d   :  { %v3569_v57 = vpop.f32.mrf.mxu0  ;;  %v3484_v26 = vpop.f32.mrf.mxu1  ;;  %v3568_v55 = vadd.f32 %v3567_v20, %v6529_v29 }
 0x39e   :  { %v4311_v30 = vmul.f32 -1.442695, %v6728_v5  ;;  %v6737_v33 = vadd.f32 %v6725_v47, %v3481_v60  ;;  %v3485_v61 = vadd.f32 %v3484_v26, %v6551_v8  ;;  %v3570_v59 = vadd.f32 %v3569_v57, %v6544_v63 }
 0x39f   :  { %v3573_v50 = vpop.f32.mrf.mxu0  ;;  %v3486_v24 = vpop.f32.mrf.mxu1  ;;  %v4309_v8 = vmul.f32 -1.442695, %v6732_v16  ;;  %v6750_v52 = vadd.f32 %v6725_v47, %v3568_v55 }
 0x3a0   :  { %v3574_v56 = vadd.f32 %v3573_v50, %v6479_v10  ;;  %4673 = vpow2.f32 %v4311_v30  ;;  %v4312_v4 = vmul.f32 -1.442695, %v6737_v33  ;;  %v6745_v29 = vadd.f32 %v6707_v39, %v3485_v61 }
 0x3a1   :  { %v3487_v40 = vadd.f32 %v3486_v24, %v6558_v11  ;;  %v3575_v53 = vpop.f32.mrf.mxu0  ;;  %v3490_v27 = vpop.f32.mrf.mxu1  ;;  %v6762_v62 = vadd.f32 %v6725_v47, %v3570_v59  ;;  %v4313_v34 = vmul.f32 -1.442695, %v6750_v52 }
 0x3a2   :  { %v6753_v32 = vadd.f32 %v6707_v39, %v3574_v56  ;;  %v3576_v10 = vadd.f32 %v3575_v53, %v6484_v51  ;;  %4675 = vpow2.f32 %v4312_v4  ;;  %v4316_v63 = vmul.f32 -1.442695, %v6745_v29 }
 0x3a3   :  { %v6758_v58 = vadd.f32 %v6707_v39, %v3487_v40  ;;  %v3491_v11 = vadd.f32 %v3490_v27, %v6574_v28  ;;  %v3579_v48 = vpop.f32.mrf.mxu0  ;;  %v3492_v46 = vpop.f32.mrf.mxu1 }
 0x3a4   :  { %v4318_v9 = vmul.f32 -1.442695, %v6753_v32  ;;  %v6766_v15 = vadd.f32 %v6707_v39, %v3576_v10  ;;  %v3580_v51 = vadd.f32 %v3579_v48, %v6491_v22  ;;  %4677 = vpow2.f32 %v4316_v63 }
 0x3a5   :  { %v4317_v44 = vmul.f32 -1.442695, %v6758_v58  ;;  %v6771_v21 = vadd.f32 %v6712_v2, %v3491_v11  ;;  %v3493_v28 = vadd.f32 %v3492_v46, %v6589_v42  ;;  %v3581_v43 = vpop.f32.mrf.mxu0  ;;  %v4398_v1 = vpop.f32.mrf.mxu1  ;;  %v6780_v22 = vadd.f32 %v6710_v25, %v3562_v0 }
 0x3a6   :  { %4679 = vpow2.f32 %v4318_v9  ;;  %v4319_v3 = vmul.f32 -1.442695, %v6766_v15  ;;  %v6776_v23 = vadd.f32 %v6712_v2, %v3580_v51  ;;  %v3582_v37 = vadd.f32 %v3581_v43, %v6566_v12 }
 0x3a7   :  { %4681 = vpow2.f32 %v4317_v44  ;;  %v4321_v36 = vmul.f32 -1.442695, %v6771_v21  ;;  %v6784_v13 = vadd.f32 %v6712_v2, %v3493_v28  ;;  %v4314_v42 = vmul.f32 -1.442695, %v6762_v62  ;;  %v3650_v31 = vpop.f32.mrf.mxu1  ;;  %v4670_v18 = vpop.eup %4669 }
 0x3a8   :  { %4683 = vpow2.f32 %v4319_v3  ;;  %v4323_v41 = vmul.f32 -1.442695, %v6776_v23  ;;  %v6789_v14 = vadd.f32 %v6712_v2, %v3582_v37  ;;  %v4308_v35 = vmul.f32 -1.442695, %v6780_v22 }
 0x3a9   :  { %4685 = vpow2.f32 %v4321_v36  ;;  %v4322_v12 = vmul.f32 -1.442695, %v6784_v13  ;;  %v4672_v7 = vpop.eup %4671  ;;  %v3773_v60 = vadd.f32 1.0, %v4670_v18  ;;  %v4401_v57 = vpop.f32.mrf.mxu1  ;;  %v3656_v30 = vadd.f32 %v4398_v1, %v6608_v49 }
 0x3aa   :  { %4687 = vpow2.f32 %v4309_v8  ;;  %v4324_v20 = vmul.f32 -1.442695, %v6789_v14  ;;  %v3774_v55 = vadd.f32 1.0, %v4672_v7  ;;  %v3651_v24 = vadd.f32 %v3650_v31, %v6620_v54 }
 0x3ab   :  { %4689 = vpow2.f32 %v4323_v41  ;;  %v3660_v59 = vpop.f32.mrf.mxu1  ;;  %v6798_v4 = vadd.f32 %v6725_v47, %v3656_v30  ;;  %v3666_v40 = vadd.f32 %v4401_v57, %v6627_v38 }
 0x3ac   :  { %4691 = vpow2.f32 %v4314_v42  ;;  %v6802_v10 = vadd.f32 %v6710_v25, %v3651_v24  ;;  %v3661_v54 = vadd.f32 %v3660_v59, %v6636_v45 }
 0x3ad   :  { %4693 = vpow2.f32 %v4322_v12  ;;  %v4674_v26 = vpop.eup %4673  ;;  %v4315_v46 = vmul.f32 -1.442695, %v6798_v4  ;;  %v6807_v38 = vadd.f32 %v6712_v2, %v3666_v40 }
 0x3ae   :  { %4695 = vpow2.f32 %v4313_v34  ;;  %v3778_v61 = vadd.f32 1.0, %v4674_v26  ;;  %v4310_v25 = vmul.f32 -1.442695, %v6802_v10  ;;  %v6811_v45 = vadd.f32 %v6707_v39, %v3661_v54 }
 0x3af   :  { %4697 = vpow2.f32 %v4324_v20  ;;  %v4676_v50 = vpop.eup %4675  ;;  %v4325_v3 = vmul.f32 -1.442695, %v6807_v38 }
 0x3b0   :  { %4699 = vpow2.f32 %v4308_v35  ;;  %v3779_v0 = vadd.f32 1.0, %v4676_v50  ;;  %v4320_v42 = vmul.f32 -1.442695, %v6811_v45 }
 0x3b1   :  { %4701 = vrcp.f32 %v3773_v60  ;;  %v4678_v56 = vpop.eup %4677 }
 0x3b2   :  { %4703 = vrcp.f32 %v3774_v55  ;;  %v3783_v27 = vadd.f32 1.0, %v4678_v56 }
 0x3b3   :  { %v4680_v53 = vpop.eup %4679  ;;  %4705 = vrcp.f32 %v3778_v61 }
 0x3b4   :  { %v4682_v49 = vpop.eup %4681  ;;  %4707 = vrcp.f32 %v3779_v0  ;;  %v3785_v8 = vadd.f32 1.0, %v4680_v53 }
 0x3b5   :  { %v4684_v63 = vpop.eup %4683  ;;  %4709 = vrcp.f32 %v3783_v27  ;;  %v3784_v11 = vadd.f32 1.0, %v4682_v49 }
 0x3b6   :  { %v4686_v48 = vpop.eup %4685  ;;  %4711 = vrcp.f32 %v3785_v8  ;;  %v3786_v47 = vadd.f32 1.0, %v4684_v63 }
 0x3b7   :  { %v4688_v9 = vpop.eup %4687  ;;  %4713 = vrcp.f32 %v3784_v11  ;;  %v3788_v51 = vadd.f32 1.0, %v4686_v48 }
 0x3b8   :  { %v4690_v44 = vpop.eup %4689  ;;  %4715 = vrcp.f32 %v3786_v47  ;;  %v3776_v7 = vadd.f32 1.0, %v4688_v9 }
 0x3b9   :  { %v4692_v28 = vpop.eup %4691  ;;  %4717 = vrcp.f32 %v3788_v51  ;;  %v3790_v43 = vadd.f32 1.0, %v4690_v44 }
 0x3ba   :  { %v4694_v1 = vpop.eup %4693  ;;  %4719 = vpow2.f32 %v4315_v46  ;;  %v3781_v12 = vadd.f32 1.0, %v4692_v28 }
 0x3bb   :  { %v4696_v37 = vpop.eup %4695  ;;  %4721 = vrcp.f32 %v3790_v43  ;;  %v3789_v2 = vadd.f32 1.0, %v4694_v1 }
 0x3bc   :  { %v4698_v36 = vpop.eup %4697  ;;  %4723 = vpow2.f32 %v4310_v25  ;;  %v3780_v18 = vadd.f32 1.0, %v4696_v37 }
 0x3bd   :  { %v4700_v41 = vpop.eup %4699  ;;  %4725 = vrcp.f32 %v3789_v2  ;;  %v3791_v31 = vadd.f32 1.0, %v4698_v36 }
 0x3be   :  { %v4702_v39 = vpop.eup %4701  ;;  %4727 = vpow2.f32 %v4325_v3  ;;  %v3775_v35 = vadd.f32 1.0, %v4700_v41 }
 0x3bf   :  { %v4704_v34 = vpop.eup %4703  ;;  %4729 = vrcp.f32 %v3791_v31  ;;  %v3833_v43 = vmul.f32 %v4702_v39, %v6715_v19 }
 0x3c0   :  { %v4706_v20 = vpop.eup %4705  ;;  %4731 = vpow2.f32 %v4320_v42  ;;  %v3834_v28 = vmul.f32 %v4704_v34, %v6719_v17 }
 0x3c1   :  { %v4708_v60 = vpop.eup %4707  ;;  %4733 = vrcp.f32 %v3781_v12 }
 0x3c2   :  { %v4710_v57 = vpop.eup %4709  ;;  %4735 = vrcp.f32 %v3780_v18 }
 0x3c3   :  { %v4712_v26 = vpop.eup %4711  ;;  %4737 = vrcp.f32 %v3776_v7  ;;  %v3843_v63 = vmul.f32 %v4710_v57, %v6745_v29  ;;  %v3839_v29 = vmul.f32 %v4708_v60, %v6737_v33 }
 0x3c4   :  { %v4714_v55 = vpop.eup %4713  ;;  %4739 = vrcp.f32 %v3775_v35 }
 0x3c5   :  { %v4716_v30 = vpop.eup %4715  ;;  %v3844_v48 = vmul.f32 %v4714_v55, %v6758_v58  ;;  %v3845_v58 = vmul.f32 %v4712_v26, %v6753_v32 }
 0x3c6   :  { %v4718_v61 = vpop.eup %4717 }
 0x3c7   :  { %v4720_v50 = vpop.eup %4719  ;;  %v3848_v49 = vmul.f32 %v4718_v61, %v6771_v21  ;;  %v3846_v21 = vmul.f32 %v4716_v30, %v6766_v15 }
 0x3c8   :  { %v4722_v24 = vpop.eup %4721  ;;  %v3782_v40 = vadd.f32 1.0, %v4720_v50 }
 0x3c9   :  { %v4724_v0 = vpop.eup %4723  ;;  %v3850_v46 = vmul.f32 %v4722_v24, %v6776_v23 }
 0x3ca   :  { %v4726_v59 = vpop.eup %4725  ;;  %v3777_v9 = vadd.f32 1.0, %v4724_v0 }
 0x3cb   :  { %v4728_v56 = vpop.eup %4727  ;;  %v3849_v53 = vmul.f32 %v4726_v59, %v6784_v13 }
 0x3cc   :  { %v4730_v27 = vpop.eup %4729  ;;  %v3792_v8 = vadd.f32 1.0, %v4728_v56 }
 0x3cd   :  { %v4732_v54 = vpop.eup %4731  ;;  %3887 = vmatprep.subr.mxu0 %v3849_v53  ;;  %v3851_v11 = vmul.f32 %v4730_v27, %v6789_v14  ;;  %v3838_v14 = vmul.f32 %v4706_v20, %v6728_v5  ;;  %v3853_v5 = vld [vmem:[%s6872_s10] sm:$0x7f] }
 0x3ce   :  { %v4734_v47 = vpop.eup %4733  ;;  %4741 = vrcp.f32 %v3792_v8  ;;  %v3787_v51 = vadd.f32 1.0, %v4732_v54  ;;  %3888 = vmatpush1.msra.mxu0 %v3848_v49 }
 0x3cf   :  { %v4736_v13 = vpop.eup %4735  ;;  %4743 = vrcp.f32 %v3782_v40  ;;  %3958 = vmatprep.subr.mxu1 %v3851_v11  ;;  %3889 = vmatprep.subr.mxu0 %v3844_v48  ;;  %v3841_v25 = vmul.f32 %v4734_v47, %v6762_v62 }
 0x3d0   :  { %v4738_v44 = vpop.eup %4737  ;;  %4745 = vrcp.f32 %v3787_v51  ;;  %3959 = vmatpush1.msra.mxu1 %v3850_v46  ;;  %3890 = vmatpush1.msra.mxu0 %v3843_v63  ;;  %v3840_v15 = vmul.f32 %v4736_v13, %v6750_v52 }
 0x3d1   :  { %v4740_v23 = vpop.eup %4739  ;;  %3960 = vmatprep.subr.mxu1 %v3846_v21  ;;  %3891 = vmatprep.subr.mxu0 %v3839_v29  ;;  %4747 = vrcp.f32 %v3777_v9  ;;  %v3836_v33 = vmul.f32 %v4738_v44, %v6732_v16 }
 0x3d2   :  { %3961 = vmatpush1.msra.mxu1 %v3845_v58  ;;  %3892 = vmatpush1.msra.mxu0 %v3838_v14  ;;  %v3835_v32 = vmul.f32 %v4740_v23, %v6780_v22 }
 0x3d3   :  { %3962 = vmatprep.subr.mxu1 %v3841_v25  ;;  %3893 = vmatprep.subr.mxu0 %v3834_v28 }
 0x3d4   :  { %3963 = vmatpush1.msra.mxu1 %v3840_v15  ;;  %3894 = vmatpush1.msra.mxu0 %v3833_v43 }
 0x3d5   :  { %3964 = vmatprep.subr.mxu1 %v3836_v33  ;;  %4326 = vmatmul.mubr.msk.f32.vlgmr.msra.gmra.mxu0 %vm3393_vm12, %v3853_v5 }
 0x3d6   :  { %3965 = vmatpush1.msra.mxu1 %v3835_v32  ;;  %4402 = vmatprep.subr.mxu0 %v6928_v6 }
 0x3d7   :  { %4327 = vmatmul.mubr.msk.f32.vlgmr.msra.gmra.mxu1 %vm3393_vm12, %v3853_v5  ;;  %4410 = vmatprep.mubr.msk.f32.mxu0 %vm4786_vm8, %v6928_v6 }
 0x3db   :  { %v4742_v19 = vpop.eup %4741 }
 0x3dc   :  { %v4744_v17 = vpop.eup %4743  ;;  %v3852_v52 = vmul.f32 %v4742_v19, %v6807_v38  ;;  %v4755_v38 = vld [vmem:[%s6862_s0] sm:$0x1f]  ;;  %s4787_s0 = smov [#allocation2]  }
 0x3dd   :  { %v4746_v16 = vpop.eup %4745  ;;  %v3842_v1 = vmul.f32 %v4744_v17, %v6798_v4  ;;  %s4125_s13 = sshll.u32 %s4787_s0, 4  ;;  %s4126_s13 = int_to_ptr.vmem [resolvable:$true] %s4125_s13 }
 0x3de   :  { %v3847_v62 = vmul.f32 %v4746_v16, %v6811_v45  ;;  %4403 = vmatpush3.msra.mxu0 %v3852_v52  ;;  %v4748_v22 = vpop.eup %4747  ;;  %v4075_v45 = vmul.f32 2.0, %v4755_v38  ;;  %s4756_s14 = scalar_lea.vmem %s4126_s13, 640  ;;  %p4761_p1 = scmp.lt.s32.totalorder %s4126_s13, %s4126_s13 }
 0x3df   :  { %4404 = vmatprep.subr.mxu0 %v6928_v6  ;;  %v3837_v3 = vmul.f32 %v4748_v22, %v6802_v10  ;;  %v6960_v10 = vld [vmem:[#allocation5_spill] sm:$0xff]  ;;  %p4757_p0 = scmp.ne.s32.totalorder %s4126_s13, %s4756_s14  ;;  %p4762_p2 = scmp.lt.s32.totalorder %s4756_s14, %s4756_s14 }
 0x3e0   :  { %4405 = vmatpush3.msra.mxu0 %v3847_v62  ;;  %v4076_v37 = vmul.f32 3.218876, %v4075_v45  ;;  %v6961_v12 = vsub.s32 0, %v6960_v10  ;;  %v6962_v34 = vsub.s32 2, %v6960_v10  ;;  %v6963_v20 = vsub.s32 1, %v6960_v10 }
 0x3e1   :  { %4406 = vmatprep.subr.mxu0 %v6928_v6  ;;  %v6964_v61 = vsub.s32 3, %v6960_v10  ;;  %v6965_v53 = vsub.s32 4, %v6960_v10  ;;  %p4763_p3 = por %p4762_p2, %p4761_p1 }
 0x3e2   :  { %4407 = vmatpush3.msra.mxu0 %v3842_v1  ;;  %v4077_v2 = vmul.f32 1.442695, %v4076_v37 }
 0x3e3   :  { %4408 = vmatprep.subr.mxu0 %v6928_v6  ;;  %v3858_v6 = vpop.permute.xlu0 %3857  ;;  %p4764_p4 = pnand %p4763_p3, %p4757_p0 }
 0x3e4   :  { %4409 = vmatpush3.msra.mxu0 %v3837_v3  ;;  %4749 = vpow2.f32 %v4077_v2 }
 0x3e5   :  { %4411 = vmatmul.mubr.msk.f32.vlgmr.msra.gmra.mxu0 %vm3393_vm12, %v3853_v5 }
 0x3f1   :  { %v4750_v4 = vpop.eup %4749 }
 0x3f2   :  { %v4329_v36 = vadd.f32 -1.0, %v4750_v4 }
 0x3f4   :  { %v4081_v42 = vmul.f32 0.15533373, %v4329_v36 }
 0x3f6   :  { %4751 = vrsqrt.f32 %v4081_v42 }
 0x403   :  { %v4752_v41 = vpop.eup %4751 }
 0x404   :  { %v4087_v31 = vrot.slane %v4752_v41, %v6961_v12  ;;  %v4095_v7 = vrot.slane %v4752_v41, %v6962_v34  ;;  %v4091_v35 = vrot.slane %v4752_v41, %v6963_v20  ;;  %v4099_v50 = vrot.slane %v4752_v41, %v6964_v61 }
 0x405   :  { %v4103_v27 = vrot.slane %v4752_v41, %v6965_v53 }
 0x495   :  { %v3929_v39 = vpop.f32.mrf.mxu0 }
 0x496   :  { %v3930_v18 = vadd.f32 %v3929_v39, %v3858_v6 }
 0x497   :  { %v4000_v60 = vpop.f32.mrf.mxu1  ;;  %v3931_v57 = vpop.f32.mrf.mxu0 }
 0x498   :  { %v4109_v26 = vmul.f32 %v4087_v31, %v3930_v18  ;;  %v4001_v55 = vadd.f32 %v4000_v60, %v3858_v6  ;;  %v3932_v30 = vadd.f32 %v3931_v57, %v3858_v6 }
 0x499   :  { %v4002_v24 = vpop.f32.mrf.mxu1 }
 0x49a   :  { %4114 = vst [vmem:[#allocation2] sm:$0x7f] %v4109_v26  ;;  %v4111_v0 = vmul.f32 %v4095_v7, %v4001_v55  ;;  %v4110_v59 = vmul.f32 %v4091_v35, %v3932_v30  ;;  %v4003_v56 = vadd.f32 %v4002_v24, %v3858_v6 }
 0x49c   :  { %4116 = vst [vmem:[#allocation2 + $0x10] sm:$0x7f] %v4111_v0  ;;  %4115 = vst [vmem:[#allocation2 + $0x8] sm:$0x7f] %v4110_v59  ;;  %v4112_v40 = vmul.f32 %v4099_v50, %v4003_v56 }
 0x49e   :  { %4117 = vst [vmem:[#allocation2 + $0x18] sm:$0x7f] %v4112_v40 }
 0x4a5   :  { %v4071_v49 = vpop.f32.mrf.mxu0 }
 0x4a6   :  { %v4072_v8 = vadd.f32 %v4071_v49, %v3858_v6 }
 0x4a7   :  { %v4412_v54 = vpop.f32.mrf.mxu0 }
 0x4a8   :  { %v4113_v63 = vmul.f32 %v4103_v27, %v4072_v8 }
 0x4aa   :  { %4118 = vst [vmem:[#allocation2 + $0x20] sm:$0x7f] %v4113_v63 }
 0x4ab   :  { %4767 = shalt.err (!%p4764_p4)
}
 0x4ac   :  { %4128 = dma.vmem_to_hbm [thread:$0]  %s4126_s13, 640, %s6874_s12, [#allocation3]  }
 0x4ad   :  { %4776 = dma.done.wait [#allocation3], 640  }
 0x4ae   :  { %4777 = vsyncadd [#allocation3], 4294966656 }
 0x4af   :  { %4132 = vsyncpa [#allocation3], 1 }

</bundles_post_ra>
